<compile_context>
chip_gen: v7x
topology: tpu7x:2x2x1
jax: 0.10.0
libtpu: 0.0.40
codegen_flags: <defaults>
</compile_context>

<pallas_src>
import functools

import jax
import jax.numpy as jnp
from jax.experimental import pallas as pl
from jax.experimental.pallas import tpu as pltpu


_OFFSETS_3X3 = tuple((dh - 1, dw - 1) for dh in range(3) for dw in range(3))


# ----------------------------------------------------------------------------
# Generic fused kernel:
#   [optional per-channel scale/shift + SiLU]  ->  multi-tap conv as ONE matmul
#   (+ optional non-normalized auxiliary input folded in as extra K rows)
#   also emits per-channel sum / sum-of-squares of the output (for the next GroupNorm).
# ----------------------------------------------------------------------------
def _make_tap_conv_kernel(offsets, img_w, fuse_norm, has_aux):
    num_taps = len(offsets)

    def kernel(*refs):
        a_scr = refs[-1]                               # (K, HW) VMEM scratch (matmul operand)
        o_ref, s_ref, ss_ref = refs[-4], refs[-3], refs[-2]
        it = iter(refs[:-4])
        x_ref = next(it)
        if fuse_norm:
            sc_ref = next(it)
            sh_ref = next(it)
        m_ref = next(it)
        w_ref = next(it)
        b_ref = next(it)
        r_ref = next(it) if has_aux else None

        cin = x_ref.shape[1]
        hw = x_ref.shape[2]

        x = x_ref[0].astype(jnp.float32)               # (Cin, HW), HW on lanes
        if fuse_norm:
            # GroupNorm folded into per-(sample, channel) scale/shift, then SiLU (EUP).
            y = x * sc_ref[0] + sh_ref[0]
            x = y * jax.nn.sigmoid(y)

        # Build the (T*Cin, HW) tap operand in VMEM: shifted copies of x with boundary
        # positions zeroed (this reproduces the zero padding of the conv input).
        for t, (dy, dx) in enumerate(offsets):
            off = dy * img_w + dx
            if off == 0:
                tap = x
            elif off > 0:
                tap = jnp.concatenate(
                    [x[:, off:], jnp.zeros((cin, off), jnp.float32)], axis=1
                ) * m_ref[t:t + 1, :]
            else:
                tap = jnp.concatenate(
                    [jnp.zeros((cin, -off), jnp.float32), x[:, :hw + off]], axis=1
                ) * m_ref[t:t + 1, :]
            a_scr[t * cin:(t + 1) * cin, :] = tap

        if has_aux:
            caux = r_ref.shape[1]
            a_scr[num_taps * cin:num_taps * cin + caux, :] = r_ref[0].astype(jnp.float32)

        # Single MXU matmul with all taps (and the optional residual input) folded into K.
        acc = jnp.dot(w_ref[...], a_scr[...], preferred_element_type=jnp.float32)
        acc = acc + b_ref[...]                          # (Cout, 1) broadcast over lanes
        o_ref[0] = acc.astype(o_ref.dtype)

        # Per-channel stats of the produced activation (consumed by the next GroupNorm),
        # saving an extra HBM pass over the activation.
        s_ref[0] = jnp.sum(acc, axis=1, keepdims=True)
        ss_ref[0] = jnp.sum(acc * acc, axis=1, keepdims=True)

    return kernel


def _tap_masks(h, w, offsets):
    hh = jnp.arange(h)[:, None]
    ww = jnp.arange(w)[None, :]
    ms = []
    for dy, dx in offsets:
        m = (hh + dy >= 0) & (hh + dy < h) & (ww + dx >= 0) & (ww + dx < w)
        ms.append(m.reshape(1, h * w))
    return jnp.concatenate(ms, axis=0).astype(jnp.float32)      # (T, H*W)


def tap_conv(x, w2, b, masks, offsets, img_w, scale=None, shift=None, aux=None):
    """x: (N, Cin, HW); w2: (Cout, K); b: (Cout,); masks: (T, HW).

    Returns (out (N, Cout, HW), chan_sum (N, Cout, 1), chan_sumsq (N, Cout, 1))."""
    n, cin, hw = x.shape
    co, k_total = w2.shape
    fuse_norm = scale is not None
    has_aux = aux is not None

    in_specs = [pl.BlockSpec((1, cin, hw), lambda i: (i, 0, 0))]
    args = [x]
    if fuse_norm:
        in_specs += [pl.BlockSpec((1, cin, 1), lambda i: (i, 0, 0)),
                     pl.BlockSpec((1, cin, 1), lambda i: (i, 0, 0))]
        args += [scale, shift]
    in_specs += [pl.BlockSpec((len(offsets), hw), lambda i: (0, 0)),
                 pl.BlockSpec((co, k_total), lambda i: (0, 0)),
                 pl.BlockSpec((co, 1), lambda i: (0, 0))]
    args += [masks, w2, b.reshape(co, 1)]
    if has_aux:
        caux = aux.shape[1]
        in_specs.append(pl.BlockSpec((1, caux, hw), lambda i: (i, 0, 0)))
        args.append(aux)

    out, s, ss = pl.pallas_call(
        _make_tap_conv_kernel(offsets, img_w, fuse_norm, has_aux),
        out_shape=(jax.ShapeDtypeStruct((n, co, hw), x.dtype),
                   jax.ShapeDtypeStruct((n, co, 1), jnp.float32),
                   jax.ShapeDtypeStruct((n, co, 1), jnp.float32)),
        grid_spec=pltpu.PrefetchScalarGridSpec(
            num_scalar_prefetch=0,
            grid=(n,),
            in_specs=in_specs,
            out_specs=(pl.BlockSpec((1, co, hw), lambda i: (i, 0, 0)),
                       pl.BlockSpec((1, co, 1), lambda i: (i, 0, 0)),
                       pl.BlockSpec((1, co, 1), lambda i: (i, 0, 0))),
            scratch_shapes=[pltpu.VMEM((k_total, hw), jnp.float32)],
        ),
        compiler_params=pltpu.CompilerParams(
            dimension_semantics=("parallel",),          # batch axis -> megacore on v7x
            vmem_limit_bytes=32 * 1024 * 1024),
    )(*args)
    return out, s, ss


# ----------------------------------------------------------------------------
# Weight preparation (pure JAX glue)
# ----------------------------------------------------------------------------
def _conv3x3_weight_2d(w_oihw):
    co, ci, _, _ = w_oihw.shape
    return jnp.transpose(w_oihw, (0, 2, 3, 1)).reshape(co, 9 * ci)   # K index = tap*Ci + ci


def _build_up_weight(w_iohw):
    """ConvTranspose2d(k=4,s=2,p=1) weight (Cin, Cout, 4, 4) -> 4-phase packed (4*Cout, 9*Cin).

    Phase p = 2*py+px produces output pixels (2m+py, 2n+px); it is a 2x2 conv whose taps are a
    subset of the 3x3 offsets; unused taps get zero weight so all phases share one operand."""
    cin, cout, _, _ = w_iohw.shape
    w_up = jnp.zeros((4 * cout, 9 * cin), w_iohw.dtype)
    for py in range(2):
        for px in range(2):
            p = py * 2 + px
            for a in range(2):
                for b in range(2):
                    dy, dx = py + a - 1, px + b - 1
                    t = (dy + 1) * 3 + (dx + 1)
                    khi, kwi = (3 - py) - 2 * a, (3 - px) - 2 * b
                    blk = jnp.transpose(w_iohw[:, :, khi, kwi], (1, 0))   # (cout, cin)
                    w_up = w_up.at[p * cout:(p + 1) * cout, t * cin:(t + 1) * cin].set(blk)
    return w_up


def conv_transpose_up2(x_flat, h, w, w_iohw, b):
    """(N, C, H*W) -> (up_flat (N, C, 4*H*W), chan_sum (N, C), chan_sumsq (N, C))."""
    n, c, hw = x_flat.shape
    w_up = _build_up_weight(w_iohw)
    b_up = jnp.tile(b, 4)
    masks = _tap_masks(h, w, _OFFSETS_3X3)
    out4, s4, ss4 = tap_conv(x_flat, w_up, b_up, masks, _OFFSETS_3X3, w)
    # Interleave the 4 phases into (N, C, 2H, 2W)  (pure layout glue, one pass).
    ph = out4.reshape(n, 2, 2, c, h, w)
    up = jnp.transpose(ph, (0, 3, 4, 1, 5, 2)).reshape(n, c, 2 * h, 2 * w)
    s = s4.reshape(n, 4, c).sum(axis=1)
    ss = ss4.reshape(n, 4, c).sum(axis=1)
    return up.reshape(n, c, 4 * hw), s, ss


# ----------------------------------------------------------------------------
# GroupNorm scale/shift from per-channel stats (tiny per-sample math, hoisted out of Pallas)
# ----------------------------------------------------------------------------
def _gn_scale_shift(chan_sum, chan_sumsq, count, num_groups, gamma, beta, eps=1e-5):
    n, c = chan_sum.shape
    g = num_groups
    cpg = c // g
    cnt = float(count * cpg)
    sg = chan_sum.reshape(n, g, cpg).sum(axis=2)
    ssg = chan_sumsq.reshape(n, g, cpg).sum(axis=2)
    mean = sg / cnt
    # TODO(synk): single-pass E[x^2]-mean^2 can cancel for very large-mean activations;
    #             adequate in f32 at these magnitudes (clamped at 0 for safety).
    var = jnp.maximum(ssg / cnt - mean * mean, 0.0)
    rstd = jax.lax.rsqrt(var + eps)
    mean_c = jnp.repeat(mean, cpg, axis=1)
    rstd_c = jnp.repeat(rstd, cpg, axis=1)
    scale = rstd_c * gamma[None, :]
    shift = beta[None, :] - mean_c * scale
    return scale.reshape(n, c, 1), shift.reshape(n, c, 1)


# ----------------------------------------------------------------------------
# UpBlock parameters + forward
# ----------------------------------------------------------------------------
def init_upblock_params(key, in_ch, out_ch, num_layers):
    params = {}

    def nxt():
        nonlocal key
        key, sub = jax.random.split(key)
        return sub

    params["up_w"] = 0.1 * jax.random.normal(nxt(), (in_ch, in_ch, 4, 4), jnp.float32)
    params["up_b"] = 0.1 * jax.random.normal(nxt(), (in_ch,), jnp.float32)
    for i in range(num_layers):
        cin = in_ch if i == 0 else out_ch
        params[f"gn1_{i}_g"] = 1.0 + 0.05 * jax.random.normal(nxt(), (cin,), jnp.float32)
        params[f"gn1_{i}_b"] = 0.05 * jax.random.normal(nxt(), (cin,), jnp.float32)
        params[f"conv1_{i}_w"] = 0.1 * jax.random.normal(nxt(), (out_ch, cin, 3, 3), jnp.float32)
        params[f"conv1_{i}_b"] = 0.1 * jax.random.normal(nxt(), (out_ch,), jnp.float32)
        params[f"gn2_{i}_g"] = 1.0 + 0.05 * jax.random.normal(nxt(), (out_ch,), jnp.float32)
        params[f"gn2_{i}_b"] = 0.05 * jax.random.normal(nxt(), (out_ch,), jnp.float32)
        params[f"conv2_{i}_w"] = 0.1 * jax.random.normal(nxt(), (out_ch, out_ch, 3, 3), jnp.float32)
        params[f"conv2_{i}_b"] = 0.1 * jax.random.normal(nxt(), (out_ch,), jnp.float32)
        params[f"rconv_{i}_w"] = 0.1 * jax.random.normal(nxt(), (out_ch, cin, 1, 1), jnp.float32)
        params[f"rconv_{i}_b"] = 0.1 * jax.random.normal(nxt(), (out_ch,), jnp.float32)
    return params


def upblock_forward(x_nchw, params, num_layers, norm_channels):
    n, c_in, h, w = x_nchw.shape
    x_flat = x_nchw.reshape(n, c_in, h * w)            # stays channels-first (NCHW-native)

    out, s, ss = conv_transpose_up2(x_flat, h, w, params["up_w"], params["up_b"])
    h2, w2 = 2 * h, 2 * w
    hw2 = h2 * w2
    masks = _tap_masks(h2, w2, _OFFSETS_3X3)

    for i in range(num_layers):
        resnet_input = out
        # GroupNorm1 + SiLU fused into conv1 (stats came from the producing kernel).
        sc1, sh1 = _gn_scale_shift(s, ss, hw2, norm_channels,
                                   params[f"gn1_{i}_g"], params[f"gn1_{i}_b"])
        w1 = _conv3x3_weight_2d(params[f"conv1_{i}_w"])
        h1, s1, ss1 = tap_conv(out, w1, params[f"conv1_{i}_b"], masks, _OFFSETS_3X3, w2,
                               scale=sc1, shift=sh1)
        # GroupNorm2 + SiLU fused into conv2; the 1x1 residual conv + add are folded into
        # the same matmul (aux input bypasses normalization).
        sc2, sh2 = _gn_scale_shift(s1.reshape(n, -1), ss1.reshape(n, -1), hw2, norm_channels,
                                   params[f"gn2_{i}_g"], params[f"gn2_{i}_b"])
        w2m = _conv3x3_weight_2d(params[f"conv2_{i}_w"])
        wr = params[f"rconv_{i}_w"].reshape(params[f"rconv_{i}_w"].shape[0], -1)   # (Cout, Cin)
        w_full = jnp.concatenate([w2m, wr], axis=1)
        b_full = params[f"conv2_{i}_b"] + params[f"rconv_{i}_b"]
        out, s_new, ss_new = tap_conv(h1, w_full, b_full, masks, _OFFSETS_3X3, w2,
                                      scale=sc2, shift=sh2, aux=resnet_input)
        s, ss = s_new.reshape(n, -1), ss_new.reshape(n, -1)

    return out.reshape(n, out.shape[1], h2, w2)


# ----------------------------------------------------------------------------
# Pure-JAX reference (PyTorch semantics) for numerical validation
# ----------------------------------------------------------------------------
def _ref_conv(x, w_oihw, b, padding):
    y = jax.lax.conv_general_dilated(
        x, w_oihw, window_strides=(1, 1), padding=[(padding, padding)] * 2,
        dimension_numbers=("NCHW", "OIHW", "NCHW"))
    return y + b.reshape(1, -1, 1, 1)


def _ref_conv_transpose(x, w_iohw, b):
    w_eq = jnp.transpose(w_iohw[:, :, ::-1, ::-1], (1, 0, 2, 3))   # flipped, in/out swapped
    y = jax.lax.conv_general_dilated(
        x, w_eq, window_strides=(1, 1), padding=[(2, 2), (2, 2)],
        lhs_dilation=(2, 2), dimension_numbers=("NCHW", "OIHW", "NCHW"))
    return y + b.reshape(1, -1, 1, 1)


def _ref_gn_silu(x, gamma, beta, groups, eps=1e-5):
    n, c, h, w = x.shape
    xg = x.reshape(n, groups, c // groups, h, w)
    mean = xg.mean(axis=(2, 3, 4), keepdims=True)
    var = ((xg - mean) ** 2).mean(axis=(2, 3, 4), keepdims=True)
    xn = ((xg - mean) / jnp.sqrt(var + eps)).reshape(n, c, h, w)
    y = xn * gamma.reshape(1, c, 1, 1) + beta.reshape(1, c, 1, 1)
    return y * jax.nn.sigmoid(y)


def upblock_reference(x, params, num_layers, norm_channels):
    out = _ref_conv_transpose(x, params["up_w"], params["up_b"])
    for i in range(num_layers):
        resnet_input = out
        hdn = _ref_gn_silu(out, params[f"gn1_{i}_g"], params[f"gn1_{i}_b"], norm_channels)
        hdn = _ref_conv(hdn, params[f"conv1_{i}_w"], params[f"conv1_{i}_b"], 1)
        hdn = _ref_gn_silu(hdn, params[f"gn2_{i}_g"], params[f"gn2_{i}_b"], norm_channels)
        hdn = _ref_conv(hdn, params[f"conv2_{i}_w"], params[f"conv2_{i}_b"], 1)
        res = _ref_conv(resnet_input, params[f"rconv_{i}_w"], params[f"rconv_{i}_b"], 0)
        out = hdn + res
    return out


if __name__ == "__main__":
    B, IN_CH, OUT_CH, H, W = 2, 8, 16, 8, 8
    NUM_LAYERS, NORM_CH = 2, 4

    key = jax.random.PRNGKey(0)
    kx, kp = jax.random.split(key)
    x = jax.random.normal(kx, (B, IN_CH, H, W), jnp.float32)       # NCHW, like PyTorch
    params = init_upblock_params(kp, IN_CH, OUT_CH, NUM_LAYERS)

    fwd = jax.jit(functools.partial(upblock_forward,
                                    num_layers=NUM_LAYERS, norm_channels=NORM_CH))
    out = jax.block_until_ready(fwd(x, params))

    assert out.shape == (B, OUT_CH, 2 * H, 2 * W), out.shape
    ref = upblock_reference(x, params, NUM_LAYERS, NORM_CH)
    max_err = float(jnp.max(jnp.abs(out - ref)))
    assert max_err < 1e-2, f"max abs error too large: {max_err}"

    print("KERNEL_OK")
</pallas_src>

<mosaic_0001>
module attributes {stable_mosaic.version = 11 : i64} {
  func.func @kernel(%arg0: i32, %arg1: memref<1x8x64xf32, #tpu.memory_space<vmem>>, %arg2: memref<9x64xf32, #tpu.memory_space<vmem>>, %arg3: memref<32x72xf32, #tpu.memory_space<vmem>>, %arg4: memref<32x1xf32, #tpu.memory_space<vmem>>, %arg5: memref<1x32x64xf32, #tpu.memory_space<vmem>>, %arg6: memref<1x32x1xf32, #tpu.memory_space<vmem>>, %arg7: memref<1x32x1xf32, #tpu.memory_space<vmem>>, %arg8: memref<72x64xf32, #tpu.memory_space<vmem>>) attributes {dimension_semantics = [#tpu.dimension_semantics<parallel>], iteration_bounds = array<i64: 2>, scalar_prefetch = 0 : i64, scratch_operands = 1 : i64, tpu.core_type = #tpu.core_type<tc>, window_params = [{transform_indices = @transform_0, window_bounds = array<i64: 1, 8, 64>}, {pipeline_mode = #tpu.pipeline_mode<synchronous>, transform_indices = @transform_1, window_bounds = array<i64: 9, 64>}, {pipeline_mode = #tpu.pipeline_mode<synchronous>, transform_indices = @transform_2, window_bounds = array<i64: 32, 72>}, {pipeline_mode = #tpu.pipeline_mode<synchronous>, transform_indices = @transform_3, window_bounds = array<i64: 32, 1>}, {transform_indices = @transform_4, window_bounds = array<i64: 1, 32, 64>}, {transform_indices = @transform_5, window_bounds = array<i64: 1, 32, 1>}, {transform_indices = @transform_6, window_bounds = array<i64: 1, 32, 1>}]} {
    %c0 = arith.constant 0 : index
    %c0_0 = arith.constant 0 : index
    %c0_1 = arith.constant 0 : index
    %0 = vector.load %arg1[%c0, %c0_0, %c0_1] : memref<1x8x64xf32, #tpu.memory_space<vmem>>, vector<1x8x64xf32>
    %1 = vector.shape_cast %0 : vector<1x8x64xf32> to vector<8x64xf32>
    %cst = arith.constant 0.000000e+00 : f32
    %2 = vector.broadcast %cst : f32 to vector<8x9xf32>
    %3 = vector.extract_strided_slice %1 {offsets = [0, 0], sizes = [8, 55], strides = [1, 1]} : vector<8x64xf32> to vector<8x55xf32>
    %4 = tpu.concatenate %2, %3 in 1 : vector<8x9xf32>, vector<8x55xf32> -> vector<8x64xf32>
    %c0_2 = arith.constant 0 : index
    %c0_3 = arith.constant 0 : index
    %5 = vector.load %arg2[%c0_2, %c0_3] : memref<9x64xf32, #tpu.memory_space<vmem>>, vector<1x64xf32>
    %6 = vector.broadcast %5 : vector<1x64xf32> to vector<8x64xf32>
    %7 = arith.mulf %4, %6 : vector<8x64xf32>
    %c0_4 = arith.constant 0 : index
    %c0_5 = arith.constant 0 : index
    %8 = vector.load %arg8[%c0_4, %c0_5] : memref<72x64xf32, #tpu.memory_space<vmem>>, vector<8x64xf32>
    tpu.vector_store %arg8[%c0_4, %c0_5], %7 {strides = array<i32>} : memref<72x64xf32, #tpu.memory_space<vmem>>, vector<8x64xf32>,
    %cst_6 = arith.constant 0.000000e+00 : f32
    %9 = vector.broadcast %cst_6 : f32 to vector<8x8xf32>
    %10 = vector.extract_strided_slice %1 {offsets = [0, 0], sizes = [8, 56], strides = [1, 1]} : vector<8x64xf32> to vector<8x56xf32>
    %11 = tpu.concatenate %9, %10 in 1 : vector<8x8xf32>, vector<8x56xf32> -> vector<8x64xf32>
    %c1 = arith.constant 1 : index
    %c0_7 = arith.constant 0 : index
    %12 = vector.load %arg2[%c1, %c0_7] : memref<9x64xf32, #tpu.memory_space<vmem>>, vector<1x64xf32>
    %13 = vector.broadcast %12 : vector<1x64xf32> to vector<8x64xf32>
    %14 = arith.mulf %11, %13 : vector<8x64xf32>
    %c8 = arith.constant 8 : index
    %c0_8 = arith.constant 0 : index
    %15 = vector.load %arg8[%c8, %c0_8] : memref<72x64xf32, #tpu.memory_space<vmem>>, vector<8x64xf32>
    tpu.vector_store %arg8[%c8, %c0_8], %14 {strides = array<i32>} : memref<72x64xf32, #tpu.memory_space<vmem>>, vector<8x64xf32>,
    %cst_9 = arith.constant 0.000000e+00 : f32
    %16 = vector.broadcast %cst_9 : f32 to vector<8x7xf32>
    %17 = vector.extract_strided_slice %1 {offsets = [0, 0], sizes = [8, 57], strides = [1, 1]} : vector<8x64xf32> to vector<8x57xf32>
    %18 = tpu.concatenate %16, %17 in 1 : vector<8x7xf32>, vector<8x57xf32> -> vector<8x64xf32>
    %c2 = arith.constant 2 : index
    %c0_10 = arith.constant 0 : index
    %19 = vector.load %arg2[%c2, %c0_10] : memref<9x64xf32, #tpu.memory_space<vmem>>, vector<1x64xf32>
    %20 = vector.broadcast %19 : vector<1x64xf32> to vector<8x64xf32>
    %21 = arith.mulf %18, %20 : vector<8x64xf32>
    %c16 = arith.constant 16 : index
    %c0_11 = arith.constant 0 : index
    %22 = vector.load %arg8[%c16, %c0_11] : memref<72x64xf32, #tpu.memory_space<vmem>>, vector<8x64xf32>
    tpu.vector_store %arg8[%c16, %c0_11], %21 {strides = array<i32>} : memref<72x64xf32, #tpu.memory_space<vmem>>, vector<8x64xf32>,
    %cst_12 = arith.constant 0.000000e+00 : f32
    %23 = vector.broadcast %cst_12 : f32 to vector<8x1xf32>
    %24 = vector.extract_strided_slice %1 {offsets = [0, 0], sizes = [8, 63], strides = [1, 1]} : vector<8x64xf32> to vector<8x63xf32>
    %25 = tpu.concatenate %23, %24 in 1 : vector<8x1xf32>, vector<8x63xf32> -> vector<8x64xf32>
    %c3 = arith.constant 3 : index
    %c0_13 = arith.constant 0 : index
    %26 = vector.load %arg2[%c3, %c0_13] : memref<9x64xf32, #tpu.memory_space<vmem>>, vector<1x64xf32>
    %27 = vector.broadcast %26 : vector<1x64xf32> to vector<8x64xf32>
    %28 = arith.mulf %25, %27 : vector<8x64xf32>
    %c24 = arith.constant 24 : index
    %c0_14 = arith.constant 0 : index
    %29 = vector.load %arg8[%c24, %c0_14] : memref<72x64xf32, #tpu.memory_space<vmem>>, vector<8x64xf32>
    tpu.vector_store %arg8[%c24, %c0_14], %28 {strides = array<i32>} : memref<72x64xf32, #tpu.memory_space<vmem>>, vector<8x64xf32>,
    %c32 = arith.constant 32 : index
    %c0_15 = arith.constant 0 : index
    %30 = vector.load %arg8[%c32, %c0_15] : memref<72x64xf32, #tpu.memory_space<vmem>>, vector<8x64xf32>
    tpu.vector_store %arg8[%c32, %c0_15], %1 {strides = array<i32>} : memref<72x64xf32, #tpu.memory_space<vmem>>, vector<8x64xf32>,
    %31 = vector.extract_strided_slice %1 {offsets = [0, 1], sizes = [8, 63], strides = [1, 1]} : vector<8x64xf32> to vector<8x63xf32>
    %cst_16 = arith.constant 0.000000e+00 : f32
    %32 = vector.broadcast %cst_16 : f32 to vector<8x1xf32>
    %33 = tpu.concatenate %31, %32 in 1 : vector<8x63xf32>, vector<8x1xf32> -> vector<8x64xf32>
    %c5 = arith.constant 5 : index
    %c0_17 = arith.constant 0 : index
    %34 = vector.load %arg2[%c5, %c0_17] : memref<9x64xf32, #tpu.memory_space<vmem>>, vector<1x64xf32>
    %35 = vector.broadcast %34 : vector<1x64xf32> to vector<8x64xf32>
    %36 = arith.mulf %33, %35 : vector<8x64xf32>
    %c40 = arith.constant 40 : index
    %c0_18 = arith.constant 0 : index
    %37 = vector.load %arg8[%c40, %c0_18] : memref<72x64xf32, #tpu.memory_space<vmem>>, vector<8x64xf32>
    tpu.vector_store %arg8[%c40, %c0_18], %36 {strides = array<i32>} : memref<72x64xf32, #tpu.memory_space<vmem>>, vector<8x64xf32>,
    %38 = vector.extract_strided_slice %1 {offsets = [0, 7], sizes = [8, 57], strides = [1, 1]} : vector<8x64xf32> to vector<8x57xf32>
    %cst_19 = arith.constant 0.000000e+00 : f32
    %39 = vector.broadcast %cst_19 : f32 to vector<8x7xf32>
    %40 = tpu.concatenate %38, %39 in 1 : vector<8x57xf32>, vector<8x7xf32> -> vector<8x64xf32>
    %c6 = arith.constant 6 : index
    %c0_20 = arith.constant 0 : index
    %41 = vector.load %arg2[%c6, %c0_20] : memref<9x64xf32, #tpu.memory_space<vmem>>, vector<1x64xf32>
    %42 = vector.broadcast %41 : vector<1x64xf32> to vector<8x64xf32>
    %43 = arith.mulf %40, %42 : vector<8x64xf32>
    %c48 = arith.constant 48 : index
    %c0_21 = arith.constant 0 : index
    %44 = vector.load %arg8[%c48, %c0_21] : memref<72x64xf32, #tpu.memory_space<vmem>>, vector<8x64xf32>
    tpu.vector_store %arg8[%c48, %c0_21], %43 {strides = array<i32>} : memref<72x64xf32, #tpu.memory_space<vmem>>, vector<8x64xf32>,
    %45 = vector.extract_strided_slice %1 {offsets = [0, 8], sizes = [8, 56], strides = [1, 1]} : vector<8x64xf32> to vector<8x56xf32>
    %cst_22 = arith.constant 0.000000e+00 : f32
    %46 = vector.broadcast %cst_22 : f32 to vector<8x8xf32>
    %47 = tpu.concatenate %45, %46 in 1 : vector<8x56xf32>, vector<8x8xf32> -> vector<8x64xf32>
    %c7 = arith.constant 7 : index
    %c0_23 = arith.constant 0 : index
    %48 = vector.load %arg2[%c7, %c0_23] : memref<9x64xf32, #tpu.memory_space<vmem>>, vector<1x64xf32>
    %49 = vector.broadcast %48 : vector<1x64xf32> to vector<8x64xf32>
    %50 = arith.mulf %47, %49 : vector<8x64xf32>
    %c56 = arith.constant 56 : index
    %c0_24 = arith.constant 0 : index
    %51 = vector.load %arg8[%c56, %c0_24] : memref<72x64xf32, #tpu.memory_space<vmem>>, vector<8x64xf32>
    tpu.vector_store %arg8[%c56, %c0_24], %50 {strides = array<i32>} : memref<72x64xf32, #tpu.memory_space<vmem>>, vector<8x64xf32>,
    %52 = vector.extract_strided_slice %1 {offsets = [0, 9], sizes = [8, 55], strides = [1, 1]} : vector<8x64xf32> to vector<8x55xf32>
    %cst_25 = arith.constant 0.000000e+00 : f32
    %53 = vector.broadcast %cst_25 : f32 to vector<8x9xf32>
    %54 = tpu.concatenate %52, %53 in 1 : vector<8x55xf32>, vector<8x9xf32> -> vector<8x64xf32>
    %c8_26 = arith.constant 8 : index
    %c0_27 = arith.constant 0 : index
    %55 = vector.load %arg2[%c8_26, %c0_27] : memref<9x64xf32, #tpu.memory_space<vmem>>, vector<1x64xf32>
    %56 = vector.broadcast %55 : vector<1x64xf32> to vector<8x64xf32>
    %57 = arith.mulf %54, %56 : vector<8x64xf32>
    %c64 = arith.constant 64 : index
    %c0_28 = arith.constant 0 : index
    %58 = vector.load %arg8[%c64, %c0_28] : memref<72x64xf32, #tpu.memory_space<vmem>>, vector<8x64xf32>
    tpu.vector_store %arg8[%c64, %c0_28], %57 {strides = array<i32>} : memref<72x64xf32, #tpu.memory_space<vmem>>, vector<8x64xf32>,
    %c0_29 = arith.constant 0 : index
    %c0_30 = arith.constant 0 : index
    %59 = vector.load %arg3[%c0_29, %c0_30] : memref<32x72xf32, #tpu.memory_space<vmem>>, vector<32x72xf32>
    %c0_31 = arith.constant 0 : index
    %c0_32 = arith.constant 0 : index
    %60 = vector.load %arg8[%c0_31, %c0_32] : memref<72x64xf32, #tpu.memory_space<vmem>>, vector<72x64xf32>
    %cst_33 = arith.constant dense<0.000000e+00> : vector<32x64xf32>
    %61 = tpu.matmul %59, %60, %cst_33 {dimension_numbers = #tpu.dot_dimension_numbers<[1], [0], [0], [1], [0, 0, 1, 1], [], []>} : vector<32x72xf32>, vector<72x64xf32>, vector<32x64xf32> -> vector<32x64xf32>
    %c0_34 = arith.constant 0 : index
    %c0_35 = arith.constant 0 : index
    %62 = vector.load %arg4[%c0_34, %c0_35] : memref<32x1xf32, #tpu.memory_space<vmem>>, vector<32x1xf32>
    %63 = vector.broadcast %62 : vector<32x1xf32> to vector<32x64xf32>
    %64 = arith.addf %61, %63 : vector<32x64xf32>
    %c0_36 = arith.constant 0 : index
    %c0_37 = arith.constant 0 : index
    %c0_38 = arith.constant 0 : index
    %65 = vector.load %arg5[%c0_36, %c0_37, %c0_38] : memref<1x32x64xf32, #tpu.memory_space<vmem>>, vector<1x32x64xf32>
    %66 = vector.shape_cast %65 : vector<1x32x64xf32> to vector<32x64xf32>
    %67 = vector.shape_cast %64 : vector<32x64xf32> to vector<1x32x64xf32>
    tpu.vector_store %arg5[%c0_36, %c0_37, %c0_38], %67 {strides = array<i32>} : memref<1x32x64xf32, #tpu.memory_space<vmem>>, vector<1x32x64xf32>,
    %cst_39 = arith.constant dense<0.000000e+00> : vector<32xf32>
    %68 = vector.multi_reduction <add>, %64, %cst_39 [1] : vector<32x64xf32> to vector<32xf32>
    %69 = vector.shape_cast %68 : vector<32xf32> to vector<32x1xf32>
    %c0_40 = arith.constant 0 : index
    %c0_41 = arith.constant 0 : index
    %c0_42 = arith.constant 0 : index
    %70 = vector.load %arg6[%c0_40, %c0_41, %c0_42] : memref<1x32x1xf32, #tpu.memory_space<vmem>>, vector<1x32x1xf32>
    %71 = vector.shape_cast %70 : vector<1x32x1xf32> to vector<32x1xf32>
    %72 = vector.shape_cast %69 : vector<32x1xf32> to vector<1x32x1xf32>
    tpu.vector_store %arg6[%c0_40, %c0_41, %c0_42], %72 {strides = array<i32>} : memref<1x32x1xf32, #tpu.memory_space<vmem>>, vector<1x32x1xf32>,
    %73 = arith.mulf %64, %64 : vector<32x64xf32>
    %cst_43 = arith.constant dense<0.000000e+00> : vector<32xf32>
    %74 = vector.multi_reduction <add>, %73, %cst_43 [1] : vector<32x64xf32> to vector<32xf32>
    %75 = vector.shape_cast %74 : vector<32xf32> to vector<32x1xf32>
    %c0_44 = arith.constant 0 : index
    %c0_45 = arith.constant 0 : index
    %c0_46 = arith.constant 0 : index
    %76 = vector.load %arg7[%c0_44, %c0_45, %c0_46] : memref<1x32x1xf32, #tpu.memory_space<vmem>>, vector<1x32x1xf32>
    %77 = vector.shape_cast %76 : vector<1x32x1xf32> to vector<32x1xf32>
    %78 = vector.shape_cast %75 : vector<32x1xf32> to vector<1x32x1xf32>
    tpu.vector_store %arg7[%c0_44, %c0_45, %c0_46], %78 {strides = array<i32>} : memref<1x32x1xf32, #tpu.memory_space<vmem>>, vector<1x32x1xf32>,
    return
  }
  func.func @transform_0(%arg0: i32) -> (i32, i32, i32) {
    %c0_i32 = arith.constant 0 : i32
    %c0_i32_0 = arith.constant 0 : i32
    %c0_i32_1 = arith.constant 0 : i32
    return %arg0, %c0_i32, %c0_i32_0 : i32, i32, i32
  }
  func.func @transform_1(%arg0: i32) -> (i32, i32) {
    %c0_i32 = arith.constant 0 : i32
    %c0_i32_0 = arith.constant 0 : i32
    %c0_i32_1 = arith.constant 0 : i32
    return %c0_i32, %c0_i32_0 : i32, i32
  }
  func.func @transform_2(%arg0: i32) -> (i32, i32) {
    %c0_i32 = arith.constant 0 : i32
    %c0_i32_0 = arith.constant 0 : i32
    %c0_i32_1 = arith.constant 0 : i32
    return %c0_i32, %c0_i32_0 : i32, i32
  }
  func.func @transform_3(%arg0: i32) -> (i32, i32) {
    %c0_i32 = arith.constant 0 : i32
    %c0_i32_0 = arith.constant 0 : i32
    %c0_i32_1 = arith.constant 0 : i32
    return %c0_i32, %c0_i32_0 : i32, i32
  }
  func.func @transform_4(%arg0: i32) -> (i32, i32, i32) {
    %c0_i32 = arith.constant 0 : i32
    %c0_i32_0 = arith.constant 0 : i32
    %c0_i32_1 = arith.constant 0 : i32
    return %arg0, %c0_i32, %c0_i32_0 : i32, i32, i32
  }
  func.func @transform_5(%arg0: i32) -> (i32, i32, i32) {
    %c0_i32 = arith.constant 0 : i32
    %c0_i32_0 = arith.constant 0 : i32
    %c0_i32_1 = arith.constant 0 : i32
    return %arg0, %c0_i32, %c0_i32_0 : i32, i32, i32
  }
  func.func @transform_6(%arg0: i32) -> (i32, i32, i32) {
    %c0_i32 = arith.constant 0 : i32
    %c0_i32_0 = arith.constant 0 : i32
    %c0_i32_1 = arith.constant 0 : i32
    return %arg0, %c0_i32, %c0_i32_0 : i32, i32, i32
  }
}

module attributes {stable_mosaic.version = 11 : i64} {
  func.func @kernel(%arg0: i32, %arg1: memref<1x8x256xf32, #tpu.memory_space<vmem>>, %arg2: memref<1x8x1xf32, #tpu.memory_space<vmem>>, %arg3: memref<1x8x1xf32, #tpu.memory_space<vmem>>, %arg4: memref<9x256xf32, #tpu.memory_space<vmem>>, %arg5: memref<16x72xf32, #tpu.memory_space<vmem>>, %arg6: memref<16x1xf32, #tpu.memory_space<vmem>>, %arg7: memref<1x16x256xf32, #tpu.memory_space<vmem>>, %arg8: memref<1x16x1xf32, #tpu.memory_space<vmem>>, %arg9: memref<1x16x1xf32, #tpu.memory_space<vmem>>, %arg10: memref<72x256xf32, #tpu.memory_space<vmem>>) attributes {dimension_semantics = [#tpu.dimension_semantics<parallel>], iteration_bounds = array<i64: 2>, scalar_prefetch = 0 : i64, scratch_operands = 1 : i64, tpu.core_type = #tpu.core_type<tc>, window_params = [{transform_indices = @transform_0, window_bounds = array<i64: 1, 8, 256>}, {transform_indices = @transform_1, window_bounds = array<i64: 1, 8, 1>}, {transform_indices = @transform_2, window_bounds = array<i64: 1, 8, 1>}, {pipeline_mode = #tpu.pipeline_mode<synchronous>, transform_indices = @transform_3, window_bounds = array<i64: 9, 256>}, {pipeline_mode = #tpu.pipeline_mode<synchronous>, transform_indices = @transform_4, window_bounds = array<i64: 16, 72>}, {pipeline_mode = #tpu.pipeline_mode<synchronous>, transform_indices = @transform_5, window_bounds = array<i64: 16, 1>}, {transform_indices = @transform_6, window_bounds = array<i64: 1, 16, 256>}, {transform_indices = @transform_7, window_bounds = array<i64: 1, 16, 1>}, {transform_indices = @transform_8, window_bounds = array<i64: 1, 16, 1>}]} {
    %c0 = arith.constant 0 : index
    %c0_0 = arith.constant 0 : index
    %c0_1 = arith.constant 0 : index
    %0 = vector.load %arg1[%c0, %c0_0, %c0_1] : memref<1x8x256xf32, #tpu.memory_space<vmem>>, vector<1x8x256xf32>
    %1 = vector.shape_cast %0 : vector<1x8x256xf32> to vector<8x256xf32>
    %c0_2 = arith.constant 0 : index
    %c0_3 = arith.constant 0 : index
    %c0_4 = arith.constant 0 : index
    %2 = vector.load %arg2[%c0_2, %c0_3, %c0_4] : memref<1x8x1xf32, #tpu.memory_space<vmem>>, vector<1x8x1xf32>
    %3 = vector.shape_cast %2 : vector<1x8x1xf32> to vector<8x1xf32>
    %4 = vector.broadcast %3 : vector<8x1xf32> to vector<8x256xf32>
    %5 = arith.mulf %1, %4 : vector<8x256xf32>
    %c0_5 = arith.constant 0 : index
    %c0_6 = arith.constant 0 : index
    %c0_7 = arith.constant 0 : index
    %6 = vector.load %arg3[%c0_5, %c0_6, %c0_7] : memref<1x8x1xf32, #tpu.memory_space<vmem>>, vector<1x8x1xf32>
    %7 = vector.shape_cast %6 : vector<1x8x1xf32> to vector<8x1xf32>
    %8 = vector.broadcast %7 : vector<8x1xf32> to vector<8x256xf32>
    %9 = arith.addf %5, %8 : vector<8x256xf32>
    %10 = arith.negf %9 : vector<8x256xf32>
    %11 = math.exp %10 : vector<8x256xf32>
    %cst = arith.constant 1.000000e+00 : f32
    %12 = vector.broadcast %cst : f32 to vector<8x256xf32>
    %13 = arith.addf %12, %11 : vector<8x256xf32>
    %14 = arith.divf %12, %13 : vector<8x256xf32>
    %15 = arith.mulf %9, %14 : vector<8x256xf32>
    %cst_8 = arith.constant 0.000000e+00 : f32
    %16 = vector.broadcast %cst_8 : f32 to vector<8x17xf32>
    %17 = vector.extract_strided_slice %15 {offsets = [0, 0], sizes = [8, 239], strides = [1, 1]} : vector<8x256xf32> to vector<8x239xf32>
    %18 = tpu.concatenate %16, %17 in 1 : vector<8x17xf32>, vector<8x239xf32> -> vector<8x256xf32>
    %c0_9 = arith.constant 0 : index
    %c0_10 = arith.constant 0 : index
    %19 = vector.load %arg4[%c0_9, %c0_10] : memref<9x256xf32, #tpu.memory_space<vmem>>, vector<1x256xf32>
    %20 = vector.broadcast %19 : vector<1x256xf32> to vector<8x256xf32>
    %21 = arith.mulf %18, %20 : vector<8x256xf32>
    %c0_11 = arith.constant 0 : index
    %c0_12 = arith.constant 0 : index
    %22 = vector.load %arg10[%c0_11, %c0_12] : memref<72x256xf32, #tpu.memory_space<vmem>>, vector<8x256xf32>
    tpu.vector_store %arg10[%c0_11, %c0_12], %21 {strides = array<i32>} : memref<72x256xf32, #tpu.memory_space<vmem>>, vector<8x256xf32>,
    %cst_13 = arith.constant 0.000000e+00 : f32
    %23 = vector.broadcast %cst_13 : f32 to vector<8x16xf32>
    %24 = vector.extract_strided_slice %15 {offsets = [0, 0], sizes = [8, 240], strides = [1, 1]} : vector<8x256xf32> to vector<8x240xf32>
    %25 = tpu.concatenate %23, %24 in 1 : vector<8x16xf32>, vector<8x240xf32> -> vector<8x256xf32>
    %c1 = arith.constant 1 : index
    %c0_14 = arith.constant 0 : index
    %26 = vector.load %arg4[%c1, %c0_14] : memref<9x256xf32, #tpu.memory_space<vmem>>, vector<1x256xf32>
    %27 = vector.broadcast %26 : vector<1x256xf32> to vector<8x256xf32>
    %28 = arith.mulf %25, %27 : vector<8x256xf32>
    %c8 = arith.constant 8 : index
    %c0_15 = arith.constant 0 : index
    %29 = vector.load %arg10[%c8, %c0_15] : memref<72x256xf32, #tpu.memory_space<vmem>>, vector<8x256xf32>
    tpu.vector_store %arg10[%c8, %c0_15], %28 {strides = array<i32>} : memref<72x256xf32, #tpu.memory_space<vmem>>, vector<8x256xf32>,
    %cst_16 = arith.constant 0.000000e+00 : f32
    %30 = vector.broadcast %cst_16 : f32 to vector<8x15xf32>
    %31 = vector.extract_strided_slice %15 {offsets = [0, 0], sizes = [8, 241], strides = [1, 1]} : vector<8x256xf32> to vector<8x241xf32>
    %32 = tpu.concatenate %30, %31 in 1 : vector<8x15xf32>, vector<8x241xf32> -> vector<8x256xf32>
    %c2 = arith.constant 2 : index
    %c0_17 = arith.constant 0 : index
    %33 = vector.load %arg4[%c2, %c0_17] : memref<9x256xf32, #tpu.memory_space<vmem>>, vector<1x256xf32>
    %34 = vector.broadcast %33 : vector<1x256xf32> to vector<8x256xf32>
    %35 = arith.mulf %32, %34 : vector<8x256xf32>
    %c16 = arith.constant 16 : index
    %c0_18 = arith.constant 0 : index
    %36 = vector.load %arg10[%c16, %c0_18] : memref<72x256xf32, #tpu.memory_space<vmem>>, vector<8x256xf32>
    tpu.vector_store %arg10[%c16, %c0_18], %35 {strides = array<i32>} : memref<72x256xf32, #tpu.memory_space<vmem>>, vector<8x256xf32>,
    %cst_19 = arith.constant 0.000000e+00 : f32
    %37 = vector.broadcast %cst_19 : f32 to vector<8x1xf32>
    %38 = vector.extract_strided_slice %15 {offsets = [0, 0], sizes = [8, 255], strides = [1, 1]} : vector<8x256xf32> to vector<8x255xf32>
    %39 = tpu.concatenate %37, %38 in 1 : vector<8x1xf32>, vector<8x255xf32> -> vector<8x256xf32>
    %c3 = arith.constant 3 : index
    %c0_20 = arith.constant 0 : index
    %40 = vector.load %arg4[%c3, %c0_20] : memref<9x256xf32, #tpu.memory_space<vmem>>, vector<1x256xf32>
    %41 = vector.broadcast %40 : vector<1x256xf32> to vector<8x256xf32>
    %42 = arith.mulf %39, %41 : vector<8x256xf32>
    %c24 = arith.constant 24 : index
    %c0_21 = arith.constant 0 : index
    %43 = vector.load %arg10[%c24, %c0_21] : memref<72x256xf32, #tpu.memory_space<vmem>>, vector<8x256xf32>
    tpu.vector_store %arg10[%c24, %c0_21], %42 {strides = array<i32>} : memref<72x256xf32, #tpu.memory_space<vmem>>, vector<8x256xf32>,
    %c32 = arith.constant 32 : index
    %c0_22 = arith.constant 0 : index
    %44 = vector.load %arg10[%c32, %c0_22] : memref<72x256xf32, #tpu.memory_space<vmem>>, vector<8x256xf32>
    tpu.vector_store %arg10[%c32, %c0_22], %15 {strides = array<i32>} : memref<72x256xf32, #tpu.memory_space<vmem>>, vector<8x256xf32>,
    %45 = vector.extract_strided_slice %15 {offsets = [0, 1], sizes = [8, 255], strides = [1, 1]} : vector<8x256xf32> to vector<8x255xf32>
    %cst_23 = arith.constant 0.000000e+00 : f32
    %46 = vector.broadcast %cst_23 : f32 to vector<8x1xf32>
    %47 = tpu.concatenate %45, %46 in 1 : vector<8x255xf32>, vector<8x1xf32> -> vector<8x256xf32>
    %c5 = arith.constant 5 : index
    %c0_24 = arith.constant 0 : index
    %48 = vector.load %arg4[%c5, %c0_24] : memref<9x256xf32, #tpu.memory_space<vmem>>, vector<1x256xf32>
    %49 = vector.broadcast %48 : vector<1x256xf32> to vector<8x256xf32>
    %50 = arith.mulf %47, %49 : vector<8x256xf32>
    %c40 = arith.constant 40 : index
    %c0_25 = arith.constant 0 : index
    %51 = vector.load %arg10[%c40, %c0_25] : memref<72x256xf32, #tpu.memory_space<vmem>>, vector<8x256xf32>
    tpu.vector_store %arg10[%c40, %c0_25], %50 {strides = array<i32>} : memref<72x256xf32, #tpu.memory_space<vmem>>, vector<8x256xf32>,
    %52 = vector.extract_strided_slice %15 {offsets = [0, 15], sizes = [8, 241], strides = [1, 1]} : vector<8x256xf32> to vector<8x241xf32>
    %cst_26 = arith.constant 0.000000e+00 : f32
    %53 = vector.broadcast %cst_26 : f32 to vector<8x15xf32>
    %54 = tpu.concatenate %52, %53 in 1 : vector<8x241xf32>, vector<8x15xf32> -> vector<8x256xf32>
    %c6 = arith.constant 6 : index
    %c0_27 = arith.constant 0 : index
    %55 = vector.load %arg4[%c6, %c0_27] : memref<9x256xf32, #tpu.memory_space<vmem>>, vector<1x256xf32>
    %56 = vector.broadcast %55 : vector<1x256xf32> to vector<8x256xf32>
    %57 = arith.mulf %54, %56 : vector<8x256xf32>
    %c48 = arith.constant 48 : index
    %c0_28 = arith.constant 0 : index
    %58 = vector.load %arg10[%c48, %c0_28] : memref<72x256xf32, #tpu.memory_space<vmem>>, vector<8x256xf32>
    tpu.vector_store %arg10[%c48, %c0_28], %57 {strides = array<i32>} : memref<72x256xf32, #tpu.memory_space<vmem>>, vector<8x256xf32>,
    %59 = vector.extract_strided_slice %15 {offsets = [0, 16], sizes = [8, 240], strides = [1, 1]} : vector<8x256xf32> to vector<8x240xf32>
    %cst_29 = arith.constant 0.000000e+00 : f32
    %60 = vector.broadcast %cst_29 : f32 to vector<8x16xf32>
    %61 = tpu.concatenate %59, %60 in 1 : vector<8x240xf32>, vector<8x16xf32> -> vector<8x256xf32>
    %c7 = arith.constant 7 : index
    %c0_30 = arith.constant 0 : index
    %62 = vector.load %arg4[%c7, %c0_30] : memref<9x256xf32, #tpu.memory_space<vmem>>, vector<1x256xf32>
    %63 = vector.broadcast %62 : vector<1x256xf32> to vector<8x256xf32>
    %64 = arith.mulf %61, %63 : vector<8x256xf32>
    %c56 = arith.constant 56 : index
    %c0_31 = arith.constant 0 : index
    %65 = vector.load %arg10[%c56, %c0_31] : memref<72x256xf32, #tpu.memory_space<vmem>>, vector<8x256xf32>
    tpu.vector_store %arg10[%c56, %c0_31], %64 {strides = array<i32>} : memref<72x256xf32, #tpu.memory_space<vmem>>, vector<8x256xf32>,
    %66 = vector.extract_strided_slice %15 {offsets = [0, 17], sizes = [8, 239], strides = [1, 1]} : vector<8x256xf32> to vector<8x239xf32>
    %cst_32 = arith.constant 0.000000e+00 : f32
    %67 = vector.broadcast %cst_32 : f32 to vector<8x17xf32>
    %68 = tpu.concatenate %66, %67 in 1 : vector<8x239xf32>, vector<8x17xf32> -> vector<8x256xf32>
    %c8_33 = arith.constant 8 : index
    %c0_34 = arith.constant 0 : index
    %69 = vector.load %arg4[%c8_33, %c0_34] : memref<9x256xf32, #tpu.memory_space<vmem>>, vector<1x256xf32>
    %70 = vector.broadcast %69 : vector<1x256xf32> to vector<8x256xf32>
    %71 = arith.mulf %68, %70 : vector<8x256xf32>
    %c64 = arith.constant 64 : index
    %c0_35 = arith.constant 0 : index
    %72 = vector.load %arg10[%c64, %c0_35] : memref<72x256xf32, #tpu.memory_space<vmem>>, vector<8x256xf32>
    tpu.vector_store %arg10[%c64, %c0_35], %71 {strides = array<i32>} : memref<72x256xf32, #tpu.memory_space<vmem>>, vector<8x256xf32>,
    %c0_36 = arith.constant 0 : index
    %c0_37 = arith.constant 0 : index
    %73 = vector.load %arg5[%c0_36, %c0_37] : memref<16x72xf32, #tpu.memory_space<vmem>>, vector<16x72xf32>
    %c0_38 = arith.constant 0 : index
    %c0_39 = arith.constant 0 : index
    %74 = vector.load %arg10[%c0_38, %c0_39] : memref<72x256xf32, #tpu.memory_space<vmem>>, vector<72x256xf32>
    %cst_40 = arith.constant dense<0.000000e+00> : vector<16x256xf32>
    %75 = tpu.matmul %73, %74, %cst_40 {dimension_numbers = #tpu.dot_dimension_numbers<[1], [0], [0], [1], [0, 0, 1, 1], [], []>} : vector<16x72xf32>, vector<72x256xf32>, vector<16x256xf32> -> vector<16x256xf32>
    %c0_41 = arith.constant 0 : index
    %c0_42 = arith.constant 0 : index
    %76 = vector.load %arg6[%c0_41, %c0_42] : memref<16x1xf32, #tpu.memory_space<vmem>>, vector<16x1xf32>
    %77 = vector.broadcast %76 : vector<16x1xf32> to vector<16x256xf32>
    %78 = arith.addf %75, %77 : vector<16x256xf32>
    %c0_43 = arith.constant 0 : index
    %c0_44 = arith.constant 0 : index
    %c0_45 = arith.constant 0 : index
    %79 = vector.load %arg7[%c0_43, %c0_44, %c0_45] : memref<1x16x256xf32, #tpu.memory_space<vmem>>, vector<1x16x256xf32>
    %80 = vector.shape_cast %79 : vector<1x16x256xf32> to vector<16x256xf32>
    %81 = vector.shape_cast %78 : vector<16x256xf32> to vector<1x16x256xf32>
    tpu.vector_store %arg7[%c0_43, %c0_44, %c0_45], %81 {strides = array<i32>} : memref<1x16x256xf32, #tpu.memory_space<vmem>>, vector<1x16x256xf32>,
    %cst_46 = arith.constant dense<0.000000e+00> : vector<16xf32>
    %82 = vector.multi_reduction <add>, %78, %cst_46 [1] : vector<16x256xf32> to vector<16xf32>
    %83 = vector.shape_cast %82 : vector<16xf32> to vector<16x1xf32>
    %c0_47 = arith.constant 0 : index
    %c0_48 = arith.constant 0 : index
    %c0_49 = arith.constant 0 : index
    %84 = vector.load %arg8[%c0_47, %c0_48, %c0_49] : memref<1x16x1xf32, #tpu.memory_space<vmem>>, vector<1x16x1xf32>
    %85 = vector.shape_cast %84 : vector<1x16x1xf32> to vector<16x1xf32>
    %86 = vector.shape_cast %83 : vector<16x1xf32> to vector<1x16x1xf32>
    tpu.vector_store %arg8[%c0_47, %c0_48, %c0_49], %86 {strides = array<i32>} : memref<1x16x1xf32, #tpu.memory_space<vmem>>, vector<1x16x1xf32>,
    %87 = arith.mulf %78, %78 : vector<16x256xf32>
    %cst_50 = arith.constant dense<0.000000e+00> : vector<16xf32>
    %88 = vector.multi_reduction <add>, %87, %cst_50 [1] : vector<16x256xf32> to vector<16xf32>
    %89 = vector.shape_cast %88 : vector<16xf32> to vector<16x1xf32>
    %c0_51 = arith.constant 0 : index
    %c0_52 = arith.constant 0 : index
    %c0_53 = arith.constant 0 : index
    %90 = vector.load %arg9[%c0_51, %c0_52, %c0_53] : memref<1x16x1xf32, #tpu.memory_space<vmem>>, vector<1x16x1xf32>
    %91 = vector.shape_cast %90 : vector<1x16x1xf32> to vector<16x1xf32>
    %92 = vector.shape_cast %89 : vector<16x1xf32> to vector<1x16x1xf32>
    tpu.vector_store %arg9[%c0_51, %c0_52, %c0_53], %92 {strides = array<i32>} : memref<1x16x1xf32, #tpu.memory_space<vmem>>, vector<1x16x1xf32>,
    return
  }
  func.func @transform_0(%arg0: i32) -> (i32, i32, i32) {
    %c0_i32 = arith.constant 0 : i32
    %c0_i32_0 = arith.constant 0 : i32
    %c0_i32_1 = arith.constant 0 : i32
    return %arg0, %c0_i32, %c0_i32_0 : i32, i32, i32
  }
  func.func @transform_1(%arg0: i32) -> (i32, i32, i32) {
    %c0_i32 = arith.constant 0 : i32
    %c0_i32_0 = arith.constant 0 : i32
    %c0_i32_1 = arith.constant 0 : i32
    return %arg0, %c0_i32, %c0_i32_0 : i32, i32, i32
  }
  func.func @transform_2(%arg0: i32) -> (i32, i32, i32) {
    %c0_i32 = arith.constant 0 : i32
    %c0_i32_0 = arith.constant 0 : i32
    %c0_i32_1 = arith.constant 0 : i32
    return %arg0, %c0_i32, %c0_i32_0 : i32, i32, i32
  }
  func.func @transform_3(%arg0: i32) -> (i32, i32) {
    %c0_i32 = arith.constant 0 : i32
    %c0_i32_0 = arith.constant 0 : i32
    %c0_i32_1 = arith.constant 0 : i32
    return %c0_i32, %c0_i32_0 : i32, i32
  }
  func.func @transform_4(%arg0: i32) -> (i32, i32) {
    %c0_i32 = arith.constant 0 : i32
    %c0_i32_0 = arith.constant 0 : i32
    %c0_i32_1 = arith.constant 0 : i32
    return %c0_i32, %c0_i32_0 : i32, i32
  }
  func.func @transform_5(%arg0: i32) -> (i32, i32) {
    %c0_i32 = arith.constant 0 : i32
    %c0_i32_0 = arith.constant 0 : i32
    %c0_i32_1 = arith.constant 0 : i32
    return %c0_i32, %c0_i32_0 : i32, i32
  }
  func.func @transform_6(%arg0: i32) -> (i32, i32, i32) {
    %c0_i32 = arith.constant 0 : i32
    %c0_i32_0 = arith.constant 0 : i32
    %c0_i32_1 = arith.constant 0 : i32
    return %arg0, %c0_i32, %c0_i32_0 : i32, i32, i32
  }
  func.func @transform_7(%arg0: i32) -> (i32, i32, i32) {
    %c0_i32 = arith.constant 0 : i32
    %c0_i32_0 = arith.constant 0 : i32
    %c0_i32_1 = arith.constant 0 : i32
    return %arg0, %c0_i32, %c0_i32_0 : i32, i32, i32
  }
  func.func @transform_8(%arg0: i32) -> (i32, i32, i32) {
    %c0_i32 = arith.constant 0 : i32
    %c0_i32_0 = arith.constant 0 : i32
    %c0_i32_1 = arith.constant 0 : i32
    return %arg0, %c0_i32, %c0_i32_0 : i32, i32, i32
  }
}

module attributes {stable_mosaic.version = 11 : i64} {
  func.func @kernel(%arg0: i32, %arg1: memref<1x16x256xf32, #tpu.memory_space<vmem>>, %arg2: memref<1x16x1xf32, #tpu.memory_space<vmem>>, %arg3: memref<1x16x1xf32, #tpu.memory_space<vmem>>, %arg4: memref<9x256xf32, #tpu.memory_space<vmem>>, %arg5: memref<16x152xf32, #tpu.memory_space<vmem>>, %arg6: memref<16x1xf32, #tpu.memory_space<vmem>>, %arg7: memref<1x8x256xf32, #tpu.memory_space<vmem>>, %arg8: memref<1x16x256xf32, #tpu.memory_space<vmem>>, %arg9: memref<1x16x1xf32, #tpu.memory_space<vmem>>, %arg10: memref<1x16x1xf32, #tpu.memory_space<vmem>>, %arg11: memref<152x256xf32, #tpu.memory_space<vmem>>) attributes {dimension_semantics = [#tpu.dimension_semantics<parallel>], iteration_bounds = array<i64: 2>, scalar_prefetch = 0 : i64, scratch_operands = 1 : i64, tpu.core_type = #tpu.core_type<tc>, window_params = [{transform_indices = @transform_0, window_bounds = array<i64: 1, 16, 256>}, {transform_indices = @transform_1, window_bounds = array<i64: 1, 16, 1>}, {transform_indices = @transform_2, window_bounds = array<i64: 1, 16, 1>}, {pipeline_mode = #tpu.pipeline_mode<synchronous>, transform_indices = @transform_3, window_bounds = array<i64: 9, 256>}, {pipeline_mode = #tpu.pipeline_mode<synchronous>, transform_indices = @transform_4, window_bounds = array<i64: 16, 152>}, {pipeline_mode = #tpu.pipeline_mode<synchronous>, transform_indices = @transform_5, window_bounds = array<i64: 16, 1>}, {transform_indices = @transform_6, window_bounds = array<i64: 1, 8, 256>}, {transform_indices = @transform_7, window_bounds = array<i64: 1, 16, 256>}, {transform_indices = @transform_8, window_bounds = array<i64: 1, 16, 1>}, {transform_indices = @transform_9, window_bounds = array<i64: 1, 16, 1>}]} {
    %c0 = arith.constant 0 : index
    %c0_0 = arith.constant 0 : index
    %c0_1 = arith.constant 0 : index
    %0 = vector.load %arg1[%c0, %c0_0, %c0_1] : memref<1x16x256xf32, #tpu.memory_space<vmem>>, vector<1x16x256xf32>
    %1 = vector.shape_cast %0 : vector<1x16x256xf32> to vector<16x256xf32>
    %c0_2 = arith.constant 0 : index
    %c0_3 = arith.constant 0 : index
    %c0_4 = arith.constant 0 : index
    %2 = vector.load %arg2[%c0_2, %c0_3, %c0_4] : memref<1x16x1xf32, #tpu.memory_space<vmem>>, vector<1x16x1xf32>
    %3 = vector.shape_cast %2 : vector<1x16x1xf32> to vector<16x1xf32>
    %4 = vector.broadcast %3 : vector<16x1xf32> to vector<16x256xf32>
    %5 = arith.mulf %1, %4 : vector<16x256xf32>
    %c0_5 = arith.constant 0 : index
    %c0_6 = arith.constant 0 : index
    %c0_7 = arith.constant 0 : index
    %6 = vector.load %arg3[%c0_5, %c0_6, %c0_7] : memref<1x16x1xf32, #tpu.memory_space<vmem>>, vector<1x16x1xf32>
    %7 = vector.shape_cast %6 : vector<1x16x1xf32> to vector<16x1xf32>
    %8 = vector.broadcast %7 : vector<16x1xf32> to vector<16x256xf32>
    %9 = arith.addf %5, %8 : vector<16x256xf32>
    %10 = arith.negf %9 : vector<16x256xf32>
    %11 = math.exp %10 : vector<16x256xf32>
    %cst = arith.constant 1.000000e+00 : f32
    %12 = vector.broadcast %cst : f32 to vector<16x256xf32>
    %13 = arith.addf %12, %11 : vector<16x256xf32>
    %14 = arith.divf %12, %13 : vector<16x256xf32>
    %15 = arith.mulf %9, %14 : vector<16x256xf32>
    %cst_8 = arith.constant 0.000000e+00 : f32
    %16 = vector.broadcast %cst_8 : f32 to vector<16x17xf32>
    %17 = vector.extract_strided_slice %15 {offsets = [0, 0], sizes = [16, 239], strides = [1, 1]} : vector<16x256xf32> to vector<16x239xf32>
    %18 = tpu.concatenate %16, %17 in 1 : vector<16x17xf32>, vector<16x239xf32> -> vector<16x256xf32>
    %c0_9 = arith.constant 0 : index
    %c0_10 = arith.constant 0 : index
    %19 = vector.load %arg4[%c0_9, %c0_10] : memref<9x256xf32, #tpu.memory_space<vmem>>, vector<1x256xf32>
    %20 = vector.broadcast %19 : vector<1x256xf32> to vector<16x256xf32>
    %21 = arith.mulf %18, %20 : vector<16x256xf32>
    %c0_11 = arith.constant 0 : index
    %c0_12 = arith.constant 0 : index
    %22 = vector.load %arg11[%c0_11, %c0_12] : memref<152x256xf32, #tpu.memory_space<vmem>>, vector<16x256xf32>
    tpu.vector_store %arg11[%c0_11, %c0_12], %21 {strides = array<i32>} : memref<152x256xf32, #tpu.memory_space<vmem>>, vector<16x256xf32>,
    %cst_13 = arith.constant 0.000000e+00 : f32
    %23 = vector.broadcast %cst_13 : f32 to vector<16x16xf32>
    %24 = vector.extract_strided_slice %15 {offsets = [0, 0], sizes = [16, 240], strides = [1, 1]} : vector<16x256xf32> to vector<16x240xf32>
    %25 = tpu.concatenate %23, %24 in 1 : vector<16x16xf32>, vector<16x240xf32> -> vector<16x256xf32>
    %c1 = arith.constant 1 : index
    %c0_14 = arith.constant 0 : index
    %26 = vector.load %arg4[%c1, %c0_14] : memref<9x256xf32, #tpu.memory_space<vmem>>, vector<1x256xf32>
    %27 = vector.broadcast %26 : vector<1x256xf32> to vector<16x256xf32>
    %28 = arith.mulf %25, %27 : vector<16x256xf32>
    %c16 = arith.constant 16 : index
    %c0_15 = arith.constant 0 : index
    %29 = vector.load %arg11[%c16, %c0_15] : memref<152x256xf32, #tpu.memory_space<vmem>>, vector<16x256xf32>
    tpu.vector_store %arg11[%c16, %c0_15], %28 {strides = array<i32>} : memref<152x256xf32, #tpu.memory_space<vmem>>, vector<16x256xf32>,
    %cst_16 = arith.constant 0.000000e+00 : f32
    %30 = vector.broadcast %cst_16 : f32 to vector<16x15xf32>
    %31 = vector.extract_strided_slice %15 {offsets = [0, 0], sizes = [16, 241], strides = [1, 1]} : vector<16x256xf32> to vector<16x241xf32>
    %32 = tpu.concatenate %30, %31 in 1 : vector<16x15xf32>, vector<16x241xf32> -> vector<16x256xf32>
    %c2 = arith.constant 2 : index
    %c0_17 = arith.constant 0 : index
    %33 = vector.load %arg4[%c2, %c0_17] : memref<9x256xf32, #tpu.memory_space<vmem>>, vector<1x256xf32>
    %34 = vector.broadcast %33 : vector<1x256xf32> to vector<16x256xf32>
    %35 = arith.mulf %32, %34 : vector<16x256xf32>
    %c32 = arith.constant 32 : index
    %c0_18 = arith.constant 0 : index
    %36 = vector.load %arg11[%c32, %c0_18] : memref<152x256xf32, #tpu.memory_space<vmem>>, vector<16x256xf32>
    tpu.vector_store %arg11[%c32, %c0_18], %35 {strides = array<i32>} : memref<152x256xf32, #tpu.memory_space<vmem>>, vector<16x256xf32>,
    %cst_19 = arith.constant 0.000000e+00 : f32
    %37 = vector.broadcast %cst_19 : f32 to vector<16x1xf32>
    %38 = vector.extract_strided_slice %15 {offsets = [0, 0], sizes = [16, 255], strides = [1, 1]} : vector<16x256xf32> to vector<16x255xf32>
    %39 = tpu.concatenate %37, %38 in 1 : vector<16x1xf32>, vector<16x255xf32> -> vector<16x256xf32>
    %c3 = arith.constant 3 : index
    %c0_20 = arith.constant 0 : index
    %40 = vector.load %arg4[%c3, %c0_20] : memref<9x256xf32, #tpu.memory_space<vmem>>, vector<1x256xf32>
    %41 = vector.broadcast %40 : vector<1x256xf32> to vector<16x256xf32>
    %42 = arith.mulf %39, %41 : vector<16x256xf32>
    %c48 = arith.constant 48 : index
    %c0_21 = arith.constant 0 : index
    %43 = vector.load %arg11[%c48, %c0_21] : memref<152x256xf32, #tpu.memory_space<vmem>>, vector<16x256xf32>
    tpu.vector_store %arg11[%c48, %c0_21], %42 {strides = array<i32>} : memref<152x256xf32, #tpu.memory_space<vmem>>, vector<16x256xf32>,
    %c64 = arith.constant 64 : index
    %c0_22 = arith.constant 0 : index
    %44 = vector.load %arg11[%c64, %c0_22] : memref<152x256xf32, #tpu.memory_space<vmem>>, vector<16x256xf32>
    tpu.vector_store %arg11[%c64, %c0_22], %15 {strides = array<i32>} : memref<152x256xf32, #tpu.memory_space<vmem>>, vector<16x256xf32>,
    %45 = vector.extract_strided_slice %15 {offsets = [0, 1], sizes = [16, 255], strides = [1, 1]} : vector<16x256xf32> to vector<16x255xf32>
    %cst_23 = arith.constant 0.000000e+00 : f32
    %46 = vector.broadcast %cst_23 : f32 to vector<16x1xf32>
    %47 = tpu.concatenate %45, %46 in 1 : vector<16x255xf32>, vector<16x1xf32> -> vector<16x256xf32>
    %c5 = arith.constant 5 : index
    %c0_24 = arith.constant 0 : index
    %48 = vector.load %arg4[%c5, %c0_24] : memref<9x256xf32, #tpu.memory_space<vmem>>, vector<1x256xf32>
    %49 = vector.broadcast %48 : vector<1x256xf32> to vector<16x256xf32>
    %50 = arith.mulf %47, %49 : vector<16x256xf32>
    %c80 = arith.constant 80 : index
    %c0_25 = arith.constant 0 : index
    %51 = vector.load %arg11[%c80, %c0_25] : memref<152x256xf32, #tpu.memory_space<vmem>>, vector<16x256xf32>
    tpu.vector_store %arg11[%c80, %c0_25], %50 {strides = array<i32>} : memref<152x256xf32, #tpu.memory_space<vmem>>, vector<16x256xf32>,
    %52 = vector.extract_strided_slice %15 {offsets = [0, 15], sizes = [16, 241], strides = [1, 1]} : vector<16x256xf32> to vector<16x241xf32>
    %cst_26 = arith.constant 0.000000e+00 : f32
    %53 = vector.broadcast %cst_26 : f32 to vector<16x15xf32>
    %54 = tpu.concatenate %52, %53 in 1 : vector<16x241xf32>, vector<16x15xf32> -> vector<16x256xf32>
    %c6 = arith.constant 6 : index
    %c0_27 = arith.constant 0 : index
    %55 = vector.load %arg4[%c6, %c0_27] : memref<9x256xf32, #tpu.memory_space<vmem>>, vector<1x256xf32>
    %56 = vector.broadcast %55 : vector<1x256xf32> to vector<16x256xf32>
    %57 = arith.mulf %54, %56 : vector<16x256xf32>
    %c96 = arith.constant 96 : index
    %c0_28 = arith.constant 0 : index
    %58 = vector.load %arg11[%c96, %c0_28] : memref<152x256xf32, #tpu.memory_space<vmem>>, vector<16x256xf32>
    tpu.vector_store %arg11[%c96, %c0_28], %57 {strides = array<i32>} : memref<152x256xf32, #tpu.memory_space<vmem>>, vector<16x256xf32>,
    %59 = vector.extract_strided_slice %15 {offsets = [0, 16], sizes = [16, 240], strides = [1, 1]} : vector<16x256xf32> to vector<16x240xf32>
    %cst_29 = arith.constant 0.000000e+00 : f32
    %60 = vector.broadcast %cst_29 : f32 to vector<16x16xf32>
    %61 = tpu.concatenate %59, %60 in 1 : vector<16x240xf32>, vector<16x16xf32> -> vector<16x256xf32>
    %c7 = arith.constant 7 : index
    %c0_30 = arith.constant 0 : index
    %62 = vector.load %arg4[%c7, %c0_30] : memref<9x256xf32, #tpu.memory_space<vmem>>, vector<1x256xf32>
    %63 = vector.broadcast %62 : vector<1x256xf32> to vector<16x256xf32>
    %64 = arith.mulf %61, %63 : vector<16x256xf32>
    %c112 = arith.constant 112 : index
    %c0_31 = arith.constant 0 : index
    %65 = vector.load %arg11[%c112, %c0_31] : memref<152x256xf32, #tpu.memory_space<vmem>>, vector<16x256xf32>
    tpu.vector_store %arg11[%c112, %c0_31], %64 {strides = array<i32>} : memref<152x256xf32, #tpu.memory_space<vmem>>, vector<16x256xf32>,
    %66 = vector.extract_strided_slice %15 {offsets = [0, 17], sizes = [16, 239], strides = [1, 1]} : vector<16x256xf32> to vector<16x239xf32>
    %cst_32 = arith.constant 0.000000e+00 : f32
    %67 = vector.broadcast %cst_32 : f32 to vector<16x17xf32>
    %68 = tpu.concatenate %66, %67 in 1 : vector<16x239xf32>, vector<16x17xf32> -> vector<16x256xf32>
    %c8 = arith.constant 8 : index
    %c0_33 = arith.constant 0 : index
    %69 = vector.load %arg4[%c8, %c0_33] : memref<9x256xf32, #tpu.memory_space<vmem>>, vector<1x256xf32>
    %70 = vector.broadcast %69 : vector<1x256xf32> to vector<16x256xf32>
    %71 = arith.mulf %68, %70 : vector<16x256xf32>
    %c128 = arith.constant 128 : index
    %c0_34 = arith.constant 0 : index
    %72 = vector.load %arg11[%c128, %c0_34] : memref<152x256xf32, #tpu.memory_space<vmem>>, vector<16x256xf32>
    tpu.vector_store %arg11[%c128, %c0_34], %71 {strides = array<i32>} : memref<152x256xf32, #tpu.memory_space<vmem>>, vector<16x256xf32>,
    %c0_35 = arith.constant 0 : index
    %c0_36 = arith.constant 0 : index
    %c0_37 = arith.constant 0 : index
    %73 = vector.load %arg7[%c0_35, %c0_36, %c0_37] : memref<1x8x256xf32, #tpu.memory_space<vmem>>, vector<1x8x256xf32>
    %74 = vector.shape_cast %73 : vector<1x8x256xf32> to vector<8x256xf32>
    %c144 = arith.constant 144 : index
    %c0_38 = arith.constant 0 : index
    %75 = vector.load %arg11[%c144, %c0_38] : memref<152x256xf32, #tpu.memory_space<vmem>>, vector<8x256xf32>
    tpu.vector_store %arg11[%c144, %c0_38], %74 {strides = array<i32>} : memref<152x256xf32, #tpu.memory_space<vmem>>, vector<8x256xf32>,
    %c0_39 = arith.constant 0 : index
    %c0_40 = arith.constant 0 : index
    %76 = vector.load %arg5[%c0_39, %c0_40] : memref<16x152xf32, #tpu.memory_space<vmem>>, vector<16x152xf32>
    %c0_41 = arith.constant 0 : index
    %c0_42 = arith.constant 0 : index
    %77 = vector.load %arg11[%c0_41, %c0_42] : memref<152x256xf32, #tpu.memory_space<vmem>>, vector<152x256xf32>
    %cst_43 = arith.constant dense<0.000000e+00> : vector<16x256xf32>
    %78 = tpu.matmul %76, %77, %cst_43 {dimension_numbers = #tpu.dot_dimension_numbers<[1], [0], [0], [1], [0, 0, 1, 1], [], []>} : vector<16x152xf32>, vector<152x256xf32>, vector<16x256xf32> -> vector<16x256xf32>
    %c0_44 = arith.constant 0 : index
    %c0_45 = arith.constant 0 : index
    %79 = vector.load %arg6[%c0_44, %c0_45] : memref<16x1xf32, #tpu.memory_space<vmem>>, vector<16x1xf32>
    %80 = vector.broadcast %79 : vector<16x1xf32> to vector<16x256xf32>
    %81 = arith.addf %78, %80 : vector<16x256xf32>
    %c0_46 = arith.constant 0 : index
    %c0_47 = arith.constant 0 : index
    %c0_48 = arith.constant 0 : index
    %82 = vector.load %arg8[%c0_46, %c0_47, %c0_48] : memref<1x16x256xf32, #tpu.memory_space<vmem>>, vector<1x16x256xf32>
    %83 = vector.shape_cast %82 : vector<1x16x256xf32> to vector<16x256xf32>
    %84 = vector.shape_cast %81 : vector<16x256xf32> to vector<1x16x256xf32>
    tpu.vector_store %arg8[%c0_46, %c0_47, %c0_48], %84 {strides = array<i32>} : memref<1x16x256xf32, #tpu.memory_space<vmem>>, vector<1x16x256xf32>,
    %cst_49 = arith.constant dense<0.000000e+00> : vector<16xf32>
    %85 = vector.multi_reduction <add>, %81, %cst_49 [1] : vector<16x256xf32> to vector<16xf32>
    %86 = vector.shape_cast %85 : vector<16xf32> to vector<16x1xf32>
    %c0_50 = arith.constant 0 : index
    %c0_51 = arith.constant 0 : index
    %c0_52 = arith.constant 0 : index
    %87 = vector.load %arg9[%c0_50, %c0_51, %c0_52] : memref<1x16x1xf32, #tpu.memory_space<vmem>>, vector<1x16x1xf32>
    %88 = vector.shape_cast %87 : vector<1x16x1xf32> to vector<16x1xf32>
    %89 = vector.shape_cast %86 : vector<16x1xf32> to vector<1x16x1xf32>
    tpu.vector_store %arg9[%c0_50, %c0_51, %c0_52], %89 {strides = array<i32>} : memref<1x16x1xf32, #tpu.memory_space<vmem>>, vector<1x16x1xf32>,
    %90 = arith.mulf %81, %81 : vector<16x256xf32>
    %cst_53 = arith.constant dense<0.000000e+00> : vector<16xf32>
    %91 = vector.multi_reduction <add>, %90, %cst_53 [1] : vector<16x256xf32> to vector<16xf32>
    %92 = vector.shape_cast %91 : vector<16xf32> to vector<16x1xf32>
    %c0_54 = arith.constant 0 : index
    %c0_55 = arith.constant 0 : index
    %c0_56 = arith.constant 0 : index
    %93 = vector.load %arg10[%c0_54, %c0_55, %c0_56] : memref<1x16x1xf32, #tpu.memory_space<vmem>>, vector<1x16x1xf32>
    %94 = vector.shape_cast %93 : vector<1x16x1xf32> to vector<16x1xf32>
    %95 = vector.shape_cast %92 : vector<16x1xf32> to vector<1x16x1xf32>
    tpu.vector_store %arg10[%c0_54, %c0_55, %c0_56], %95 {strides = array<i32>} : memref<1x16x1xf32, #tpu.memory_space<vmem>>, vector<1x16x1xf32>,
    return
  }
  func.func @transform_0(%arg0: i32) -> (i32, i32, i32) {
    %c0_i32 = arith.constant 0 : i32
    %c0_i32_0 = arith.constant 0 : i32
    %c0_i32_1 = arith.constant 0 : i32
    return %arg0, %c0_i32, %c0_i32_0 : i32, i32, i32
  }
  func.func @transform_1(%arg0: i32) -> (i32, i32, i32) {
    %c0_i32 = arith.constant 0 : i32
    %c0_i32_0 = arith.constant 0 : i32
    %c0_i32_1 = arith.constant 0 : i32
    return %arg0, %c0_i32, %c0_i32_0 : i32, i32, i32
  }
  func.func @transform_2(%arg0: i32) -> (i32, i32, i32) {
    %c0_i32 = arith.constant 0 : i32
    %c0_i32_0 = arith.constant 0 : i32
    %c0_i32_1 = arith.constant 0 : i32
    return %arg0, %c0_i32, %c0_i32_0 : i32, i32, i32
  }
  func.func @transform_3(%arg0: i32) -> (i32, i32) {
    %c0_i32 = arith.constant 0 : i32
    %c0_i32_0 = arith.constant 0 : i32
    %c0_i32_1 = arith.constant 0 : i32
    return %c0_i32, %c0_i32_0 : i32, i32
  }
  func.func @transform_4(%arg0: i32) -> (i32, i32) {
    %c0_i32 = arith.constant 0 : i32
    %c0_i32_0 = arith.constant 0 : i32
    %c0_i32_1 = arith.constant 0 : i32
    return %c0_i32, %c0_i32_0 : i32, i32
  }
  func.func @transform_5(%arg0: i32) -> (i32, i32) {
    %c0_i32 = arith.constant 0 : i32
    %c0_i32_0 = arith.constant 0 : i32
    %c0_i32_1 = arith.constant 0 : i32
    return %c0_i32, %c0_i32_0 : i32, i32
  }
  func.func @transform_6(%arg0: i32) -> (i32, i32, i32) {
    %c0_i32 = arith.constant 0 : i32
    %c0_i32_0 = arith.constant 0 : i32
    %c0_i32_1 = arith.constant 0 : i32
    return %arg0, %c0_i32, %c0_i32_0 : i32, i32, i32
  }
  func.func @transform_7(%arg0: i32) -> (i32, i32, i32) {
    %c0_i32 = arith.constant 0 : i32
    %c0_i32_0 = arith.constant 0 : i32
    %c0_i32_1 = arith.constant 0 : i32
    return %arg0, %c0_i32, %c0_i32_0 : i32, i32, i32
  }
  func.func @transform_8(%arg0: i32) -> (i32, i32, i32) {
    %c0_i32 = arith.constant 0 : i32
    %c0_i32_0 = arith.constant 0 : i32
    %c0_i32_1 = arith.constant 0 : i32
    return %arg0, %c0_i32, %c0_i32_0 : i32, i32, i32
  }
  func.func @transform_9(%arg0: i32) -> (i32, i32, i32) {
    %c0_i32 = arith.constant 0 : i32
    %c0_i32_0 = arith.constant 0 : i32
    %c0_i32_1 = arith.constant 0 : i32
    return %arg0, %c0_i32, %c0_i32_0 : i32, i32, i32
  }
}

module attributes {stable_mosaic.version = 11 : i64} {
  func.func @kernel(%arg0: i32, %arg1: memref<1x16x256xf32, #tpu.memory_space<vmem>>, %arg2: memref<1x16x1xf32, #tpu.memory_space<vmem>>, %arg3: memref<1x16x1xf32, #tpu.memory_space<vmem>>, %arg4: memref<9x256xf32, #tpu.memory_space<vmem>>, %arg5: memref<16x144xf32, #tpu.memory_space<vmem>>, %arg6: memref<16x1xf32, #tpu.memory_space<vmem>>, %arg7: memref<1x16x256xf32, #tpu.memory_space<vmem>>, %arg8: memref<1x16x1xf32, #tpu.memory_space<vmem>>, %arg9: memref<1x16x1xf32, #tpu.memory_space<vmem>>, %arg10: memref<144x256xf32, #tpu.memory_space<vmem>>) attributes {dimension_semantics = [#tpu.dimension_semantics<parallel>], iteration_bounds = array<i64: 2>, scalar_prefetch = 0 : i64, scratch_operands = 1 : i64, tpu.core_type = #tpu.core_type<tc>, window_params = [{transform_indices = @transform_0, window_bounds = array<i64: 1, 16, 256>}, {transform_indices = @transform_1, window_bounds = array<i64: 1, 16, 1>}, {transform_indices = @transform_2, window_bounds = array<i64: 1, 16, 1>}, {pipeline_mode = #tpu.pipeline_mode<synchronous>, transform_indices = @transform_3, window_bounds = array<i64: 9, 256>}, {pipeline_mode = #tpu.pipeline_mode<synchronous>, transform_indices = @transform_4, window_bounds = array<i64: 16, 144>}, {pipeline_mode = #tpu.pipeline_mode<synchronous>, transform_indices = @transform_5, window_bounds = array<i64: 16, 1>}, {transform_indices = @transform_6, window_bounds = array<i64: 1, 16, 256>}, {transform_indices = @transform_7, window_bounds = array<i64: 1, 16, 1>}, {transform_indices = @transform_8, window_bounds = array<i64: 1, 16, 1>}]} {
    %c0 = arith.constant 0 : index
    %c0_0 = arith.constant 0 : index
    %c0_1 = arith.constant 0 : index
    %0 = vector.load %arg1[%c0, %c0_0, %c0_1] : memref<1x16x256xf32, #tpu.memory_space<vmem>>, vector<1x16x256xf32>
    %1 = vector.shape_cast %0 : vector<1x16x256xf32> to vector<16x256xf32>
    %c0_2 = arith.constant 0 : index
    %c0_3 = arith.constant 0 : index
    %c0_4 = arith.constant 0 : index
    %2 = vector.load %arg2[%c0_2, %c0_3, %c0_4] : memref<1x16x1xf32, #tpu.memory_space<vmem>>, vector<1x16x1xf32>
    %3 = vector.shape_cast %2 : vector<1x16x1xf32> to vector<16x1xf32>
    %4 = vector.broadcast %3 : vector<16x1xf32> to vector<16x256xf32>
    %5 = arith.mulf %1, %4 : vector<16x256xf32>
    %c0_5 = arith.constant 0 : index
    %c0_6 = arith.constant 0 : index
    %c0_7 = arith.constant 0 : index
    %6 = vector.load %arg3[%c0_5, %c0_6, %c0_7] : memref<1x16x1xf32, #tpu.memory_space<vmem>>, vector<1x16x1xf32>
    %7 = vector.shape_cast %6 : vector<1x16x1xf32> to vector<16x1xf32>
    %8 = vector.broadcast %7 : vector<16x1xf32> to vector<16x256xf32>
    %9 = arith.addf %5, %8 : vector<16x256xf32>
    %10 = arith.negf %9 : vector<16x256xf32>
    %11 = math.exp %10 : vector<16x256xf32>
    %cst = arith.constant 1.000000e+00 : f32
    %12 = vector.broadcast %cst : f32 to vector<16x256xf32>
    %13 = arith.addf %12, %11 : vector<16x256xf32>
    %14 = arith.divf %12, %13 : vector<16x256xf32>
    %15 = arith.mulf %9, %14 : vector<16x256xf32>
    %cst_8 = arith.constant 0.000000e+00 : f32
    %16 = vector.broadcast %cst_8 : f32 to vector<16x17xf32>
    %17 = vector.extract_strided_slice %15 {offsets = [0, 0], sizes = [16, 239], strides = [1, 1]} : vector<16x256xf32> to vector<16x239xf32>
    %18 = tpu.concatenate %16, %17 in 1 : vector<16x17xf32>, vector<16x239xf32> -> vector<16x256xf32>
    %c0_9 = arith.constant 0 : index
    %c0_10 = arith.constant 0 : index
    %19 = vector.load %arg4[%c0_9, %c0_10] : memref<9x256xf32, #tpu.memory_space<vmem>>, vector<1x256xf32>
    %20 = vector.broadcast %19 : vector<1x256xf32> to vector<16x256xf32>
    %21 = arith.mulf %18, %20 : vector<16x256xf32>
    %c0_11 = arith.constant 0 : index
    %c0_12 = arith.constant 0 : index
    %22 = vector.load %arg10[%c0_11, %c0_12] : memref<144x256xf32, #tpu.memory_space<vmem>>, vector<16x256xf32>
    tpu.vector_store %arg10[%c0_11, %c0_12], %21 {strides = array<i32>} : memref<144x256xf32, #tpu.memory_space<vmem>>, vector<16x256xf32>,
    %cst_13 = arith.constant 0.000000e+00 : f32
    %23 = vector.broadcast %cst_13 : f32 to vector<16x16xf32>
    %24 = vector.extract_strided_slice %15 {offsets = [0, 0], sizes = [16, 240], strides = [1, 1]} : vector<16x256xf32> to vector<16x240xf32>
    %25 = tpu.concatenate %23, %24 in 1 : vector<16x16xf32>, vector<16x240xf32> -> vector<16x256xf32>
    %c1 = arith.constant 1 : index
    %c0_14 = arith.constant 0 : index
    %26 = vector.load %arg4[%c1, %c0_14] : memref<9x256xf32, #tpu.memory_space<vmem>>, vector<1x256xf32>
    %27 = vector.broadcast %26 : vector<1x256xf32> to vector<16x256xf32>
    %28 = arith.mulf %25, %27 : vector<16x256xf32>
    %c16 = arith.constant 16 : index
    %c0_15 = arith.constant 0 : index
    %29 = vector.load %arg10[%c16, %c0_15] : memref<144x256xf32, #tpu.memory_space<vmem>>, vector<16x256xf32>
    tpu.vector_store %arg10[%c16, %c0_15], %28 {strides = array<i32>} : memref<144x256xf32, #tpu.memory_space<vmem>>, vector<16x256xf32>,
    %cst_16 = arith.constant 0.000000e+00 : f32
    %30 = vector.broadcast %cst_16 : f32 to vector<16x15xf32>
    %31 = vector.extract_strided_slice %15 {offsets = [0, 0], sizes = [16, 241], strides = [1, 1]} : vector<16x256xf32> to vector<16x241xf32>
    %32 = tpu.concatenate %30, %31 in 1 : vector<16x15xf32>, vector<16x241xf32> -> vector<16x256xf32>
    %c2 = arith.constant 2 : index
    %c0_17 = arith.constant 0 : index
    %33 = vector.load %arg4[%c2, %c0_17] : memref<9x256xf32, #tpu.memory_space<vmem>>, vector<1x256xf32>
    %34 = vector.broadcast %33 : vector<1x256xf32> to vector<16x256xf32>
    %35 = arith.mulf %32, %34 : vector<16x256xf32>
    %c32 = arith.constant 32 : index
    %c0_18 = arith.constant 0 : index
    %36 = vector.load %arg10[%c32, %c0_18] : memref<144x256xf32, #tpu.memory_space<vmem>>, vector<16x256xf32>
    tpu.vector_store %arg10[%c32, %c0_18], %35 {strides = array<i32>} : memref<144x256xf32, #tpu.memory_space<vmem>>, vector<16x256xf32>,
    %cst_19 = arith.constant 0.000000e+00 : f32
    %37 = vector.broadcast %cst_19 : f32 to vector<16x1xf32>
    %38 = vector.extract_strided_slice %15 {offsets = [0, 0], sizes = [16, 255], strides = [1, 1]} : vector<16x256xf32> to vector<16x255xf32>
    %39 = tpu.concatenate %37, %38 in 1 : vector<16x1xf32>, vector<16x255xf32> -> vector<16x256xf32>
    %c3 = arith.constant 3 : index
    %c0_20 = arith.constant 0 : index
    %40 = vector.load %arg4[%c3, %c0_20] : memref<9x256xf32, #tpu.memory_space<vmem>>, vector<1x256xf32>
    %41 = vector.broadcast %40 : vector<1x256xf32> to vector<16x256xf32>
    %42 = arith.mulf %39, %41 : vector<16x256xf32>
    %c48 = arith.constant 48 : index
    %c0_21 = arith.constant 0 : index
    %43 = vector.load %arg10[%c48, %c0_21] : memref<144x256xf32, #tpu.memory_space<vmem>>, vector<16x256xf32>
    tpu.vector_store %arg10[%c48, %c0_21], %42 {strides = array<i32>} : memref<144x256xf32, #tpu.memory_space<vmem>>, vector<16x256xf32>,
    %c64 = arith.constant 64 : index
    %c0_22 = arith.constant 0 : index
    %44 = vector.load %arg10[%c64, %c0_22] : memref<144x256xf32, #tpu.memory_space<vmem>>, vector<16x256xf32>
    tpu.vector_store %arg10[%c64, %c0_22], %15 {strides = array<i32>} : memref<144x256xf32, #tpu.memory_space<vmem>>, vector<16x256xf32>,
    %45 = vector.extract_strided_slice %15 {offsets = [0, 1], sizes = [16, 255], strides = [1, 1]} : vector<16x256xf32> to vector<16x255xf32>
    %cst_23 = arith.constant 0.000000e+00 : f32
    %46 = vector.broadcast %cst_23 : f32 to vector<16x1xf32>
    %47 = tpu.concatenate %45, %46 in 1 : vector<16x255xf32>, vector<16x1xf32> -> vector<16x256xf32>
    %c5 = arith.constant 5 : index
    %c0_24 = arith.constant 0 : index
    %48 = vector.load %arg4[%c5, %c0_24] : memref<9x256xf32, #tpu.memory_space<vmem>>, vector<1x256xf32>
    %49 = vector.broadcast %48 : vector<1x256xf32> to vector<16x256xf32>
    %50 = arith.mulf %47, %49 : vector<16x256xf32>
    %c80 = arith.constant 80 : index
    %c0_25 = arith.constant 0 : index
    %51 = vector.load %arg10[%c80, %c0_25] : memref<144x256xf32, #tpu.memory_space<vmem>>, vector<16x256xf32>
    tpu.vector_store %arg10[%c80, %c0_25], %50 {strides = array<i32>} : memref<144x256xf32, #tpu.memory_space<vmem>>, vector<16x256xf32>,
    %52 = vector.extract_strided_slice %15 {offsets = [0, 15], sizes = [16, 241], strides = [1, 1]} : vector<16x256xf32> to vector<16x241xf32>
    %cst_26 = arith.constant 0.000000e+00 : f32
    %53 = vector.broadcast %cst_26 : f32 to vector<16x15xf32>
    %54 = tpu.concatenate %52, %53 in 1 : vector<16x241xf32>, vector<16x15xf32> -> vector<16x256xf32>
    %c6 = arith.constant 6 : index
    %c0_27 = arith.constant 0 : index
    %55 = vector.load %arg4[%c6, %c0_27] : memref<9x256xf32, #tpu.memory_space<vmem>>, vector<1x256xf32>
    %56 = vector.broadcast %55 : vector<1x256xf32> to vector<16x256xf32>
    %57 = arith.mulf %54, %56 : vector<16x256xf32>
    %c96 = arith.constant 96 : index
    %c0_28 = arith.constant 0 : index
    %58 = vector.load %arg10[%c96, %c0_28] : memref<144x256xf32, #tpu.memory_space<vmem>>, vector<16x256xf32>
    tpu.vector_store %arg10[%c96, %c0_28], %57 {strides = array<i32>} : memref<144x256xf32, #tpu.memory_space<vmem>>, vector<16x256xf32>,
    %59 = vector.extract_strided_slice %15 {offsets = [0, 16], sizes = [16, 240], strides = [1, 1]} : vector<16x256xf32> to vector<16x240xf32>
    %cst_29 = arith.constant 0.000000e+00 : f32
    %60 = vector.broadcast %cst_29 : f32 to vector<16x16xf32>
    %61 = tpu.concatenate %59, %60 in 1 : vector<16x240xf32>, vector<16x16xf32> -> vector<16x256xf32>
    %c7 = arith.constant 7 : index
    %c0_30 = arith.constant 0 : index
    %62 = vector.load %arg4[%c7, %c0_30] : memref<9x256xf32, #tpu.memory_space<vmem>>, vector<1x256xf32>
    %63 = vector.broadcast %62 : vector<1x256xf32> to vector<16x256xf32>
    %64 = arith.mulf %61, %63 : vector<16x256xf32>
    %c112 = arith.constant 112 : index
    %c0_31 = arith.constant 0 : index
    %65 = vector.load %arg10[%c112, %c0_31] : memref<144x256xf32, #tpu.memory_space<vmem>>, vector<16x256xf32>
    tpu.vector_store %arg10[%c112, %c0_31], %64 {strides = array<i32>} : memref<144x256xf32, #tpu.memory_space<vmem>>, vector<16x256xf32>,
    %66 = vector.extract_strided_slice %15 {offsets = [0, 17], sizes = [16, 239], strides = [1, 1]} : vector<16x256xf32> to vector<16x239xf32>
    %cst_32 = arith.constant 0.000000e+00 : f32
    %67 = vector.broadcast %cst_32 : f32 to vector<16x17xf32>
    %68 = tpu.concatenate %66, %67 in 1 : vector<16x239xf32>, vector<16x17xf32> -> vector<16x256xf32>
    %c8 = arith.constant 8 : index
    %c0_33 = arith.constant 0 : index
    %69 = vector.load %arg4[%c8, %c0_33] : memref<9x256xf32, #tpu.memory_space<vmem>>, vector<1x256xf32>
    %70 = vector.broadcast %69 : vector<1x256xf32> to vector<16x256xf32>
    %71 = arith.mulf %68, %70 : vector<16x256xf32>
    %c128 = arith.constant 128 : index
    %c0_34 = arith.constant 0 : index
    %72 = vector.load %arg10[%c128, %c0_34] : memref<144x256xf32, #tpu.memory_space<vmem>>, vector<16x256xf32>
    tpu.vector_store %arg10[%c128, %c0_34], %71 {strides = array<i32>} : memref<144x256xf32, #tpu.memory_space<vmem>>, vector<16x256xf32>,
    %c0_35 = arith.constant 0 : index
    %c0_36 = arith.constant 0 : index
    %73 = vector.load %arg5[%c0_35, %c0_36] : memref<16x144xf32, #tpu.memory_space<vmem>>, vector<16x144xf32>
    %c0_37 = arith.constant 0 : index
    %c0_38 = arith.constant 0 : index
    %74 = vector.load %arg10[%c0_37, %c0_38] : memref<144x256xf32, #tpu.memory_space<vmem>>, vector<144x256xf32>
    %cst_39 = arith.constant dense<0.000000e+00> : vector<16x256xf32>
    %75 = tpu.matmul %73, %74, %cst_39 {dimension_numbers = #tpu.dot_dimension_numbers<[1], [0], [0], [1], [0, 0, 1, 1], [], []>} : vector<16x144xf32>, vector<144x256xf32>, vector<16x256xf32> -> vector<16x256xf32>
    %c0_40 = arith.constant 0 : index
    %c0_41 = arith.constant 0 : index
    %76 = vector.load %arg6[%c0_40, %c0_41] : memref<16x1xf32, #tpu.memory_space<vmem>>, vector<16x1xf32>
    %77 = vector.broadcast %76 : vector<16x1xf32> to vector<16x256xf32>
    %78 = arith.addf %75, %77 : vector<16x256xf32>
    %c0_42 = arith.constant 0 : index
    %c0_43 = arith.constant 0 : index
    %c0_44 = arith.constant 0 : index
    %79 = vector.load %arg7[%c0_42, %c0_43, %c0_44] : memref<1x16x256xf32, #tpu.memory_space<vmem>>, vector<1x16x256xf32>
    %80 = vector.shape_cast %79 : vector<1x16x256xf32> to vector<16x256xf32>
    %81 = vector.shape_cast %78 : vector<16x256xf32> to vector<1x16x256xf32>
    tpu.vector_store %arg7[%c0_42, %c0_43, %c0_44], %81 {strides = array<i32>} : memref<1x16x256xf32, #tpu.memory_space<vmem>>, vector<1x16x256xf32>,
    %cst_45 = arith.constant dense<0.000000e+00> : vector<16xf32>
    %82 = vector.multi_reduction <add>, %78, %cst_45 [1] : vector<16x256xf32> to vector<16xf32>
    %83 = vector.shape_cast %82 : vector<16xf32> to vector<16x1xf32>
    %c0_46 = arith.constant 0 : index
    %c0_47 = arith.constant 0 : index
    %c0_48 = arith.constant 0 : index
    %84 = vector.load %arg8[%c0_46, %c0_47, %c0_48] : memref<1x16x1xf32, #tpu.memory_space<vmem>>, vector<1x16x1xf32>
    %85 = vector.shape_cast %84 : vector<1x16x1xf32> to vector<16x1xf32>
    %86 = vector.shape_cast %83 : vector<16x1xf32> to vector<1x16x1xf32>
    tpu.vector_store %arg8[%c0_46, %c0_47, %c0_48], %86 {strides = array<i32>} : memref<1x16x1xf32, #tpu.memory_space<vmem>>, vector<1x16x1xf32>,
    %87 = arith.mulf %78, %78 : vector<16x256xf32>
    %cst_49 = arith.constant dense<0.000000e+00> : vector<16xf32>
    %88 = vector.multi_reduction <add>, %87, %cst_49 [1] : vector<16x256xf32> to vector<16xf32>
    %89 = vector.shape_cast %88 : vector<16xf32> to vector<16x1xf32>
    %c0_50 = arith.constant 0 : index
    %c0_51 = arith.constant 0 : index
    %c0_52 = arith.constant 0 : index
    %90 = vector.load %arg9[%c0_50, %c0_51, %c0_52] : memref<1x16x1xf32, #tpu.memory_space<vmem>>, vector<1x16x1xf32>
    %91 = vector.shape_cast %90 : vector<1x16x1xf32> to vector<16x1xf32>
    %92 = vector.shape_cast %89 : vector<16x1xf32> to vector<1x16x1xf32>
    tpu.vector_store %arg9[%c0_50, %c0_51, %c0_52], %92 {strides = array<i32>} : memref<1x16x1xf32, #tpu.memory_space<vmem>>, vector<1x16x1xf32>,
    return
  }
  func.func @transform_0(%arg0: i32) -> (i32, i32, i32) {
    %c0_i32 = arith.constant 0 : i32
    %c0_i32_0 = arith.constant 0 : i32
    %c0_i32_1 = arith.constant 0 : i32
    return %arg0, %c0_i32, %c0_i32_0 : i32, i32, i32
  }
  func.func @transform_1(%arg0: i32) -> (i32, i32, i32) {
    %c0_i32 = arith.constant 0 : i32
    %c0_i32_0 = arith.constant 0 : i32
    %c0_i32_1 = arith.constant 0 : i32
    return %arg0, %c0_i32, %c0_i32_0 : i32, i32, i32
  }
  func.func @transform_2(%arg0: i32) -> (i32, i32, i32) {
    %c0_i32 = arith.constant 0 : i32
    %c0_i32_0 = arith.constant 0 : i32
    %c0_i32_1 = arith.constant 0 : i32
    return %arg0, %c0_i32, %c0_i32_0 : i32, i32, i32
  }
  func.func @transform_3(%arg0: i32) -> (i32, i32) {
    %c0_i32 = arith.constant 0 : i32
    %c0_i32_0 = arith.constant 0 : i32
    %c0_i32_1 = arith.constant 0 : i32
    return %c0_i32, %c0_i32_0 : i32, i32
  }
  func.func @transform_4(%arg0: i32) -> (i32, i32) {
    %c0_i32 = arith.constant 0 : i32
    %c0_i32_0 = arith.constant 0 : i32
    %c0_i32_1 = arith.constant 0 : i32
    return %c0_i32, %c0_i32_0 : i32, i32
  }
  func.func @transform_5(%arg0: i32) -> (i32, i32) {
    %c0_i32 = arith.constant 0 : i32
    %c0_i32_0 = arith.constant 0 : i32
    %c0_i32_1 = arith.constant 0 : i32
    return %c0_i32, %c0_i32_0 : i32, i32
  }
  func.func @transform_6(%arg0: i32) -> (i32, i32, i32) {
    %c0_i32 = arith.constant 0 : i32
    %c0_i32_0 = arith.constant 0 : i32
    %c0_i32_1 = arith.constant 0 : i32
    return %arg0, %c0_i32, %c0_i32_0 : i32, i32, i32
  }
  func.func @transform_7(%arg0: i32) -> (i32, i32, i32) {
    %c0_i32 = arith.constant 0 : i32
    %c0_i32_0 = arith.constant 0 : i32
    %c0_i32_1 = arith.constant 0 : i32
    return %arg0, %c0_i32, %c0_i32_0 : i32, i32, i32
  }
  func.func @transform_8(%arg0: i32) -> (i32, i32, i32) {
    %c0_i32 = arith.constant 0 : i32
    %c0_i32_0 = arith.constant 0 : i32
    %c0_i32_1 = arith.constant 0 : i32
    return %arg0, %c0_i32, %c0_i32_0 : i32, i32, i32
  }
}

module attributes {stable_mosaic.version = 11 : i64} {
  func.func @kernel(%arg0: i32, %arg1: memref<1x16x256xf32, #tpu.memory_space<vmem>>, %arg2: memref<1x16x1xf32, #tpu.memory_space<vmem>>, %arg3: memref<1x16x1xf32, #tpu.memory_space<vmem>>, %arg4: memref<9x256xf32, #tpu.memory_space<vmem>>, %arg5: memref<16x160xf32, #tpu.memory_space<vmem>>, %arg6: memref<16x1xf32, #tpu.memory_space<vmem>>, %arg7: memref<1x16x256xf32, #tpu.memory_space<vmem>>, %arg8: memref<1x16x256xf32, #tpu.memory_space<vmem>>, %arg9: memref<1x16x1xf32, #tpu.memory_space<vmem>>, %arg10: memref<1x16x1xf32, #tpu.memory_space<vmem>>, %arg11: memref<160x256xf32, #tpu.memory_space<vmem>>) attributes {dimension_semantics = [#tpu.dimension_semantics<parallel>], iteration_bounds = array<i64: 2>, scalar_prefetch = 0 : i64, scratch_operands = 1 : i64, tpu.core_type = #tpu.core_type<tc>, window_params = [{transform_indices = @transform_0, window_bounds = array<i64: 1, 16, 256>}, {transform_indices = @transform_1, window_bounds = array<i64: 1, 16, 1>}, {transform_indices = @transform_2, window_bounds = array<i64: 1, 16, 1>}, {pipeline_mode = #tpu.pipeline_mode<synchronous>, transform_indices = @transform_3, window_bounds = array<i64: 9, 256>}, {pipeline_mode = #tpu.pipeline_mode<synchronous>, transform_indices = @transform_4, window_bounds = array<i64: 16, 160>}, {pipeline_mode = #tpu.pipeline_mode<synchronous>, transform_indices = @transform_5, window_bounds = array<i64: 16, 1>}, {transform_indices = @transform_6, window_bounds = array<i64: 1, 16, 256>}, {transform_indices = @transform_7, window_bounds = array<i64: 1, 16, 256>}, {transform_indices = @transform_8, window_bounds = array<i64: 1, 16, 1>}, {transform_indices = @transform_9, window_bounds = array<i64: 1, 16, 1>}]} {
    %c0 = arith.constant 0 : index
    %c0_0 = arith.constant 0 : index
    %c0_1 = arith.constant 0 : index
    %0 = vector.load %arg1[%c0, %c0_0, %c0_1] : memref<1x16x256xf32, #tpu.memory_space<vmem>>, vector<1x16x256xf32>
    %1 = vector.shape_cast %0 : vector<1x16x256xf32> to vector<16x256xf32>
    %c0_2 = arith.constant 0 : index
    %c0_3 = arith.constant 0 : index
    %c0_4 = arith.constant 0 : index
    %2 = vector.load %arg2[%c0_2, %c0_3, %c0_4] : memref<1x16x1xf32, #tpu.memory_space<vmem>>, vector<1x16x1xf32>
    %3 = vector.shape_cast %2 : vector<1x16x1xf32> to vector<16x1xf32>
    %4 = vector.broadcast %3 : vector<16x1xf32> to vector<16x256xf32>
    %5 = arith.mulf %1, %4 : vector<16x256xf32>
    %c0_5 = arith.constant 0 : index
    %c0_6 = arith.constant 0 : index
    %c0_7 = arith.constant 0 : index
    %6 = vector.load %arg3[%c0_5, %c0_6, %c0_7] : memref<1x16x1xf32, #tpu.memory_space<vmem>>, vector<1x16x1xf32>
    %7 = vector.shape_cast %6 : vector<1x16x1xf32> to vector<16x1xf32>
    %8 = vector.broadcast %7 : vector<16x1xf32> to vector<16x256xf32>
    %9 = arith.addf %5, %8 : vector<16x256xf32>
    %10 = arith.negf %9 : vector<16x256xf32>
    %11 = math.exp %10 : vector<16x256xf32>
    %cst = arith.constant 1.000000e+00 : f32
    %12 = vector.broadcast %cst : f32 to vector<16x256xf32>
    %13 = arith.addf %12, %11 : vector<16x256xf32>
    %14 = arith.divf %12, %13 : vector<16x256xf32>
    %15 = arith.mulf %9, %14 : vector<16x256xf32>
    %cst_8 = arith.constant 0.000000e+00 : f32
    %16 = vector.broadcast %cst_8 : f32 to vector<16x17xf32>
    %17 = vector.extract_strided_slice %15 {offsets = [0, 0], sizes = [16, 239], strides = [1, 1]} : vector<16x256xf32> to vector<16x239xf32>
    %18 = tpu.concatenate %16, %17 in 1 : vector<16x17xf32>, vector<16x239xf32> -> vector<16x256xf32>
    %c0_9 = arith.constant 0 : index
    %c0_10 = arith.constant 0 : index
    %19 = vector.load %arg4[%c0_9, %c0_10] : memref<9x256xf32, #tpu.memory_space<vmem>>, vector<1x256xf32>
    %20 = vector.broadcast %19 : vector<1x256xf32> to vector<16x256xf32>
    %21 = arith.mulf %18, %20 : vector<16x256xf32>
    %c0_11 = arith.constant 0 : index
    %c0_12 = arith.constant 0 : index
    %22 = vector.load %arg11[%c0_11, %c0_12] : memref<160x256xf32, #tpu.memory_space<vmem>>, vector<16x256xf32>
    tpu.vector_store %arg11[%c0_11, %c0_12], %21 {strides = array<i32>} : memref<160x256xf32, #tpu.memory_space<vmem>>, vector<16x256xf32>,
    %cst_13 = arith.constant 0.000000e+00 : f32
    %23 = vector.broadcast %cst_13 : f32 to vector<16x16xf32>
    %24 = vector.extract_strided_slice %15 {offsets = [0, 0], sizes = [16, 240], strides = [1, 1]} : vector<16x256xf32> to vector<16x240xf32>
    %25 = tpu.concatenate %23, %24 in 1 : vector<16x16xf32>, vector<16x240xf32> -> vector<16x256xf32>
    %c1 = arith.constant 1 : index
    %c0_14 = arith.constant 0 : index
    %26 = vector.load %arg4[%c1, %c0_14] : memref<9x256xf32, #tpu.memory_space<vmem>>, vector<1x256xf32>
    %27 = vector.broadcast %26 : vector<1x256xf32> to vector<16x256xf32>
    %28 = arith.mulf %25, %27 : vector<16x256xf32>
    %c16 = arith.constant 16 : index
    %c0_15 = arith.constant 0 : index
    %29 = vector.load %arg11[%c16, %c0_15] : memref<160x256xf32, #tpu.memory_space<vmem>>, vector<16x256xf32>
    tpu.vector_store %arg11[%c16, %c0_15], %28 {strides = array<i32>} : memref<160x256xf32, #tpu.memory_space<vmem>>, vector<16x256xf32>,
    %cst_16 = arith.constant 0.000000e+00 : f32
    %30 = vector.broadcast %cst_16 : f32 to vector<16x15xf32>
    %31 = vector.extract_strided_slice %15 {offsets = [0, 0], sizes = [16, 241], strides = [1, 1]} : vector<16x256xf32> to vector<16x241xf32>
    %32 = tpu.concatenate %30, %31 in 1 : vector<16x15xf32>, vector<16x241xf32> -> vector<16x256xf32>
    %c2 = arith.constant 2 : index
    %c0_17 = arith.constant 0 : index
    %33 = vector.load %arg4[%c2, %c0_17] : memref<9x256xf32, #tpu.memory_space<vmem>>, vector<1x256xf32>
    %34 = vector.broadcast %33 : vector<1x256xf32> to vector<16x256xf32>
    %35 = arith.mulf %32, %34 : vector<16x256xf32>
    %c32 = arith.constant 32 : index
    %c0_18 = arith.constant 0 : index
    %36 = vector.load %arg11[%c32, %c0_18] : memref<160x256xf32, #tpu.memory_space<vmem>>, vector<16x256xf32>
    tpu.vector_store %arg11[%c32, %c0_18], %35 {strides = array<i32>} : memref<160x256xf32, #tpu.memory_space<vmem>>, vector<16x256xf32>,
    %cst_19 = arith.constant 0.000000e+00 : f32
    %37 = vector.broadcast %cst_19 : f32 to vector<16x1xf32>
    %38 = vector.extract_strided_slice %15 {offsets = [0, 0], sizes = [16, 255], strides = [1, 1]} : vector<16x256xf32> to vector<16x255xf32>
    %39 = tpu.concatenate %37, %38 in 1 : vector<16x1xf32>, vector<16x255xf32> -> vector<16x256xf32>
    %c3 = arith.constant 3 : index
    %c0_20 = arith.constant 0 : index
    %40 = vector.load %arg4[%c3, %c0_20] : memref<9x256xf32, #tpu.memory_space<vmem>>, vector<1x256xf32>
    %41 = vector.broadcast %40 : vector<1x256xf32> to vector<16x256xf32>
    %42 = arith.mulf %39, %41 : vector<16x256xf32>
    %c48 = arith.constant 48 : index
    %c0_21 = arith.constant 0 : index
    %43 = vector.load %arg11[%c48, %c0_21] : memref<160x256xf32, #tpu.memory_space<vmem>>, vector<16x256xf32>
    tpu.vector_store %arg11[%c48, %c0_21], %42 {strides = array<i32>} : memref<160x256xf32, #tpu.memory_space<vmem>>, vector<16x256xf32>,
    %c64 = arith.constant 64 : index
    %c0_22 = arith.constant 0 : index
    %44 = vector.load %arg11[%c64, %c0_22] : memref<160x256xf32, #tpu.memory_space<vmem>>, vector<16x256xf32>
    tpu.vector_store %arg11[%c64, %c0_22], %15 {strides = array<i32>} : memref<160x256xf32, #tpu.memory_space<vmem>>, vector<16x256xf32>,
    %45 = vector.extract_strided_slice %15 {offsets = [0, 1], sizes = [16, 255], strides = [1, 1]} : vector<16x256xf32> to vector<16x255xf32>
    %cst_23 = arith.constant 0.000000e+00 : f32
    %46 = vector.broadcast %cst_23 : f32 to vector<16x1xf32>
    %47 = tpu.concatenate %45, %46 in 1 : vector<16x255xf32>, vector<16x1xf32> -> vector<16x256xf32>
    %c5 = arith.constant 5 : index
    %c0_24 = arith.constant 0 : index
    %48 = vector.load %arg4[%c5, %c0_24] : memref<9x256xf32, #tpu.memory_space<vmem>>, vector<1x256xf32>
    %49 = vector.broadcast %48 : vector<1x256xf32> to vector<16x256xf32>
    %50 = arith.mulf %47, %49 : vector<16x256xf32>
    %c80 = arith.constant 80 : index
    %c0_25 = arith.constant 0 : index
    %51 = vector.load %arg11[%c80, %c0_25] : memref<160x256xf32, #tpu.memory_space<vmem>>, vector<16x256xf32>
    tpu.vector_store %arg11[%c80, %c0_25], %50 {strides = array<i32>} : memref<160x256xf32, #tpu.memory_space<vmem>>, vector<16x256xf32>,
    %52 = vector.extract_strided_slice %15 {offsets = [0, 15], sizes = [16, 241], strides = [1, 1]} : vector<16x256xf32> to vector<16x241xf32>
    %cst_26 = arith.constant 0.000000e+00 : f32
    %53 = vector.broadcast %cst_26 : f32 to vector<16x15xf32>
    %54 = tpu.concatenate %52, %53 in 1 : vector<16x241xf32>, vector<16x15xf32> -> vector<16x256xf32>
    %c6 = arith.constant 6 : index
    %c0_27 = arith.constant 0 : index
    %55 = vector.load %arg4[%c6, %c0_27] : memref<9x256xf32, #tpu.memory_space<vmem>>, vector<1x256xf32>
    %56 = vector.broadcast %55 : vector<1x256xf32> to vector<16x256xf32>
    %57 = arith.mulf %54, %56 : vector<16x256xf32>
    %c96 = arith.constant 96 : index
    %c0_28 = arith.constant 0 : index
    %58 = vector.load %arg11[%c96, %c0_28] : memref<160x256xf32, #tpu.memory_space<vmem>>, vector<16x256xf32>
    tpu.vector_store %arg11[%c96, %c0_28], %57 {strides = array<i32>} : memref<160x256xf32, #tpu.memory_space<vmem>>, vector<16x256xf32>,
    %59 = vector.extract_strided_slice %15 {offsets = [0, 16], sizes = [16, 240], strides = [1, 1]} : vector<16x256xf32> to vector<16x240xf32>
    %cst_29 = arith.constant 0.000000e+00 : f32
    %60 = vector.broadcast %cst_29 : f32 to vector<16x16xf32>
    %61 = tpu.concatenate %59, %60 in 1 : vector<16x240xf32>, vector<16x16xf32> -> vector<16x256xf32>
    %c7 = arith.constant 7 : index
    %c0_30 = arith.constant 0 : index
    %62 = vector.load %arg4[%c7, %c0_30] : memref<9x256xf32, #tpu.memory_space<vmem>>, vector<1x256xf32>
    %63 = vector.broadcast %62 : vector<1x256xf32> to vector<16x256xf32>
    %64 = arith.mulf %61, %63 : vector<16x256xf32>
    %c112 = arith.constant 112 : index
    %c0_31 = arith.constant 0 : index
    %65 = vector.load %arg11[%c112, %c0_31] : memref<160x256xf32, #tpu.memory_space<vmem>>, vector<16x256xf32>
    tpu.vector_store %arg11[%c112, %c0_31], %64 {strides = array<i32>} : memref<160x256xf32, #tpu.memory_space<vmem>>, vector<16x256xf32>,
    %66 = vector.extract_strided_slice %15 {offsets = [0, 17], sizes = [16, 239], strides = [1, 1]} : vector<16x256xf32> to vector<16x239xf32>
    %cst_32 = arith.constant 0.000000e+00 : f32
    %67 = vector.broadcast %cst_32 : f32 to vector<16x17xf32>
    %68 = tpu.concatenate %66, %67 in 1 : vector<16x239xf32>, vector<16x17xf32> -> vector<16x256xf32>
    %c8 = arith.constant 8 : index
    %c0_33 = arith.constant 0 : index
    %69 = vector.load %arg4[%c8, %c0_33] : memref<9x256xf32, #tpu.memory_space<vmem>>, vector<1x256xf32>
    %70 = vector.broadcast %69 : vector<1x256xf32> to vector<16x256xf32>
    %71 = arith.mulf %68, %70 : vector<16x256xf32>
    %c128 = arith.constant 128 : index
    %c0_34 = arith.constant 0 : index
    %72 = vector.load %arg11[%c128, %c0_34] : memref<160x256xf32, #tpu.memory_space<vmem>>, vector<16x256xf32>
    tpu.vector_store %arg11[%c128, %c0_34], %71 {strides = array<i32>} : memref<160x256xf32, #tpu.memory_space<vmem>>, vector<16x256xf32>,
    %c0_35 = arith.constant 0 : index
    %c0_36 = arith.constant 0 : index
    %c0_37 = arith.constant 0 : index
    %73 = vector.load %arg7[%c0_35, %c0_36, %c0_37] : memref<1x16x256xf32, #tpu.memory_space<vmem>>, vector<1x16x256xf32>
    %74 = vector.shape_cast %73 : vector<1x16x256xf32> to vector<16x256xf32>
    %c144 = arith.constant 144 : index
    %c0_38 = arith.constant 0 : index
    %75 = vector.load %arg11[%c144, %c0_38] : memref<160x256xf32, #tpu.memory_space<vmem>>, vector<16x256xf32>
    tpu.vector_store %arg11[%c144, %c0_38], %74 {strides = array<i32>} : memref<160x256xf32, #tpu.memory_space<vmem>>, vector<16x256xf32>,
    %c0_39 = arith.constant 0 : index
    %c0_40 = arith.constant 0 : index
    %76 = vector.load %arg5[%c0_39, %c0_40] : memref<16x160xf32, #tpu.memory_space<vmem>>, vector<16x160xf32>
    %c0_41 = arith.constant 0 : index
    %c0_42 = arith.constant 0 : index
    %77 = vector.load %arg11[%c0_41, %c0_42] : memref<160x256xf32, #tpu.memory_space<vmem>>, vector<160x256xf32>
    %cst_43 = arith.constant dense<0.000000e+00> : vector<16x256xf32>
    %78 = tpu.matmul %76, %77, %cst_43 {dimension_numbers = #tpu.dot_dimension_numbers<[1], [0], [0], [1], [0, 0, 1, 1], [], []>} : vector<16x160xf32>, vector<160x256xf32>, vector<16x256xf32> -> vector<16x256xf32>
    %c0_44 = arith.constant 0 : index
    %c0_45 = arith.constant 0 : index
    %79 = vector.load %arg6[%c0_44, %c0_45] : memref<16x1xf32, #tpu.memory_space<vmem>>, vector<16x1xf32>
    %80 = vector.broadcast %79 : vector<16x1xf32> to vector<16x256xf32>
    %81 = arith.addf %78, %80 : vector<16x256xf32>
    %c0_46 = arith.constant 0 : index
    %c0_47 = arith.constant 0 : index
    %c0_48 = arith.constant 0 : index
    %82 = vector.load %arg8[%c0_46, %c0_47, %c0_48] : memref<1x16x256xf32, #tpu.memory_space<vmem>>, vector<1x16x256xf32>
    %83 = vector.shape_cast %82 : vector<1x16x256xf32> to vector<16x256xf32>
    %84 = vector.shape_cast %81 : vector<16x256xf32> to vector<1x16x256xf32>
    tpu.vector_store %arg8[%c0_46, %c0_47, %c0_48], %84 {strides = array<i32>} : memref<1x16x256xf32, #tpu.memory_space<vmem>>, vector<1x16x256xf32>,
    %cst_49 = arith.constant dense<0.000000e+00> : vector<16xf32>
    %85 = vector.multi_reduction <add>, %81, %cst_49 [1] : vector<16x256xf32> to vector<16xf32>
    %86 = vector.shape_cast %85 : vector<16xf32> to vector<16x1xf32>
    %c0_50 = arith.constant 0 : index
    %c0_51 = arith.constant 0 : index
    %c0_52 = arith.constant 0 : index
    %87 = vector.load %arg9[%c0_50, %c0_51, %c0_52] : memref<1x16x1xf32, #tpu.memory_space<vmem>>, vector<1x16x1xf32>
    %88 = vector.shape_cast %87 : vector<1x16x1xf32> to vector<16x1xf32>
    %89 = vector.shape_cast %86 : vector<16x1xf32> to vector<1x16x1xf32>
    tpu.vector_store %arg9[%c0_50, %c0_51, %c0_52], %89 {strides = array<i32>} : memref<1x16x1xf32, #tpu.memory_space<vmem>>, vector<1x16x1xf32>,
    %90 = arith.mulf %81, %81 : vector<16x256xf32>
    %cst_53 = arith.constant dense<0.000000e+00> : vector<16xf32>
    %91 = vector.multi_reduction <add>, %90, %cst_53 [1] : vector<16x256xf32> to vector<16xf32>
    %92 = vector.shape_cast %91 : vector<16xf32> to vector<16x1xf32>
    %c0_54 = arith.constant 0 : index
    %c0_55 = arith.constant 0 : index
    %c0_56 = arith.constant 0 : index
    %93 = vector.load %arg10[%c0_54, %c0_55, %c0_56] : memref<1x16x1xf32, #tpu.memory_space<vmem>>, vector<1x16x1xf32>
    %94 = vector.shape_cast %93 : vector<1x16x1xf32> to vector<16x1xf32>
    %95 = vector.shape_cast %92 : vector<16x1xf32> to vector<1x16x1xf32>
    tpu.vector_store %arg10[%c0_54, %c0_55, %c0_56], %95 {strides = array<i32>} : memref<1x16x1xf32, #tpu.memory_space<vmem>>, vector<1x16x1xf32>,
    return
  }
  func.func @transform_0(%arg0: i32) -> (i32, i32, i32) {
    %c0_i32 = arith.constant 0 : i32
    %c0_i32_0 = arith.constant 0 : i32
    %c0_i32_1 = arith.constant 0 : i32
    return %arg0, %c0_i32, %c0_i32_0 : i32, i32, i32
  }
  func.func @transform_1(%arg0: i32) -> (i32, i32, i32) {
    %c0_i32 = arith.constant 0 : i32
    %c0_i32_0 = arith.constant 0 : i32
    %c0_i32_1 = arith.constant 0 : i32
    return %arg0, %c0_i32, %c0_i32_0 : i32, i32, i32
  }
  func.func @transform_2(%arg0: i32) -> (i32, i32, i32) {
    %c0_i32 = arith.constant 0 : i32
    %c0_i32_0 = arith.constant 0 : i32
    %c0_i32_1 = arith.constant 0 : i32
    return %arg0, %c0_i32, %c0_i32_0 : i32, i32, i32
  }
  func.func @transform_3(%arg0: i32) -> (i32, i32) {
    %c0_i32 = arith.constant 0 : i32
    %c0_i32_0 = arith.constant 0 : i32
    %c0_i32_1 = arith.constant 0 : i32
    return %c0_i32, %c0_i32_0 : i32, i32
  }
  func.func @transform_4(%arg0: i32) -> (i32, i32) {
    %c0_i32 = arith.constant 0 : i32
    %c0_i32_0 = arith.constant 0 : i32
    %c0_i32_1 = arith.constant 0 : i32
    return %c0_i32, %c0_i32_0 : i32, i32
  }
  func.func @transform_5(%arg0: i32) -> (i32, i32) {
    %c0_i32 = arith.constant 0 : i32
    %c0_i32_0 = arith.constant 0 : i32
    %c0_i32_1 = arith.constant 0 : i32
    return %c0_i32, %c0_i32_0 : i32, i32
  }
  func.func @transform_6(%arg0: i32) -> (i32, i32, i32) {
    %c0_i32 = arith.constant 0 : i32
    %c0_i32_0 = arith.constant 0 : i32
    %c0_i32_1 = arith.constant 0 : i32
    return %arg0, %c0_i32, %c0_i32_0 : i32, i32, i32
  }
  func.func @transform_7(%arg0: i32) -> (i32, i32, i32) {
    %c0_i32 = arith.constant 0 : i32
    %c0_i32_0 = arith.constant 0 : i32
    %c0_i32_1 = arith.constant 0 : i32
    return %arg0, %c0_i32, %c0_i32_0 : i32, i32, i32
  }
  func.func @transform_8(%arg0: i32) -> (i32, i32, i32) {
    %c0_i32 = arith.constant 0 : i32
    %c0_i32_0 = arith.constant 0 : i32
    %c0_i32_1 = arith.constant 0 : i32
    return %arg0, %c0_i32, %c0_i32_0 : i32, i32, i32
  }
  func.func @transform_9(%arg0: i32) -> (i32, i32, i32) {
    %c0_i32 = arith.constant 0 : i32
    %c0_i32_0 = arith.constant 0 : i32
    %c0_i32_1 = arith.constant 0 : i32
    return %arg0, %c0_i32, %c0_i32_0 : i32, i32, i32
  }
}

</mosaic_0001>

<bundles_post_ra>
// kernel: tile.8
= control target key start
LH: loop header
LB: loop body
LE: loop exit
PB: predicated region body
PF: predicated region fallthrough
CT: control target
= control target key end

     0   :  { %s22_s0 = inlined_call_operand.vmem [shape: f32[8], index: 0, kind: input, shape index: {}]   ;;  %s23_s1 = inlined_call_operand.vmem [shape: f32[4,8], index: 1, kind: output, shape index: {}]  }
   0x1   :  { %v4_v0 = vld [vmem:[%s22_s0] ss:$0 sm:$0xff] }
   0x2   :  { %5 = vst [vmem:[%s23_s1] sm:$0xf] %v4_v0 }

// kernel: tile.0
= control target key start
LH: loop header
LB: loop body
LE: loop exit
PB: predicated region body
PF: predicated region fallthrough
CT: control target
= control target key end

     0   :  { %s66_s8 = smov 125   ;;  %vm7_vm0 = vcmask 7168   ;;  %s67_s11 = smov 126   ;;  %s117_s0 = inlined_call_operand.vmem [shape: f32[4,8], index: 0, kind: input, shape index: {}]   ;;  %s118_s1 = inlined_call_operand.vmem [shape: f32[32,1], index: 1, kind: output, shape index: {}]  }
   0x1   :  { %v4_v0 = vld [vmem:[%s117_s0] sm:$0xf]  ;;  %s65_s0 = smov 127   ;;  %s68_s12 = smov 124  }
   0x2   :  { %5 = vst [vmem:[#allocation0] sm:$0xf] %v4_v0  ;;  %s69_s13 = smov 123   ;;  %s70_s14 = smov 122  }
   0x3   :  { %s71_s15 = smov 121  }
   0x9   :  { %v9_v1 = vld [vmem:[#allocation0] sm:$0xf]  }
   0xa   :  { %v21_v2 = vld [vmem:[#allocation0] sm:$0xf]   ;;  %10 = vrot.lane.b32.xlu0 %v9_v1, %s65_s0 }
   0xb   :  { %22 = vrot.lane.b32.xlu1 %v21_v2, %s66_s8  ;;  %v15_v3 = vld [vmem:[#allocation0] sm:$0xf]  }
   0xc   :  { %v27_v4 = vld [vmem:[#allocation0] sm:$0xf]  }
   0xd   :  { %v6_v5 = vld [vmem:[#allocation0] sm:$0xf]  }
   0xe   :  { %8 = vst.msk [vmem:[%s118_s1] ss:$8 sm:$0xf] %vm7_vm0, %v6_v5   ;;  %16 = vrot.lane.b32.xlu0 %v15_v3, %s67_s11  ;;  %v33_v6 = vld [vmem:[#allocation0] sm:$0xf]  }
   0xf   :  { %28 = vrot.lane.b32.xlu1 %v27_v4, %s68_s12  ;;  %v39_v7 = vld [vmem:[#allocation0] sm:$0xf]  }
  0x10   :  { %v45_v8 = vld [vmem:[#allocation0] sm:$0xf]  }
  0x12   :  { %34 = vrot.lane.b32.xlu0 %v33_v6, %s69_s13 }
  0x13   :  { %40 = vrot.lane.b32.xlu1 %v39_v7, %s70_s14 }
  0x16   :  { %46 = vrot.lane.b32.xlu0 %v45_v8, %s71_s15 }
  0x7c   :  { %v11_v9 = vpop.permute.xlu0 %10  }
  0x7d   :  { %v23_v10 = vpop.permute.xlu1 %22   ;;  %51 = vst.msk [vmem:[%s118_s1 + $0x1] ss:$8 sm:$0xf] %vm7_vm0, %v11_v9  }
  0x7e   :  { %53 = vst.msk [vmem:[%s118_s1 + $0x3] ss:$8 sm:$0xf] %vm7_vm0, %v23_v10  }
  0x80   :  { %v17_v11 = vpop.permute.xlu0 %16  }
  0x81   :  { %v29_v12 = vpop.permute.xlu1 %28   ;;  %52 = vst.msk [vmem:[%s118_s1 + $0x2] ss:$8 sm:$0xf] %vm7_vm0, %v17_v11  }
  0x82   :  { %54 = vst.msk [vmem:[%s118_s1 + $0x4] ss:$8 sm:$0xf] %vm7_vm0, %v29_v12  }
  0x84   :  { %v35_v13 = vpop.permute.xlu0 %34  }
  0x85   :  { %v41_v14 = vpop.permute.xlu1 %40   ;;  %55 = vst.msk [vmem:[%s118_s1 + $0x5] ss:$8 sm:$0xf] %vm7_vm0, %v35_v13  }
  0x86   :  { %56 = vst.msk [vmem:[%s118_s1 + $0x6] ss:$8 sm:$0xf] %vm7_vm0, %v41_v14  }
  0x88   :  { %v47_v15 = vpop.permute.xlu0 %46  }
  0x89   :  { %57 = vst.msk [vmem:[%s118_s1 + $0x7] ss:$8 sm:$0xf] %vm7_vm0, %v47_v15  }

// kernel: upblock_forward.5
= control target key start
LH: loop header
LB: loop body
LE: loop exit
PB: predicated region body
PF: predicated region fallthrough
CT: control target
= control target key end

     0   :  { %s833_s21 = smov 0   ;;  %s947_s0 = inlined_call_operand.vmem [shape: f32[2,8,64], index: 0, kind: input, shape index: {}]   ;;  %s948_s1 = inlined_call_operand.vmem [shape: f32[9,64], index: 1, kind: input, shape index: {}]   ;;  %s949_s2 = inlined_call_operand.vmem [shape: f32[32,72], index: 2, kind: input, shape index: {}]   ;;  %s950_s3 = inlined_call_operand.vmem [shape: f32[32,1], index: 3, kind: input, shape index: {}]   ;;  %s951_s4 = inlined_call_operand.vmem [shape: f32[2,32,64], index: 4, kind: output, shape index: {0}]   ;;  %s952_s5 = inlined_call_operand.vmem [shape: f32[2,32,1], index: 5, kind: output, shape index: {1}]   ;;  %s953_s6 = inlined_call_operand.vmem [shape: f32[2,32,1], index: 6, kind: output, shape index: {2}]  }
   0x1 LB: > { %s670_s22 = sadd.s32 4294967295, %s787_s21   ;;  %p674_p0 = scmp.ge.s32.totalorder %s787_s21, 1  ;;  %s787_s21 = sphi %s833_s21, %s17_s21  }
   0x2   : > { %p216_p1 = scmp.lt.s32.totalorder %s787_s21, 3 }
   0x4   : > { %p217_p2 = pnand %p674_p0, %p216_p1 }
   0x5   : > { %p255_p3 = scmp.lt.s32.totalorder (!%p217_p2), %s670_s22, 1  ;;  %vm287_vm0 = vcmask (!%p217_p2), 523264   ;;  %s789_s27 = smov (!%p217_p2), 7   ;;  %v374_v1 = vld [vmem:[%s949_s2] sm:$0xff] (!%p217_p2)  ;;  %vm411_vm1 = vcmask (!%p217_p2), 588800   ;;  %v376_v2 = vld [vmem:[%s949_s2 + $0x10] sm:$0xff] (!%p217_p2) }
   0x6   : > { %220 = sbr.rel (%p217_p2) target bundleno = 537 (0x219), region = 36  ;;  %s790_s28 = smov (!%p217_p2), 9   ;;  %730 = vmatprep.mubr.msk.f32.mxu0 (!%p217_p2), %vm411_vm1, %v374_v1  ;;  %733 = vmatprep.mubr.msk.f32.mxu1 (!%p217_p2), %vm411_vm1, %v376_v2  ;;  %v387_v3 = vld [vmem:[%s950_s3] sm:$0xff] (!%p217_p2)  ;;  %v388_v4 = vld [vmem:[%s950_s3 + $0x8] sm:$0xff] (!%p217_p2)  ;;  %v797_v5 = vmov (!%p217_p2), 0   ;;  %v390_v6 = vld [vmem:[%s950_s3 + $0x18] sm:$0xff] (!%p217_p2) }
   0x7   : > { %s791_s29 = smov (!%p217_p2), 1   ;;  %s792_s30 = smov (!%p217_p2), 8   ;;  %779 = vset.pattern.permute.xlu0 (!%p217_p2), %v797_v5  ;;  %780 = vset.pattern.permute.xlu1 (!%p217_p2), %v797_v5  ;;  %v389_v7 = vld [vmem:[%s950_s3 + $0x10] sm:$0xff] (!%p217_p2)  ;;  %vm304_vm2 = vcmask (!%p217_p2), 56320   ;;  %vm279_vm3 = vcmask (!%p217_p2), 72704   ;;  %vm316_vm4 = vcmask (!%p217_p2), 7168  }
   0x8   : > { %s793_s7 = smov (!%p217_p2), 127   ;;  %s794_s8 = smov (!%p217_p2), 121   ;;  %v684_v8 = vld [vmem:[%s948_s1 + $0x2] ss:$0 sm:$0xff] (!%p217_p2)  ;;  %v682_v9 = vld [vmem:[%s948_s1] ss:$0 sm:$0xff] (!%p217_p2) }
   0x9   : > { %s795_s9 = smov (!%p217_p2), 120   ;;  %s796_s10 = smov (!%p217_p2), 119   ;;  %vm292_vm5 = vcmask (!%p217_p2), 64512   ;;  %v685_v16 = vld [vmem:[%s948_s1 + $0x3] ss:$0 sm:$0xff] (!%p217_p2)  ;;  %vm329_vm6 = vcmask (!%p217_p2), 515072  }
   0xa   : > { %v683_v17 = vld [vmem:[%s948_s1 + $0x1] ss:$0 sm:$0xff] (!%p217_p2)  ;;  %vm341_vm7 = vcmask (!%p217_p2), 465920   ;;  %v686_v24 = vld [vmem:[%s948_s1 + $0x5] ss:$0 sm:$0xff] (!%p217_p2)  ;;  %vm353_vm8 = vcmask (!%p217_p2), 457728  }
   0xb   : > { %v687_v25 = vld [vmem:[%s948_s1 + $0x6] ss:$0 sm:$0xff] (!%p217_p2)  ;;  %vm365_vm9 = vcmask (!%p217_p2), 449536   ;;  %v688_v32 = vld [vmem:[%s948_s1 + $0x7] ss:$0 sm:$0xff] (!%p217_p2)  ;;  %v375_v53 = vld [vmem:[%s949_s2 + $0x8] sm:$0xff] (!%p217_p2) }
   0xc   : > { %v689_v33 = vld [vmem:[%s948_s1 + $0x8] ss:$0 sm:$0xff] (!%p217_p2)  ;;  %v377_v54 = vld [vmem:[%s949_s2 + $0x18] sm:$0xff] (!%p217_p2) }
   0xd   : > { %s955_s22 = smov (!%p255_p3, %s670_s22), 1 }
   0xe   : > { %s675_s23 = sshll.u32 %s955_s22, 3 }
   0xf   : > { %s258_s26 = scalar_lea.vmem %s947_s0, %s675_s23  ;;  %s910_s23 = sshll.u32 %s955_s22, 5 }
  0x10   : > { %v274_v0 = vld [vmem:[%s258_s26] sm:$0xff]  ;;  %s263_s26 = scalar_lea.vmem %s951_s4, %s910_s23 }
  0x11   : > { %301 = vrot.lane.b32.xlu1 %v274_v0, %s789_s27  ;;  %325 = vst.msk [vmem:[#allocation2 + $0x20] sm:$0xff] %vm287_vm0, %v274_v0  ;;  %276 = vrot.lane.b32.xlu0 %v274_v0, %s790_s28  ;;  %s268_s28 = scalar_lea.vmem %s952_s5, %s910_s23 }
  0x15   : > { %313 = vrot.lane.b32.xlu1 %v274_v0, %s791_s29  ;;  %289 = vrot.lane.b32.xlu0 %v274_v0, %s792_s30 }
  0x18   : > { %v382_v45 = vld [vmem:[#allocation2 + $0x20] sm:$0xff] }
  0x19   : > { %326 = vrot.lane.b32.xlu0 %v274_v0, %s793_s7  ;;  %338 = vrot.lane.b32.xlu1 %v274_v0, %s794_s8  ;;  %s273_s7 = scalar_lea.vmem %s953_s6, %s910_s23 }
  0x1d   : > { %350 = vrot.lane.b32.xlu0 %v274_v0, %s795_s9  ;;  %362 = vrot.lane.b32.xlu1 %v274_v0, %s796_s10 }
  0x21   : > { %393 = vperm.xlu0 %779, %v387_v3   ;;  %398 = vperm.xlu1 %780, %v388_v4  }
  0x25   : > { %408 = vperm.xlu0 %779, %v390_v6   ;;  %403 = vperm.xlu1 %780, %v389_v7  }
  0x83   : > { %v302_v10 = vpop.permute.xlu1 %301  ;;  %v277_v11 = vpop.permute.xlu0 %276 }
  0x84   : > { %v305_v12 = vsel %vm304_vm2, 0.0, %v302_v10  ;;  %v280_v13 = vsel %vm279_vm3, 0.0, %v277_v11 }
  0x85   : > { %v311_v14 = vmul.f32 %v684_v8, %v305_v12  ;;  %v286_v15 = vmul.f32 %v682_v9, %v280_v13 }
  0x87   : > { %312 = vst.msk [vmem:[#allocation2 + $0x10] sm:$0xff] %vm287_vm0, %v311_v14  ;;  %288 = vst.msk [vmem:[#allocation2] sm:$0xff] %vm287_vm0, %v286_v15  ;;  %v314_v18 = vpop.permute.xlu1 %313  ;;  %v290_v19 = vpop.permute.xlu0 %289 }
  0x88   : > { %v317_v20 = vsel %vm316_vm4, 0.0, %v314_v18  ;;  %v293_v21 = vsel %vm292_vm5, 0.0, %v290_v19 }
  0x89   : > { %v323_v22 = vmul.f32 %v685_v16, %v317_v20  ;;  %v299_v23 = vmul.f32 %v683_v17, %v293_v21 }
  0x8b   : > { %324 = vst.msk [vmem:[#allocation2 + $0x18] sm:$0xff] %vm287_vm0, %v323_v22  ;;  %300 = vst.msk [vmem:[#allocation2 + $0x8] sm:$0xff] %vm287_vm0, %v299_v23  ;;  %v327_v26 = vpop.permute.xlu0 %326  ;;  %v339_v27 = vpop.permute.xlu1 %338 }
  0x8c   : > { %v330_v28 = vsel %vm329_vm6, %v327_v26, 0.0  ;;  %v342_v29 = vsel %vm341_vm7, %v339_v27, 0.0 }
  0x8d   : > { %v336_v30 = vmul.f32 %v686_v24, %v330_v28  ;;  %v348_v31 = vmul.f32 %v687_v25, %v342_v29 }
  0x8e   : > { %v378_v39 = vld [vmem:[#allocation2] sm:$0xff]  ;;  %v380_v42 = vld [vmem:[#allocation2 + $0x10] sm:$0xff] }
  0x8f   : > { %337 = vst.msk [vmem:[#allocation2 + $0x28] sm:$0xff] %vm287_vm0, %v336_v30  ;;  %349 = vst.msk [vmem:[#allocation2 + $0x30] sm:$0xff] %vm287_vm0, %v348_v31  ;;  %v351_v34 = vpop.permute.xlu0 %350  ;;  %v363_v35 = vpop.permute.xlu1 %362 }
  0x90   : > { %v354_v36 = vsel %vm353_vm8, %v351_v34, 0.0  ;;  %v366_v37 = vsel %vm365_vm9, %v363_v35, 0.0 }
  0x91   : > { %v360_v38 = vmul.f32 %v688_v32, %v354_v36  ;;  %v372_v40 = vmul.f32 %v689_v33, %v366_v37 }
  0x92   : > { %v379_v41 = vld [vmem:[#allocation2 + $0x8] sm:$0xff]  ;;  %v381_v43 = vld [vmem:[#allocation2 + $0x18] sm:$0xff] }
  0x93   : > { %361 = vst.msk [vmem:[#allocation2 + $0x38] sm:$0xff] %vm287_vm0, %v360_v38  ;;  %v736_v44 = vpack.c.bf16 %v379_v41, %v378_v39  ;;  %373 = vst.msk [vmem:[#allocation2 + $0x40] sm:$0xff] %vm287_vm0, %v372_v40  ;;  %v740_v46 = vpack.c.bf16 %v381_v43, %v380_v42 }
  0x95   : > { %737 = vmatprep.subr.bf16.mxu0 %v736_v44  ;;  %752 = vmatprep.subr.bf16.mxu1 %v736_v44 }
  0x96   : > { %739 = vmatpush3.bf16.msra.mxu0 %v736_v44  ;;  %757 = vmatpush3.bf16.msra.mxu1 %v736_v44  ;;  %v383_v47 = vld [vmem:[#allocation2 + $0x28] sm:$0xff]  ;;  %v384_v49 = vld [vmem:[#allocation2 + $0x30] sm:$0xff] }
  0x97   : > { %741 = vmatprep.subr.bf16.mxu0 %v740_v46  ;;  %753 = vmatprep.subr.bf16.mxu1 %v740_v46  ;;  %v744_v48 = vpack.c.bf16 %v383_v47, %v382_v45 }
  0x9a   : > { %743 = vmatpush3.bf16.msra.mxu0 %v740_v46  ;;  %758 = vmatpush3.bf16.msra.mxu1 %v740_v46  ;;  %v385_v50 = vld [vmem:[#allocation2 + $0x38] sm:$0xff]  ;;  %v386_v52 = vld [vmem:[#allocation2 + $0x40] sm:$0xff] }
  0x9b   : > { %745 = vmatprep.subr.bf16.mxu0 %v744_v48  ;;  %754 = vmatprep.subr.bf16.mxu1 %v744_v48  ;;  %v748_v51 = vpack.c.bf16 %v385_v50, %v384_v49 }
  0x9e   : > { %747 = vmatpush3.bf16.msra.mxu0 %v744_v48  ;;  %759 = vmatpush3.bf16.msra.mxu1 %v744_v48 }
  0x9f   : > { %749 = vmatprep.subr.bf16.mxu0 %v748_v51  ;;  %755 = vmatprep.subr.bf16.mxu1 %v748_v51 }
  0xa0   : > { %v394_v55 = vpop.permute.xlu0 %393  ;;  %v399_v56 = vpop.permute.xlu1 %398 }
  0xa2   : > { %751 = vmatpush3.bf16.msra.mxu0 %v748_v51  ;;  %760 = vmatpush3.bf16.msra.mxu1 %v748_v51 }
  0xa3   : > { %728 = vmatprep.subr.mxu0 %v386_v52  ;;  %756 = vmatprep.subr.mxu1 %v386_v52 }
  0xa4   : > { %v409_v57 = vpop.permute.xlu0 %408  ;;  %v404_v58 = vpop.permute.xlu1 %403 }
  0xa6   : > { %729 = vmatpush3.msra.mxu0 %v386_v52  ;;  %761 = vmatpush3.msra.mxu1 %v386_v52 }
  0xa7   : > { %731 = vmatmul.mubr.msk.f32.vlgmr.msra.gmra.mrb[0].mxu0 %vm411_vm1, %v375_v53  ;;  %734 = vmatmul.mubr.msk.f32.vlgmr.msra.gmra.mrb[0].mxu1 %vm411_vm1, %v377_v54 }
 0x17a   : > { %v732_v59 = vpop.f32.mrb[0].mxu0  ;;  %v735_v60 = vpop.f32.mrb[0].mxu1 }
 0x17b   : > { %v496_v61 = vadd.f32 %v732_v59, %v399_v56  ;;  %v506_v62 = vadd.f32 %v735_v60, %v409_v57  ;;  %v490_v63 = vpop.f32.mrb[1].mxu0  ;;  %v500_v0 = vpop.f32.mrb[1].mxu1 }
 0x17c   : > { %v491_v1 = vadd.f32 %v490_v63, %v394_v55  ;;  %v501_v2 = vadd.f32 %v500_v0, %v404_v58 }
 0x17d   : > { %510 = vst.msk [vmem:[%s263_s26 + $0x8] sm:$0xff] %vm287_vm0, %v496_v61  ;;  %512 = vst.msk [vmem:[%s263_s26 + $0x18] sm:$0xff] %vm287_vm0, %v506_v62  ;;  %v522_v3 = vsel %vm287_vm0, %v506_v62, 0.0  ;;  %v516_v4 = vsel %vm287_vm0, %v496_v61, 0.0  ;;  %v530_v8 = vmul.f32 %v496_v61, %v496_v61  ;;  %v532_v12 = vmul.f32 %v506_v62, %v506_v62 }
 0x17e   : > { %509 = vst.msk [vmem:[%s263_s26] sm:$0xff] %vm287_vm0, %v491_v1  ;;  %511 = vst.msk [vmem:[%s263_s26 + $0x10] sm:$0xff] %vm287_vm0, %v501_v2  ;;  %523 = vadd.xlane.f32.xlu1 %v522_v3  ;;  %517 = vadd.xlane.f32.xlu0 %v516_v4  ;;  %v519_v5 = vsel %vm287_vm0, %v501_v2, 0.0  ;;  %v513_v6 = vsel %vm287_vm0, %v491_v1, 0.0  ;;  %v529_v7 = vmul.f32 %v491_v1, %v491_v1 }
 0x17f   : > { %v536_v10 = vsel %vm287_vm0, %v530_v8, 0.0  ;;  %v531_v11 = vmul.f32 %v501_v2, %v501_v2  ;;  %v542_v14 = vsel %vm287_vm0, %v532_v12, 0.0 }
 0x180   : > { %v533_v9 = vsel %vm287_vm0, %v529_v7, 0.0 }
 0x181   : > { %v539_v13 = vsel %vm287_vm0, %v531_v11, 0.0 }
 0x182   : > { %520 = vadd.xlane.f32.xlu0 %v519_v5  ;;  %514 = vadd.xlane.f32.xlu1 %v513_v6 }
 0x186   : > { %534 = vadd.xlane.f32.xlu0 %v533_v9  ;;  %537 = vadd.xlane.f32.xlu1 %v536_v10 }
 0x18a   : > { %540 = vadd.xlane.f32.xlu0 %v539_v13  ;;  %543 = vadd.xlane.f32.xlu1 %v542_v14 }
 0x20b   : > { %v524_v15 = vpop.xlane.xlu1 %523  ;;  %v518_v16 = vpop.xlane.xlu0 %517 }
 0x20c   : > { %528 = vst.msk [vmem:[%s268_s28 + $0x18] sm:$0xff] %vm316_vm4, %v524_v15  ;;  %526 = vst.msk [vmem:[%s268_s28 + $0x8] sm:$0xff] %vm316_vm4, %v518_v16 }
 0x20f   : > { %v521_v17 = vpop.xlane.xlu0 %520  ;;  %v515_v18 = vpop.xlane.xlu1 %514 }
 0x210   : > { %527 = vst.msk [vmem:[%s268_s28 + $0x10] sm:$0xff] %vm316_vm4, %v521_v17  ;;  %525 = vst.msk [vmem:[%s268_s28] sm:$0xff] %vm316_vm4, %v515_v18 }
 0x213   : > { %v535_v19 = vpop.xlane.xlu0 %534  ;;  %v538_v20 = vpop.xlane.xlu1 %537 }
 0x214   : > { %545 = vst.msk [vmem:[%s273_s7] sm:$0xff] %vm316_vm4, %v535_v19  ;;  %546 = vst.msk [vmem:[%s273_s7 + $0x8] sm:$0xff] %vm316_vm4, %v538_v20 }
 0x217   : > { %v541_v21 = vpop.xlane.xlu0 %540  ;;  %v544_v22 = vpop.xlane.xlu1 %543 }
 0x218   : > { %547 = vst.msk [vmem:[%s273_s7 + $0x10] sm:$0xff] %vm316_vm4, %v541_v21  ;;  %548 = vst.msk [vmem:[%s273_s7 + $0x18] sm:$0xff] %vm316_vm4, %v544_v22 }
 0x219 PF: > { %s17_s21 = sadd.s32 1, %s787_s21  }
 0x21a   : > { %p14_p4 = scmp.ge.s32.totalorder %s17_s21, 4  }
 0x21c   :  { %16 = sbr.rel (!%p14_p4) target bundleno = 1 (0x1), region = 90 }

// kernel: upblock_forward.6
= control target key start
LH: loop header
LB: loop body
LE: loop exit
PB: predicated region body
PF: predicated region fallthrough
CT: control target
= control target key end

     0   :  { %s1042_s27 = smov 0   ;;  %s1173_s0 = inlined_call_operand.vmem [shape: f32[2,8,256], index: 0, kind: input, shape index: {}]   ;;  %s1174_s1 = inlined_call_operand.vmem [shape: f32[2,8,1], index: 1, kind: input, shape index: {}]   ;;  %s1175_s2 = inlined_call_operand.vmem [shape: f32[2,8,1], index: 2, kind: input, shape index: {}]   ;;  %s1176_s3 = inlined_call_operand.vmem [shape: f32[9,256], index: 3, kind: input, shape index: {}]   ;;  %s1177_s4 = inlined_call_operand.vmem [shape: f32[16,72], index: 4, kind: input, shape index: {}]   ;;  %s1178_s5 = inlined_call_operand.vmem [shape: f32[16,1], index: 5, kind: input, shape index: {}]   ;;  %s1179_s6 = inlined_call_operand.vmem [shape: f32[2,16,256], index: 6, kind: output, shape index: {0}]   ;;  %s1180_s7 = inlined_call_operand.vmem [shape: f32[2,16,1], index: 7, kind: output, shape index: {1}]   ;;  %s1181_s8 = inlined_call_operand.vmem [shape: f32[2,16,1], index: 8, kind: output, shape index: {2}]  }
   0x1 LB: > { %s893_s28 = sadd.s32 4294967295, %s985_s27   ;;  %p897_p0 = scmp.ge.s32.totalorder %s985_s27, 1  ;;  %s985_s27 = sphi %s1042_s27, %s19_s27  }
   0x2   : > { %p285_p1 = scmp.lt.s32.totalorder %s985_s27, 3 }
   0x4   : > { %p286_p2 = pnand %p897_p0, %p285_p1 }
   0x5   : > { %p337_p3 = scmp.lt.s32.totalorder (!%p286_p2), %s893_s28, 1  ;;  %v987_v0 = vmov (!%p286_p2), 0   ;;  %s988_s18 = smov (!%p286_p2), 16   ;;  %v628_v21 = vld [vmem:[%s1178_s5] sm:$0xff] (!%p286_p2)  ;;  %v996_v22 = vmov (!%p286_p2), 0.0   ;;  %v629_v23 = vld [vmem:[%s1178_s5 + $0x8] sm:$0xff] (!%p286_p2)  ;;  %v410_v24 = vlaneseq (!%p286_p2) }
   0x6   : > { %289 = sbr.rel (%p286_p2) target bundleno = 700 (0x2bc), region = 44  ;;  %969 = vset.pattern.permute.xlu0 (!%p286_p2), %v987_v0  ;;  %970 = vset.pattern.permute.xlu1 (!%p286_p2), %v987_v0  ;;  %s989_s19 = smov (!%p286_p2), 17   ;;  %v910_v29 = vld [vmem:[%s1176_s3 + $0x1] ss:$8 sm:$0x3] (!%p286_p2)  ;;  %vm428_vm0 = vcmask (!%p286_p2), 130048  }
   0x7   : > { %s990_s20 = smov (!%p286_p2), 15   ;;  %s991_s21 = smov (!%p286_p2), 1   ;;  %711 = vmatprep.mubr.f32.mxu0 (!%p286_p2), %v996_v22  ;;  %717 = vmatprep.mubr.f32.mxu1 (!%p286_p2), %v996_v22  ;;  %v411_v25 = vshrl.u32 (!%p286_p2), %v410_v24, 7  ;;  %v408_v30 = vld [vmem:[%s1176_s3] ss:$8 sm:$0x3] (!%p286_p2) }
   0x8   : > { %s992_s22 = smov (!%p286_p2), 127   ;;  %s993_s23 = smov (!%p286_p2), 113   ;;  %vm403_vm1 = vcmask (!%p286_p2), 138240   ;;  %v912_v47 = vld [vmem:[%s1176_s3 + $0x3] ss:$8 sm:$0x3] (!%p286_p2) }
   0x9   : > { %s994_s24 = smov (!%p286_p2), 111   ;;  %s995_s25 = smov (!%p286_p2), 112   ;;  %v1092_v28 = vsub.s32 (!%p286_p2), 0, %v411_v25  ;;  %v1100_v31 = vsub.s32 (!%p286_p2), 1, %v411_v25  ;;  %vm480_vm2 = vcmask (!%p286_p2), 7168   ;;  %vm508_vm3 = vcmask (!%p286_p2), 1039360  }
   0xa   : > { %v913_v49 = vld [vmem:[%s1176_s3 + $0x5] ss:$8 sm:$0x3] (!%p286_p2)  ;;  %v911_v50 = vld [vmem:[%s1176_s3 + $0x2] ss:$8 sm:$0x3] (!%p286_p2) }
   0xb   : > { %v439_v34 = vrot.slane (!%p286_p2), %v910_v29, %v1092_v28  ;;  %v413_v35 = vrot.slane (!%p286_p2), %v408_v30, %v1092_v28  ;;  %v417_v38 = vrot.slane (!%p286_p2), %v408_v30, %v1100_v31  ;;  %v443_v39 = vrot.slane (!%p286_p2), %v910_v29, %v1100_v31 }
   0xc   : > { %vm454_vm4 = vcmask (!%p286_p2), 121856   ;;  %v491_v54 = vrot.slane (!%p286_p2), %v912_v47, %v1092_v28  ;;  %v523_v57 = vrot.slane (!%p286_p2), %v913_v49, %v1100_v31  ;;  %v469_v58 = vrot.slane (!%p286_p2), %v911_v50, %v1100_v31 }
   0xd   : > { %s1183_s28 = smov (!%p337_p3, %s893_s28), 1  ;;  %v495_v59 = vrot.slane %v912_v47, %v1100_v31  ;;  %v465_v60 = vrot.slane %v911_v50, %v1092_v28  ;;  %vm534_vm5 = vcmask 924672   ;;  %vm560_vm6 = vcmask 916480  }
   0xe   : > { %s900_s29 = sshll.u32 %s1183_s28, 3  ;;  %s1060_s14 = sshll.u32 %s1183_s28, 4  ;;  %vm586_vm7 = vcmask 908288   ;;  %vm640_vm8 = vcmask 588800  }
   0xf   : > { %s345_s10 = scalar_lea.vmem %s1174_s1, %s900_s29  ;;  %s349_s13 = scalar_lea.vmem %s1175_s2, %s900_s29 }
  0x10   : > { %v367_v1 = vld [vmem:[%s345_s10] sm:$0xff]  ;;  %s341_s17 = scalar_lea.vmem %s1173_s0, %s1060_s14  ;;  %s922_s11 = sshll.u32 %s1183_s28, 5 }
  0x11   : > { %370 = vperm.xlu0 %969, %v367_v1   ;;  %v375_v2 = vld [vmem:[%s349_s13] sm:$0xff]  ;;  %v366_v5 = vld [vmem:[%s341_s17 + $0x8] sm:$0xff]  ;;  %s354_s15 = scalar_lea.vmem %s1179_s6, %s922_s11 }
  0x12   : > { %v365_v4 = vld [vmem:[%s341_s17] sm:$0xff]  ;;  %s359_s17 = scalar_lea.vmem %s1180_s7, %s1060_s14 }
  0x15   : > { %378 = vperm.xlu0 %969, %v375_v2  }
  0x90   : > { %v371_v3 = vpop.permute.xlu0 %370 }
  0x91   : > { %v373_v6 = vmul.f32 %v371_v3, %v365_v4  ;;  %v374_v7 = vmul.f32 %v371_v3, %v366_v5 }
  0x94   : > { %v379_v8 = vpop.permute.xlu0 %378 }
  0x95   : > { %v381_v9 = vadd.f32 %v379_v8, %v373_v6  ;;  %v382_v10 = vadd.f32 %v379_v8, %v374_v7  ;;  %v914_v6 = vld [vmem:[%s1176_s3 + $0x6] ss:$8 sm:$0x3]  ;;  %v519_v8 = vrot.slane %v913_v49, %v1092_v28 }
  0x97   : > { %v908_v11 = vmul.f32 -1.442695, %v381_v9  ;;  %v909_v12 = vmul.f32 -1.442695, %v382_v10 }
  0x99   : > { %971 = vpow2.f32 %v908_v11 }
  0x9a   : > { %973 = vpow2.f32 %v909_v12 }
  0xa3   : > { %v972_v13 = vpop.eup %971 }
  0xa4   : > { %v974_v14 = vpop.eup %973  ;;  %v389_v15 = vadd.f32 1.0, %v972_v13  ;;  %v549_v13 = vrot.slane %v914_v6, %v1100_v31 }
  0xa5   : > { %v390_v16 = vadd.f32 1.0, %v974_v14 }
  0xa6   : > { %975 = vrcp.f32 %v389_v15 }
  0xa7   : > { %977 = vrcp.f32 %v390_v16 }
  0xb0   : > { %v976_v17 = vpop.eup %975 }
  0xb1   : > { %v1066_v18 = vmul.f32 %v976_v17, %v381_v9  ;;  %v978_v19 = vpop.eup %977 }
  0xb2   : > { %v1070_v20 = vmul.f32 %v978_v19, %v382_v10  ;;  %v915_v10 = vld [vmem:[%s1176_s3 + $0x7] ss:$8 sm:$0x3] }
  0xb3   : > { %424 = vrot.lane.b32.xlu0 %v1066_v18, %s988_s18  ;;  %399 = vrot.lane.b32.xlu1 %v1066_v18, %s989_s19  ;;  %v571_v30 = vrot.slane %v915_v10, %v1092_v28 }
  0xb7   : > { %450 = vrot.lane.b32.xlu0 %v1066_v18, %s990_s20  ;;  %401 = vrot.lane.b32.xlu1 %v1070_v20, %s989_s19 }
  0xbb   : > { %476 = vrot.lane.b32.xlu0 %v1066_v18, %s991_s21  ;;  %426 = vrot.lane.b32.xlu1 %v1070_v20, %s988_s18 }
  0xbf   : > { %506 = vrot.lane.b32.xlu0 %v1070_v20, %s992_s22  ;;  %452 = vrot.lane.b32.xlu1 %v1070_v20, %s990_s20  ;;  %s364_s20 = scalar_lea.vmem %s1181_s8, %s1060_s14 }
  0xc3   : > { %532 = vrot.lane.b32.xlu0 %v1070_v20, %s993_s23  ;;  %478 = vrot.lane.b32.xlu1 %v1070_v20, %s991_s21 }
  0xc7   : > { %530 = vrot.lane.b32.xlu0 %v1066_v18, %s993_s23  ;;  %504 = vrot.lane.b32.xlu1 %v1066_v18, %s992_s22 }
  0xcb   : > { %584 = vrot.lane.b32.xlu0 %v1070_v20, %s994_s24  ;;  %558 = vrot.lane.b32.xlu1 %v1070_v20, %s995_s25 }
  0xcf   : > { %632 = vperm.xlu0 %969, %v628_v21   ;;  %556 = vrot.lane.b32.xlu1 %v1066_v18, %s995_s25  ;;  %v575_v21 = vrot.slane %v915_v10, %v1100_v31 }
  0xd3   : > { %582 = vrot.lane.b32.xlu1 %v1066_v18, %s994_s24 }
  0xd7   : > { %637 = vperm.xlu1 %970, %v629_v23  }
 0x125   : > { %v425_v26 = vpop.permute.xlu0 %424  ;;  %v400_v27 = vpop.permute.xlu1 %399 }
 0x126   : > { %v432_v36 = vsel %vm428_vm0, 0.0, %v425_v26  ;;  %v407_v37 = vsel %vm403_vm1, 0.0, %v400_v27 }
 0x127   : > { %v446_v43 = vmul.f32 %v439_v34, %v432_v36  ;;  %v420_v44 = vmul.f32 %v413_v35, %v407_v37 }
 0x129   : > { %v451_v32 = vpop.permute.xlu0 %450  ;;  %v402_v33 = vpop.permute.xlu1 %401  ;;  %v927_v55 = vpack.c.bf16 %v446_v43, %v420_v44 }
 0x12a   : > { %v404_v40 = vsel %vm403_vm1, %v400_v27, %v402_v33  ;;  %v458_v63 = vsel %vm454_vm4, 0.0, %v451_v32  ;;  %v545_v27 = vrot.slane %v914_v6, %v1092_v28 }
 0x12b   : > { %v421_v46 = vmul.f32 %v417_v38, %v404_v40  ;;  %v472_v9 = vmul.f32 %v465_v60, %v458_v63 }
 0x12d   : > { %v477_v41 = vpop.permute.xlu0 %476  ;;  %v427_v42 = vpop.permute.xlu1 %426 }
 0x12e   : > { %v429_v45 = vsel %vm428_vm0, %v425_v26, %v427_v42  ;;  %v484_v56 = vsel %vm480_vm2, 0.0, %v477_v41 }
 0x12f   : > { %v447_v48 = vmul.f32 %v443_v39, %v429_v45  ;;  %v498_v2 = vmul.f32 %v491_v54, %v484_v56  ;;  %v608_v45 = vld [vmem:[%s1177_s4] sm:$0xff] }
 0x131   : > { %v507_v51 = vpop.permute.xlu0 %506  ;;  %v453_v52 = vpop.permute.xlu1 %452  ;;  %v925_v53 = vpack.c.bf16 %v447_v48, %v421_v46  ;;  %v931_v16 = vpack.c.bf16 %v498_v2, %v472_v9 }
 0x132   : > { %v512_v61 = vsel %vm508_vm3, %v507_v51, 0.0  ;;  %v455_v62 = vsel %vm454_vm4, %v451_v32, %v453_v52 }
 0x133   : > { %926 = vmatprep.subr.bf16.mxu0 %v925_v53  ;;  %941 = vmatprep.subr.bf16.mxu1 %v925_v53  ;;  %v527_v4 = vmul.f32 %v523_v57, %v512_v61  ;;  %v473_v5 = vmul.f32 %v469_v58, %v455_v62 }
 0x134   : > { %928 = vmatpush1.bf16.msra.mxu0 %v927_v55  ;;  %946 = vmatpush1.bf16.msra.mxu1 %v927_v55 }
 0x135   : > { %v533_v0 = vpop.permute.xlu0 %532  ;;  %v479_v1 = vpop.permute.xlu1 %478  ;;  %v933_v19 = vpack.c.bf16 %v527_v4, %v1070_v20  ;;  %v916_v20 = vld [vmem:[%s1176_s3 + $0x10] ss:$8 sm:$0x3] }
 0x136   : > { %v481_v3 = vsel %vm480_vm2, %v477_v41, %v479_v1  ;;  %v538_v22 = vsel %vm534_vm5, %v533_v0, 0.0  ;;  %v601_v35 = vrot.slane %v916_v20, %v1100_v31  ;;  %v597_v40 = vrot.slane %v916_v20, %v1092_v28  ;;  %v609_v28 = vld [vmem:[%s1177_s4 + $0x8] sm:$0xff] }
 0x137   : > { %v499_v7 = vmul.f32 %v495_v59, %v481_v3  ;;  %v553_v26 = vmul.f32 %v549_v13, %v538_v22 }
 0x139   : > { %v505_v11 = vpop.permute.xlu1 %504  ;;  %v929_v12 = vpack.c.bf16 %v499_v7, %v473_v5  ;;  %v531_v14 = vpop.permute.xlu0 %530 }
 0x13a   : > { %v509_v15 = vsel %vm508_vm3, %v505_v11, %v507_v51  ;;  %v535_v32 = vsel %vm534_vm5, %v531_v14, %v533_v0 }
 0x13b   : > { %v526_v17 = vmul.f32 %v519_v8, %v509_v15  ;;  %930 = vmatprep.subr.bf16.mxu0 %v929_v12  ;;  %942 = vmatprep.subr.bf16.mxu1 %v929_v12  ;;  %v552_v37 = vmul.f32 %v545_v27, %v535_v32 }
 0x13c   : > { %932 = vmatpush1.bf16.msra.mxu0 %v931_v16  ;;  %947 = vmatpush1.bf16.msra.mxu1 %v931_v16 }
 0x13d   : > { %934 = vmatprep.subr.bf16.mxu0 %v933_v19  ;;  %943 = vmatprep.subr.bf16.mxu1 %v933_v19  ;;  %v559_v23 = vpop.permute.xlu1 %558  ;;  %v935_v24 = vpack.c.bf16 %v526_v17, %v1066_v18  ;;  %v585_v33 = vpop.permute.xlu0 %584 }
 0x13e   : > { %v564_v25 = vsel %vm560_vm6, %v559_v23, 0.0  ;;  %v590_v38 = vsel %vm586_vm7, %v585_v33, 0.0 }
 0x13f   : > { %v579_v29 = vmul.f32 %v575_v21, %v564_v25  ;;  %v605_v43 = vmul.f32 %v601_v35, %v590_v38 }
 0x140   : > { %936 = vmatpush1.bf16.msra.mxu0 %v935_v24  ;;  %948 = vmatpush1.bf16.msra.mxu1 %v935_v24 }
 0x141   : > { %v557_v34 = vpop.permute.xlu1 %556  ;;  %v937_v18 = vpack.c.bf16 %v579_v29, %v553_v26 }
 0x142   : > { %v561_v36 = vsel %vm560_vm6, %v557_v34, %v559_v23 }
 0x143   : > { %v578_v39 = vmul.f32 %v571_v30, %v561_v36  ;;  %938 = vmatprep.subr.bf16.mxu0 %v937_v18  ;;  %944 = vmatprep.subr.bf16.mxu1 %v937_v18 }
 0x145   : > { %v583_v41 = vpop.permute.xlu1 %582  ;;  %v939_v42 = vpack.c.bf16 %v578_v39, %v552_v37 }
 0x146   : > { %v587_v44 = vsel %vm586_vm7, %v583_v41, %v585_v33 }
 0x147   : > { %940 = vmatpush1.bf16.msra.mxu0 %v939_v42  ;;  %949 = vmatpush1.bf16.msra.mxu1 %v939_v42  ;;  %v604_v31 = vmul.f32 %v597_v40, %v587_v44 }
 0x148   : > { %663 = vmatprep.subr.mxu0 %v605_v43  ;;  %945 = vmatprep.subr.mxu1 %v605_v43 }
 0x14b   : > { %664 = vmatpush1.msra.mxu0 %v604_v31  ;;  %950 = vmatpush1.msra.mxu1 %v604_v31 }
 0x14c   : > { %917 = vmatmul.mubr.msk.f32.vlgmr.msra.gmra.mrb[0].mxu0 %vm640_vm8, %v608_v45  ;;  %918 = vmatmul.mubr.msk.f32.vlgmr.msra.gmra.mrb[0].mxu1 %vm640_vm8, %v609_v28 }
 0x14e   : > { %v633_v47 = vpop.permute.xlu0 %632 }
 0x156   : > { %v638_v46 = vpop.permute.xlu1 %637 }
 0x21f   : > { %v713_v48 = vpop.f32.mrb[0].mxu0  ;;  %v719_v49 = vpop.f32.mrb[0].mxu1 }
 0x220   : > { %v714_v50 = vadd.f32 %v713_v48, %v633_v47  ;;  %v715_v51 = vpop.f32.mrb[1].mxu0  ;;  %v721_v52 = vpop.f32.mrb[1].mxu1  ;;  %v720_v53 = vadd.f32 %v719_v49, %v638_v46 }
 0x221   : > { %v716_v54 = vadd.f32 %v715_v51, %v633_v47  ;;  %v722_v55 = vadd.f32 %v721_v52, %v638_v46 }
 0x222   : > { %724 = vst [vmem:[%s354_s15] sm:$0xff] %v714_v50  ;;  %726 = vst [vmem:[%s354_s15 + $0x10] sm:$0xff] %v720_v53  ;;  %v736_v56 = vmul.f32 %v714_v50, %v714_v50  ;;  %v738_v57 = vmul.f32 %v720_v53, %v720_v53 }
 0x223   : > { %725 = vst [vmem:[%s354_s15 + $0x8] sm:$0xff] %v716_v54  ;;  %v728_v58 = vadd.f32 %v716_v54, %v714_v50  ;;  %727 = vst [vmem:[%s354_s15 + $0x18] sm:$0xff] %v722_v55  ;;  %v737_v59 = vmul.f32 %v716_v54, %v716_v54  ;;  %v731_v60 = vadd.f32 %v722_v55, %v720_v53 }
 0x224   : > { %v739_v61 = vmul.f32 %v722_v55, %v722_v55 }
 0x225   : > { %729 = vadd.xlane.f32.xlu0 %v728_v58  ;;  %v740_v62 = vadd.f32 %v737_v59, %v736_v56  ;;  %732 = vadd.xlane.f32.xlu1 %v731_v60 }
 0x226   : > { %v743_v63 = vadd.f32 %v739_v61, %v738_v57 }
 0x229   : > { %741 = vadd.xlane.f32.xlu0 %v740_v62 }
 0x22d   : > { %744 = vadd.xlane.f32.xlu0 %v743_v63 }
 0x2b2   : > { %v730_v0 = vpop.xlane.xlu0 %729  ;;  %v733_v1 = vpop.xlane.xlu1 %732 }
 0x2b3   : > { %734 = vst.msk [vmem:[%s359_s17] sm:$0xff] %vm480_vm2, %v730_v0  ;;  %735 = vst.msk [vmem:[%s359_s17 + $0x8] sm:$0xff] %vm480_vm2, %v733_v1 }
 0x2b6   : > { %v742_v2 = vpop.xlane.xlu0 %741 }
 0x2b7   : > { %746 = vst.msk [vmem:[%s364_s20] sm:$0xff] %vm480_vm2, %v742_v2 }
 0x2ba   : > { %v745_v3 = vpop.xlane.xlu0 %744 }
 0x2bb   : > { %747 = vst.msk [vmem:[%s364_s20 + $0x8] sm:$0xff] %vm480_vm2, %v745_v3 }
 0x2bc PF: > { %s19_s27 = sadd.s32 1, %s985_s27  }
 0x2bd   : > { %p16_p4 = scmp.ge.s32.totalorder %s19_s27, 4  }
 0x2bf   :  { %18 = sbr.rel (!%p16_p4) target bundleno = 1 (0x1), region = 111 }

// kernel: upblock_forward.7
= control target key start
LH: loop header
LB: loop body
LE: loop exit
PB: predicated region body
PF: predicated region fallthrough
CT: control target
= control target key end

     0   :  { %s1315_s30 = smov 0   ;;  %s1464_s0 = inlined_call_operand.vmem [shape: f32[2,16,256], index: 0, kind: input, shape index: {}]   ;;  %s1465_s1 = inlined_call_operand.vmem [shape: f32[2,16,1], index: 1, kind: input, shape index: {}]   ;;  %s1466_s2 = inlined_call_operand.vmem [shape: f32[2,16,1], index: 2, kind: input, shape index: {}]   ;;  %s1467_s3 = inlined_call_operand.vmem [shape: f32[9,256], index: 3, kind: input, shape index: {}]   ;;  %s1468_s4 = inlined_call_operand.vmem [shape: f32[16,152], index: 4, kind: input, shape index: {}]   ;;  %s1469_s5 = inlined_call_operand.vmem [shape: f32[16,1], index: 5, kind: input, shape index: {}]   ;;  %s1470_s6 = inlined_call_operand.vmem [shape: f32[2,8,256], index: 6, kind: input, shape index: {}]   ;;  %s1471_s7 = inlined_call_operand.vmem [shape: f32[2,16,256], index: 7, kind: output, shape index: {0}]   ;;  %s1472_s8 = inlined_call_operand.vmem [shape: f32[2,16,1], index: 8, kind: output, shape index: {1}]   ;;  %s1473_s9 = inlined_call_operand.vmem [shape: f32[2,16,1], index: 9, kind: output, shape index: {2}]  }
   0x1 LB: > { %s1116_s10 = sadd.s32 4294967295, %s1254_s30   ;;  %p1120_p0 = scmp.ge.s32.totalorder %s1254_s30, 1  ;;  %s1254_s30 = sphi %s1315_s30, %s20_s30  }
   0x2   : > { %p322_p1 = scmp.lt.s32.totalorder %s1254_s30, 3 }
   0x4   : > { %p323_p2 = pnand %p1120_p0, %p322_p1 }
   0x5   : > { %p383_p3 = scmp.lt.s32.totalorder (!%p323_p2), %s1116_s10, 1  ;;  %v1256_v0 = vmov (!%p323_p2), 0   ;;  %s1257_s22 = smov (!%p323_p2), 17   ;;  %v798_v43 = vld [vmem:[%s1468_s4 + $0x8] sm:$0xff] (!%p323_p2)  ;;  %vm851_vm0 = vcmask (!%p323_p2), 195584   ;;  %v800_v44 = vld [vmem:[%s1468_s4 + $0x18] sm:$0xff] (!%p323_p2)  ;;  %v505_v47 = vlaneseq (!%p323_p2) }
   0x6   : > { %326 = sbr.rel (%p323_p2) target bundleno = 732 (0x2dc), region = 48  ;;  %1231 = vset.pattern.permute.xlu1 (!%p323_p2), %v1256_v0  ;;  %1230 = vset.pattern.permute.xlu0 (!%p323_p2), %v1256_v0  ;;  %s1258_s23 = smov (!%p323_p2), 16   ;;  %v839_v45 = vld [vmem:[%s1469_s5] sm:$0xff] (!%p323_p2)  ;;  %v840_v46 = vld [vmem:[%s1469_s5 + $0x8] sm:$0xff] (!%p323_p2)  ;;  %vm494_vm1 = vcmask (!%p323_p2), 138240   ;;  %vm531_vm2 = vcmask (!%p323_p2), 130048  }
   0x7   : > { %s1259_s24 = smov (!%p323_p2), 15   ;;  %s1260_s25 = smov (!%p323_p2), 1   ;;  %1146 = vmatprep.mubr.msk.f32.mxu0 (!%p323_p2), %vm851_vm0, %v798_v43  ;;  %1147 = vmatprep.mubr.msk.f32.mxu1 (!%p323_p2), %vm851_vm0, %v800_v44  ;;  %v506_v48 = vshrl.u32 (!%p323_p2), %v505_v47, 7  ;;  %v503_v50 = vld [vmem:[%s1467_s3] ss:$8 sm:$0x3] (!%p323_p2) }
   0x8   : > { %s1261_s26 = smov (!%p323_p2), 127   ;;  %s1262_s27 = smov (!%p323_p2), 113   ;;  %vm569_vm3 = vcmask (!%p323_p2), 121856   ;;  %vm607_vm4 = vcmask (!%p323_p2), 7168   ;;  %vm649_vm5 = vcmask (!%p323_p2), 1039360   ;;  %vm687_vm6 = vcmask (!%p323_p2), 924672  }
   0x9   : > { %s1263_s28 = smov (!%p323_p2), 112   ;;  %s1264_s29 = smov (!%p323_p2), 111   ;;  %v1358_v49 = vsub.s32 (!%p323_p2), 0, %v506_v48  ;;  %v1363_v51 = vsub.s32 (!%p323_p2), 1, %v506_v48  ;;  %vm725_vm7 = vcmask (!%p323_p2), 916480   ;;  %vm763_vm8 = vcmask (!%p323_p2), 908288  }
   0xa   : > { %v1142_v48 = vld [vmem:[%s1467_s3 + $0x5] ss:$8 sm:$0x3] (!%p323_p2) }
   0xb   : > { %v508_v54 = vrot.slane (!%p323_p2), %v503_v50, %v1358_v49  ;;  %v512_v55 = vrot.slane (!%p323_p2), %v503_v50, %v1363_v51 }
   0xd   : > { %s1475_s10 = smov (!%p383_p3, %s1116_s10), 1 }
   0xe   : > { %s1326_s11 = sshll.u32 %s1475_s10, 4  ;;  %s1150_s18 = sshll.u32 %s1475_s10, 5 }
   0xf   : > { %s397_s14 = scalar_lea.vmem %s1466_s2, %s1326_s11  ;;  %s392_s17 = scalar_lea.vmem %s1465_s1, %s1326_s11 }
  0x10   : > { %v438_v1 = vld [vmem:[%s397_s14] sm:$0xff]  ;;  %v439_v3 = vld [vmem:[%s397_s14 + $0x8] sm:$0xff]  ;;  %s387_s21 = scalar_lea.vmem %s1464_s0, %s1150_s18  ;;  %s412_s12 = scalar_lea.vmem %s1472_s8, %s1326_s11 }
  0x11   : > { %v422_v2 = vld [vmem:[%s392_s17] sm:$0xff]  ;;  %442 = vperm.xlu1 %1231, %v438_v1   ;;  %v423_v4 = vld [vmem:[%s392_s17 + $0x8] sm:$0xff]  ;;  %v420_v11 = vld [vmem:[%s387_s21 + $0x10] sm:$0xff]  ;;  %s417_s15 = scalar_lea.vmem %s1473_s9, %s1326_s11 }
  0x12   : > { %426 = vperm.xlu0 %1230, %v422_v2   ;;  %v418_v5 = vld [vmem:[%s387_s21] sm:$0xff]  ;;  %v419_v6 = vld [vmem:[%s387_s21 + $0x8] sm:$0xff]  ;;  %v421_v12 = vld [vmem:[%s387_s21 + $0x18] sm:$0xff] }
  0x13   : > { %v1139_v2 = vld [vmem:[%s1467_s3 + $0x1] ss:$8 sm:$0x3] }
  0x15   : > { %447 = vperm.xlu1 %1231, %v439_v3  }
  0x16   : > { %431 = vperm.xlu0 %1230, %v423_v4  }
  0x90   : > { %v443_v7 = vpop.permute.xlu1 %442 }
  0x91   : > { %v427_v8 = vpop.permute.xlu0 %426 }
  0x92   : > { %v434_v9 = vmul.f32 %v427_v8, %v418_v5  ;;  %v435_v10 = vmul.f32 %v427_v8, %v419_v6  ;;  %v550_v8 = vrot.slane %v1139_v2, %v1363_v51 }
  0x94   : > { %v450_v13 = vadd.f32 %v443_v7, %v434_v9  ;;  %v451_v14 = vadd.f32 %v443_v7, %v435_v10  ;;  %v448_v20 = vpop.permute.xlu1 %447  ;;  %v546_v7 = vrot.slane %v1139_v2, %v1358_v49 }
  0x95   : > { %v432_v15 = vpop.permute.xlu0 %431 }
  0x96   : > { %v1135_v16 = vmul.f32 -1.442695, %v450_v13  ;;  %v1136_v17 = vmul.f32 -1.442695, %v451_v14  ;;  %v436_v18 = vmul.f32 %v432_v15, %v420_v11  ;;  %v437_v19 = vmul.f32 %v432_v15, %v421_v12 }
  0x98   : > { %1232 = vpow2.f32 %v1135_v16  ;;  %v452_v21 = vadd.f32 %v448_v20, %v436_v18  ;;  %v453_v22 = vadd.f32 %v448_v20, %v437_v19  ;;  %v1140_v19 = vld [vmem:[%s1467_s3 + $0x2] ss:$8 sm:$0x3] }
  0x99   : > { %1234 = vpow2.f32 %v1136_v17 }
  0x9a   : > { %v1137_v23 = vmul.f32 -1.442695, %v452_v21  ;;  %v1138_v24 = vmul.f32 -1.442695, %v453_v22 }
  0x9c   : > { %1236 = vpow2.f32 %v1137_v23 }
  0x9d   : > { %1238 = vpow2.f32 %v1138_v24  ;;  %v584_v24 = vrot.slane %v1140_v19, %v1358_v49 }
  0xa2   : > { %v1233_v25 = vpop.eup %1232 }
  0xa3   : > { %v1235_v26 = vpop.eup %1234  ;;  %v466_v27 = vadd.f32 1.0, %v1233_v25  ;;  %v588_v25 = vrot.slane %v1140_v19, %v1363_v51 }
  0xa4   : > { %v467_v28 = vadd.f32 1.0, %v1235_v26 }
  0xa5   : > { %1240 = vrcp.f32 %v466_v27 }
  0xa6   : > { %v1237_v29 = vpop.eup %1236  ;;  %1242 = vrcp.f32 %v467_v28 }
  0xa7   : > { %v1239_v30 = vpop.eup %1238  ;;  %v468_v31 = vadd.f32 1.0, %v1237_v29 }
  0xa8   : > { %v469_v32 = vadd.f32 1.0, %v1239_v30 }
  0xa9   : > { %1244 = vrcp.f32 %v468_v31 }
  0xaa   : > { %1246 = vrcp.f32 %v469_v32 }
  0xaf   : > { %v1241_v33 = vpop.eup %1240 }
  0xb0   : > { %v1243_v34 = vpop.eup %1242  ;;  %v478_v35 = vmul.f32 %v1241_v33, %v450_v13 }
  0xb1   : > { %v479_v36 = vmul.f32 %v1243_v34, %v451_v14 }
  0xb2   : > { %486 = vrot.lane.b32.xlu0 %v478_v35, %s1257_s22 }
  0xb3   : > { %v1245_v37 = vpop.eup %1244  ;;  %488 = vrot.lane.b32.xlu1 %v479_v36, %s1257_s22 }
  0xb4   : > { %v1247_v38 = vpop.eup %1246  ;;  %v480_v39 = vmul.f32 %v1245_v37, %v452_v21 }
  0xb5   : > { %v481_v40 = vmul.f32 %v1247_v38, %v453_v22 }
  0xb6   : > { %490 = vrot.lane.b32.xlu0 %v480_v39, %s1257_s22  ;;  %v1342_v41 = vpack.c.bf16 %v480_v39, %v478_v35 }
  0xb7   : > { %492 = vrot.lane.b32.xlu1 %v481_v40, %s1257_s22  ;;  %v1344_v42 = vpack.c.bf16 %v481_v40, %v479_v36  ;;  %s402_s22 = scalar_lea.vmem %s1470_s6, %s1326_s11 }
  0xba   : > { %523 = vrot.lane.b32.xlu0 %v478_v35, %s1258_s23 }
  0xbb   : > { %525 = vrot.lane.b32.xlu1 %v479_v36, %s1258_s23 }
  0xbe   : > { %527 = vrot.lane.b32.xlu0 %v480_v39, %s1258_s23 }
  0xbf   : > { %529 = vrot.lane.b32.xlu1 %v481_v40, %s1258_s23 }
  0xc2   : > { %561 = vrot.lane.b32.xlu0 %v478_v35, %s1259_s24 }
  0xc3   : > { %563 = vrot.lane.b32.xlu1 %v479_v36, %s1259_s24 }
  0xc6   : > { %565 = vrot.lane.b32.xlu0 %v480_v39, %s1259_s24 }
  0xc7   : > { %567 = vrot.lane.b32.xlu1 %v481_v40, %s1259_s24 }
  0xca   : > { %599 = vrot.lane.b32.xlu0 %v478_v35, %s1260_s25 }
  0xcb   : > { %601 = vrot.lane.b32.xlu1 %v479_v36, %s1260_s25 }
  0xce   : > { %603 = vrot.lane.b32.xlu0 %v480_v39, %s1260_s25 }
  0xcf   : > { %605 = vrot.lane.b32.xlu1 %v481_v40, %s1260_s25 }
  0xd2   : > { %643 = vrot.lane.b32.xlu0 %v479_v36, %s1261_s26 }
  0xd3   : > { %647 = vrot.lane.b32.xlu1 %v481_v40, %s1261_s26 }
  0xd6   : > { %641 = vrot.lane.b32.xlu0 %v478_v35, %s1261_s26 }
  0xd7   : > { %645 = vrot.lane.b32.xlu1 %v480_v39, %s1261_s26 }
  0xda   : > { %681 = vrot.lane.b32.xlu0 %v479_v36, %s1262_s27 }
  0xdb   : > { %685 = vrot.lane.b32.xlu1 %v481_v40, %s1262_s27 }
  0xde   : > { %679 = vrot.lane.b32.xlu0 %v478_v35, %s1262_s27 }
  0xdf   : > { %683 = vrot.lane.b32.xlu1 %v480_v39, %s1262_s27 }
  0xe2   : > { %719 = vrot.lane.b32.xlu0 %v479_v36, %s1263_s28 }
  0xe3   : > { %723 = vrot.lane.b32.xlu1 %v481_v40, %s1263_s28 }
  0xe6   : > { %717 = vrot.lane.b32.xlu0 %v478_v35, %s1263_s28 }
  0xe7   : > { %721 = vrot.lane.b32.xlu1 %v480_v39, %s1263_s28 }
  0xea   : > { %757 = vrot.lane.b32.xlu0 %v479_v36, %s1264_s29  ;;  %v1141_v36 = vld [vmem:[%s1467_s3 + $0x3] ss:$8 sm:$0x3] }
  0xeb   : > { %761 = vrot.lane.b32.xlu1 %v481_v40, %s1264_s29  ;;  %v622_v43 = vrot.slane %v1141_v36, %v1358_v49  ;;  %v626_v44 = vrot.slane %v1141_v36, %v1363_v51  ;;  %v1145_v36 = vld [vmem:[%s1467_s3 + $0x10] ss:$8 sm:$0x3] }
  0xee   : > { %755 = vrot.lane.b32.xlu0 %v478_v35, %s1264_s29 }
  0xef   : > { %759 = vrot.lane.b32.xlu1 %v480_v39, %s1264_s29  ;;  %s407_s29 = scalar_lea.vmem %s1471_s7, %s1150_s18 }
  0xf2   : > { %843 = vperm.xlu0 %1230, %v839_v45  }
  0xf3   : > { %848 = vperm.xlu1 %1231, %v840_v46  }
 0x124   : > { %v487_v52 = vpop.permute.xlu0 %486 }
 0x125   : > { %v489_v53 = vpop.permute.xlu1 %488  ;;  %v501_v56 = vsel %vm494_vm1, 0.0, %v487_v52 }
 0x126   : > { %v495_v57 = vsel %vm494_vm1, %v487_v52, %v489_v53  ;;  %v515_v61 = vmul.f32 %v508_v54, %v501_v56 }
 0x127   : > { %v516_v0 = vmul.f32 %v512_v55, %v495_v57 }
 0x128   : > { %v491_v58 = vpop.permute.xlu0 %490 }
 0x129   : > { %v493_v59 = vpop.permute.xlu1 %492  ;;  %v502_v60 = vsel %vm494_vm1, 0.0, %v491_v58 }
 0x12a   : > { %v496_v62 = vsel %vm494_vm1, %v491_v58, %v493_v59  ;;  %v517_v63 = vmul.f32 %v508_v54, %v502_v60  ;;  %v668_v58 = vrot.slane %v1142_v48, %v1363_v51 }
 0x12b   : > { %v518_v1 = vmul.f32 %v512_v55, %v496_v62 }
 0x12c   : > { %v524_v3 = vpop.permute.xlu0 %523  ;;  %v1159_v4 = vpack.c.bf16 %v517_v63, %v515_v61 }
 0x12d   : > { %v526_v5 = vpop.permute.xlu1 %525  ;;  %v1157_v6 = vpack.c.bf16 %v518_v1, %v516_v0  ;;  %v538_v9 = vsel %vm531_vm2, 0.0, %v524_v3  ;;  %v664_v1 = vrot.slane %v1142_v48, %v1358_v49 }
 0x12e   : > { %v532_v10 = vsel %vm531_vm2, %v524_v3, %v526_v5  ;;  %v553_v14 = vmul.f32 %v546_v7, %v538_v9 }
 0x12f   : > { %1158 = vmatprep.subr.bf16.mxu0 %v1157_v6  ;;  %1193 = vmatprep.subr.bf16.mxu1 %v1157_v6  ;;  %v554_v17 = vmul.f32 %v550_v8, %v532_v10 }
 0x130   : > { %1160 = vmatpush1.bf16.msra.mxu0 %v1159_v4  ;;  %1203 = vmatpush1.bf16.msra.mxu1 %v1159_v4  ;;  %v528_v11 = vpop.permute.xlu0 %527  ;;  %v1143_v4 = vld [vmem:[%s1467_s3 + $0x6] ss:$8 sm:$0x3] }
 0x131   : > { %v530_v12 = vpop.permute.xlu1 %529  ;;  %v539_v13 = vsel %vm531_vm2, 0.0, %v528_v11  ;;  %v706_v10 = vrot.slane %v1143_v4, %v1363_v51 }
 0x132   : > { %v533_v15 = vsel %vm531_vm2, %v528_v11, %v530_v12  ;;  %v555_v16 = vmul.f32 %v546_v7, %v539_v13 }
 0x133   : > { %v556_v18 = vmul.f32 %v550_v8, %v533_v15 }
 0x134   : > { %v562_v20 = vpop.permute.xlu0 %561  ;;  %v1163_v21 = vpack.c.bf16 %v555_v16, %v553_v14 }
 0x135   : > { %v564_v22 = vpop.permute.xlu1 %563  ;;  %v1161_v23 = vpack.c.bf16 %v556_v18, %v554_v17  ;;  %v576_v26 = vsel %vm569_vm3, 0.0, %v562_v20  ;;  %v702_v18 = vrot.slane %v1143_v4, %v1358_v49 }
 0x136   : > { %v570_v27 = vsel %vm569_vm3, %v562_v20, %v564_v22  ;;  %v591_v31 = vmul.f32 %v584_v24, %v576_v26  ;;  %v1144_v20 = vld [vmem:[%s1467_s3 + $0x7] ss:$8 sm:$0x3] }
 0x137   : > { %1162 = vmatprep.subr.bf16.mxu0 %v1161_v23  ;;  %1194 = vmatprep.subr.bf16.mxu1 %v1161_v23  ;;  %v592_v34 = vmul.f32 %v588_v25, %v570_v27  ;;  %v744_v26 = vrot.slane %v1144_v20, %v1363_v51 }
 0x138   : > { %1164 = vmatpush1.bf16.msra.mxu0 %v1163_v21  ;;  %1204 = vmatpush1.bf16.msra.mxu1 %v1163_v21  ;;  %v566_v28 = vpop.permute.xlu0 %565 }
 0x139   : > { %v568_v29 = vpop.permute.xlu1 %567  ;;  %v577_v30 = vsel %vm569_vm3, 0.0, %v566_v28 }
 0x13a   : > { %v571_v32 = vsel %vm569_vm3, %v566_v28, %v568_v29  ;;  %v593_v33 = vmul.f32 %v584_v24, %v577_v30 }
 0x13b   : > { %v594_v35 = vmul.f32 %v588_v25, %v571_v32 }
 0x13c   : > { %v600_v37 = vpop.permute.xlu0 %599  ;;  %v1167_v38 = vpack.c.bf16 %v593_v33, %v591_v31 }
 0x13d   : > { %v602_v39 = vpop.permute.xlu1 %601  ;;  %v1165_v40 = vpack.c.bf16 %v594_v35, %v592_v34  ;;  %v614_v45 = vsel %vm607_vm4, 0.0, %v600_v37  ;;  %v740_v34 = vrot.slane %v1144_v20, %v1358_v49 }
 0x13e   : > { %v608_v46 = vsel %vm607_vm4, %v600_v37, %v602_v39  ;;  %v629_v53 = vmul.f32 %v622_v43, %v614_v45  ;;  %v782_v45 = vrot.slane %v1145_v36, %v1363_v51 }
 0x13f   : > { %1166 = vmatprep.subr.bf16.mxu0 %v1165_v40  ;;  %1195 = vmatprep.subr.bf16.mxu1 %v1165_v40  ;;  %v630_v56 = vmul.f32 %v626_v44, %v608_v46 }
 0x140   : > { %1168 = vmatpush1.bf16.msra.mxu0 %v1167_v38  ;;  %1205 = vmatpush1.bf16.msra.mxu1 %v1167_v38  ;;  %v604_v47 = vpop.permute.xlu0 %603 }
 0x141   : > { %v606_v50 = vpop.permute.xlu1 %605  ;;  %v615_v52 = vsel %vm607_vm4, 0.0, %v604_v47 }
 0x142   : > { %v609_v54 = vsel %vm607_vm4, %v604_v47, %v606_v50  ;;  %v631_v55 = vmul.f32 %v622_v43, %v615_v52 }
 0x143   : > { %v632_v57 = vmul.f32 %v626_v44, %v609_v54 }
 0x144   : > { %v644_v59 = vpop.permute.xlu0 %643  ;;  %v1171_v60 = vpack.c.bf16 %v631_v55, %v629_v53  ;;  %v778_v55 = vrot.slane %v1145_v36, %v1358_v49 }
 0x145   : > { %v648_v61 = vpop.permute.xlu1 %647  ;;  %v656_v62 = vsel %vm649_vm5, %v644_v59, 0.0  ;;  %v1169_v63 = vpack.c.bf16 %v632_v57, %v630_v56 }
 0x146   : > { %v657_v0 = vsel %vm649_vm5, %v648_v61, 0.0  ;;  %v672_v3 = vmul.f32 %v668_v58, %v656_v62 }
 0x147   : > { %v674_v2 = vmul.f32 %v668_v58, %v657_v0  ;;  %1170 = vmatprep.subr.bf16.mxu0 %v1169_v63  ;;  %1196 = vmatprep.subr.bf16.mxu1 %v1169_v63  ;;  %v794_v63 = vld [vmem:[%s402_s22 + $0x8] sm:$0xff]  ;;  %v793_v0 = vld [vmem:[%s402_s22] sm:$0xff] }
 0x148   : > { %1172 = vmatpush1.bf16.msra.mxu0 %v1171_v60  ;;  %1206 = vmatpush1.bf16.msra.mxu1 %v1171_v60  ;;  %v642_v5 = vpop.permute.xlu0 %641 }
 0x149   : > { %v646_v6 = vpop.permute.xlu1 %645  ;;  %1174 = vmatprep.subr.bf16.mxu0 %v1344_v42  ;;  %1197 = vmatprep.subr.bf16.mxu1 %v1344_v42  ;;  %v650_v7 = vsel %vm649_vm5, %v642_v5, %v644_v59  ;;  %v1177_v12 = vpack.c.bf16 %v674_v2, %v672_v3  ;;  %v799_v2 = vld [vmem:[%s1468_s4 + $0x10] sm:$0xff] }
 0x14a   : > { %v651_v8 = vsel %vm649_vm5, %v646_v6, %v648_v61  ;;  %v671_v9 = vmul.f32 %v664_v1, %v650_v7 }
 0x14b   : > { %v673_v11 = vmul.f32 %v664_v1, %v651_v8  ;;  %v797_v1 = vld [vmem:[%s1468_s4] sm:$0xff] }
 0x14c   : > { %1176 = vmatpush1.bf16.msra.mxu0 %v1342_v41  ;;  %1207 = vmatpush1.bf16.msra.mxu1 %v1342_v41  ;;  %v682_v13 = vpop.permute.xlu0 %681 }
 0x14d   : > { %v686_v14 = vpop.permute.xlu1 %685  ;;  %v694_v15 = vsel %vm687_vm6, %v682_v13, 0.0  ;;  %1178 = vmatprep.subr.bf16.mxu0 %v1177_v12  ;;  %1198 = vmatprep.subr.bf16.mxu1 %v1177_v12  ;;  %v1179_v42 = vpack.c.bf16 %v673_v11, %v671_v9 }
 0x14e   : > { %v695_v16 = vsel %vm687_vm6, %v686_v14, 0.0  ;;  %v710_v17 = vmul.f32 %v706_v10, %v694_v15 }
 0x14f   : > { %v712_v19 = vmul.f32 %v706_v10, %v695_v16 }
 0x150   : > { %1180 = vmatpush1.bf16.msra.mxu0 %v1179_v42  ;;  %1208 = vmatpush1.bf16.msra.mxu1 %v1179_v42  ;;  %v680_v41 = vpop.permute.xlu0 %679 }
 0x151   : > { %v684_v21 = vpop.permute.xlu1 %683  ;;  %v688_v22 = vsel %vm687_vm6, %v680_v41, %v682_v13  ;;  %v1181_v23 = vpack.c.bf16 %v712_v19, %v710_v17 }
 0x152   : > { %v689_v24 = vsel %vm687_vm6, %v684_v21, %v686_v14  ;;  %v709_v25 = vmul.f32 %v702_v18, %v688_v22 }
 0x153   : > { %v711_v27 = vmul.f32 %v702_v18, %v689_v24  ;;  %1182 = vmatprep.subr.bf16.mxu0 %v1181_v23  ;;  %1199 = vmatprep.subr.bf16.mxu1 %v1181_v23 }
 0x154   : > { %v720_v28 = vpop.permute.xlu0 %719 }
 0x155   : > { %v724_v29 = vpop.permute.xlu1 %723  ;;  %v732_v30 = vsel %vm725_vm7, %v720_v28, 0.0  ;;  %v1183_v31 = vpack.c.bf16 %v711_v27, %v709_v25 }
 0x156   : > { %v733_v32 = vsel %vm725_vm7, %v724_v29, 0.0  ;;  %v748_v33 = vmul.f32 %v744_v26, %v732_v30 }
 0x157   : > { %v750_v35 = vmul.f32 %v744_v26, %v733_v32  ;;  %1184 = vmatpush1.bf16.msra.mxu0 %v1183_v31  ;;  %1209 = vmatpush1.bf16.msra.mxu1 %v1183_v31 }
 0x158   : > { %v718_v37 = vpop.permute.xlu0 %717 }
 0x159   : > { %v722_v38 = vpop.permute.xlu1 %721  ;;  %v726_v39 = vsel %vm725_vm7, %v718_v37, %v720_v28  ;;  %v1185_v40 = vpack.c.bf16 %v750_v35, %v748_v33 }
 0x15a   : > { %v727_v43 = vsel %vm725_vm7, %v722_v38, %v724_v29  ;;  %v747_v44 = vmul.f32 %v740_v34, %v726_v39 }
 0x15b   : > { %v749_v46 = vmul.f32 %v740_v34, %v727_v43  ;;  %1186 = vmatprep.subr.bf16.mxu0 %v1185_v40  ;;  %1200 = vmatprep.subr.bf16.mxu1 %v1185_v40 }
 0x15c   : > { %v758_v47 = vpop.permute.xlu0 %757 }
 0x15d   : > { %v762_v48 = vpop.permute.xlu1 %761  ;;  %v770_v50 = vsel %vm763_vm8, %v758_v47, 0.0  ;;  %v1187_v52 = vpack.c.bf16 %v749_v46, %v747_v44 }
 0x15e   : > { %v771_v53 = vsel %vm763_vm8, %v762_v48, 0.0  ;;  %v786_v54 = vmul.f32 %v782_v45, %v770_v50 }
 0x15f   : > { %v788_v56 = vmul.f32 %v782_v45, %v771_v53  ;;  %1188 = vmatpush1.bf16.msra.mxu0 %v1187_v52  ;;  %1210 = vmatpush1.bf16.msra.mxu1 %v1187_v52 }
 0x160   : > { %v756_v57 = vpop.permute.xlu0 %755 }
 0x161   : > { %v760_v58 = vpop.permute.xlu1 %759  ;;  %v764_v51 = vsel %vm763_vm8, %v756_v57, %v758_v47  ;;  %v1189_v59 = vpack.c.bf16 %v788_v56, %v786_v54 }
 0x162   : > { %v765_v60 = vsel %vm763_vm8, %v760_v58, %v762_v48  ;;  %v785_v61 = vmul.f32 %v778_v55, %v764_v51 }
 0x163   : > { %v787_v62 = vmul.f32 %v778_v55, %v765_v60  ;;  %1190 = vmatprep.subr.bf16.mxu0 %v1189_v59  ;;  %1201 = vmatprep.subr.bf16.mxu1 %v1189_v59 }
 0x165   : > { %v1191_v49 = vpack.c.bf16 %v787_v62, %v785_v61 }
 0x167   : > { %1192 = vmatpush1.bf16.msra.mxu0 %v1191_v49  ;;  %1211 = vmatpush1.bf16.msra.mxu1 %v1191_v49 }
 0x168   : > { %894 = vmatprep.subr.mxu0 %v794_v63  ;;  %1202 = vmatprep.subr.mxu1 %v794_v63 }
 0x16b   : > { %895 = vmatpush1.msra.mxu0 %v793_v0  ;;  %1212 = vmatpush1.msra.mxu1 %v793_v0 }
 0x16c   : > { %923 = vmatmul.mubr.f32.vlgmr.msra.gmra.mrb[0].mxu0 %v797_v1  ;;  %929 = vmatmul.mubr.f32.vlgmr.msra.gmra.mrb[0].mxu1 %v799_v2 }
 0x171   : > { %v844_v4 = vpop.permute.xlu0 %843 }
 0x172   : > { %v849_v3 = vpop.permute.xlu1 %848 }
 0x23f   : > { %v924_v5 = vpop.f32.mrb[0].mxu0  ;;  %v930_v6 = vpop.f32.mrb[0].mxu1 }
 0x240   : > { %v925_v7 = vadd.f32 %v924_v5, %v844_v4  ;;  %v931_v8 = vadd.f32 %v930_v6, %v849_v3  ;;  %v926_v9 = vpop.f32.mrb[1].mxu0  ;;  %v932_v10 = vpop.f32.mrb[1].mxu1 }
 0x241   : > { %v927_v11 = vadd.f32 %v926_v9, %v844_v4  ;;  %v933_v12 = vadd.f32 %v932_v10, %v849_v3 }
 0x242   : > { %935 = vst [vmem:[%s407_s29] sm:$0xff] %v925_v7  ;;  %937 = vst [vmem:[%s407_s29 + $0x10] sm:$0xff] %v931_v8  ;;  %v947_v13 = vmul.f32 %v925_v7, %v925_v7  ;;  %v949_v14 = vmul.f32 %v931_v8, %v931_v8 }
 0x243   : > { %936 = vst [vmem:[%s407_s29 + $0x8] sm:$0xff] %v927_v11  ;;  %938 = vst [vmem:[%s407_s29 + $0x18] sm:$0xff] %v933_v12  ;;  %v942_v15 = vadd.f32 %v933_v12, %v931_v8  ;;  %v939_v42 = vadd.f32 %v927_v11, %v925_v7  ;;  %v948_v16 = vmul.f32 %v927_v11, %v927_v11 }
 0x244   : > { %v950_v17 = vmul.f32 %v933_v12, %v933_v12 }
 0x245   : > { %943 = vadd.xlane.f32.xlu1 %v942_v15  ;;  %940 = vadd.xlane.f32.xlu0 %v939_v42  ;;  %v951_v18 = vadd.f32 %v948_v16, %v947_v13 }
 0x246   : > { %v954_v19 = vadd.f32 %v950_v17, %v949_v14 }
 0x249   : > { %952 = vadd.xlane.f32.xlu0 %v951_v18 }
 0x24d   : > { %955 = vadd.xlane.f32.xlu0 %v954_v19 }
 0x2d2   : > { %v944_v20 = vpop.xlane.xlu1 %943  ;;  %v941_v41 = vpop.xlane.xlu0 %940 }
 0x2d3   : > { %946 = vst.msk [vmem:[%s412_s12 + $0x8] sm:$0xff] %vm607_vm4, %v944_v20  ;;  %945 = vst.msk [vmem:[%s412_s12] sm:$0xff] %vm607_vm4, %v941_v41 }
 0x2d6   : > { %v953_v21 = vpop.xlane.xlu0 %952 }
 0x2d7   : > { %957 = vst.msk [vmem:[%s417_s15] sm:$0xff] %vm607_vm4, %v953_v21 }
 0x2da   : > { %v956_v22 = vpop.xlane.xlu0 %955 }
 0x2db   : > { %958 = vst.msk [vmem:[%s417_s15 + $0x8] sm:$0xff] %vm607_vm4, %v956_v22 }
 0x2dc PF: > { %s20_s30 = sadd.s32 1, %s1254_s30  }
 0x2dd   : > { %p17_p4 = scmp.ge.s32.totalorder %s20_s30, 4  }
 0x2df   :  { %19 = sbr.rel (!%p17_p4) target bundleno = 1 (0x1), region = 118 }

// kernel: upblock_forward.8
= control target key start
LH: loop header
LB: loop body
LE: loop exit
PB: predicated region body
PF: predicated region fallthrough
CT: control target
= control target key end

     0   :  { %s1239_s27 = smov 0   ;;  %s1386_s0 = inlined_call_operand.vmem [shape: f32[2,16,256], index: 0, kind: input, shape index: {}]   ;;  %s1387_s1 = inlined_call_operand.vmem [shape: f32[2,16,1], index: 1, kind: input, shape index: {}]   ;;  %s1388_s2 = inlined_call_operand.vmem [shape: f32[2,16,1], index: 2, kind: input, shape index: {}]   ;;  %s1389_s3 = inlined_call_operand.vmem [shape: f32[9,256], index: 3, kind: input, shape index: {}]   ;;  %s1390_s4 = inlined_call_operand.vmem [shape: f32[16,144], index: 4, kind: input, shape index: {}]   ;;  %s1391_s5 = inlined_call_operand.vmem [shape: f32[16,1], index: 5, kind: input, shape index: {}]   ;;  %s1392_s6 = inlined_call_operand.vmem [shape: f32[2,16,256], index: 6, kind: output, shape index: {0}]   ;;  %s1393_s7 = inlined_call_operand.vmem [shape: f32[2,16,1], index: 7, kind: output, shape index: {1}]   ;;  %s1394_s8 = inlined_call_operand.vmem [shape: f32[2,16,1], index: 8, kind: output, shape index: {2}]  }
   0x1 LB: > { %s1050_s28 = sadd.s32 4294967295, %s1183_s27   ;;  %p1054_p0 = scmp.ge.s32.totalorder %s1183_s27, 1  ;;  %s1183_s27 = sphi %s1239_s27, %s19_s27  }
   0x2   : > { %p287_p1 = scmp.lt.s32.totalorder %s1183_s27, 3 }
   0x4   : > { %p288_p2 = pnand %p1054_p0, %p287_p1 }
   0x5   : > { %p341_p3 = scmp.lt.s32.totalorder (!%p288_p2), %s1050_s28, 1  ;;  %v1185_v0 = vmov (!%p288_p2), 0   ;;  %s1186_s18 = smov (!%p288_p2), 17   ;;  %vm484_vm0 = vcmask (!%p288_p2), 130048   ;;  %v747_v43 = vld [vmem:[%s1390_s4 + $0x8] sm:$0xff] (!%p288_p2)  ;;  %v749_v44 = vld [vmem:[%s1390_s4 + $0x18] sm:$0xff] (!%p288_p2)  ;;  %v458_v47 = vlaneseq (!%p288_p2) }
   0x6   : > { %291 = sbr.rel (%p288_p2) target bundleno = 730 (0x2da), region = 44  ;;  %1160 = vset.pattern.permute.xlu1 (!%p288_p2), %v1185_v0  ;;  %1159 = vset.pattern.permute.xlu0 (!%p288_p2), %v1185_v0  ;;  %s1187_s19 = smov (!%p288_p2), 16   ;;  %v786_v45 = vld [vmem:[%s1391_s5] sm:$0xff] (!%p288_p2)  ;;  %v787_v46 = vld [vmem:[%s1391_s5 + $0x8] sm:$0xff] (!%p288_p2)  ;;  %vm447_vm1 = vcmask (!%p288_p2), 138240   ;;  %vm522_vm2 = vcmask (!%p288_p2), 121856  }
   0x7   : > { %s1188_s20 = smov (!%p288_p2), 15   ;;  %s1189_s21 = smov (!%p288_p2), 1   ;;  %1078 = vmatprep.mubr.msk.f32.mxu0 (!%p288_p2), %vm484_vm0, %v747_v43  ;;  %1079 = vmatprep.mubr.msk.f32.mxu1 (!%p288_p2), %vm484_vm0, %v749_v44  ;;  %v459_v48 = vshrl.u32 (!%p288_p2), %v458_v47, 7  ;;  %v456_v50 = vld [vmem:[%s1389_s3] ss:$8 sm:$0x3] (!%p288_p2) }
   0x8   : > { %s1190_s22 = smov (!%p288_p2), 127   ;;  %s1191_s23 = smov (!%p288_p2), 113   ;;  %vm560_vm3 = vcmask (!%p288_p2), 7168   ;;  %vm602_vm4 = vcmask (!%p288_p2), 1039360   ;;  %vm640_vm5 = vcmask (!%p288_p2), 924672   ;;  %vm678_vm6 = vcmask (!%p288_p2), 916480  }
   0x9   : > { %s1192_s24 = smov (!%p288_p2), 112   ;;  %v1284_v49 = vsub.s32 (!%p288_p2), 0, %v459_v48  ;;  %v1289_v51 = vsub.s32 (!%p288_p2), 1, %v459_v48  ;;  %v1074_v48 = vld [vmem:[%s1389_s3 + $0x5] ss:$8 sm:$0x3] (!%p288_p2) }
   0xa   : > { %vm716_vm7 = vcmask (!%p288_p2), 908288  }
   0xb   : > { %v461_v54 = vrot.slane (!%p288_p2), %v456_v50, %v1284_v49  ;;  %v465_v55 = vrot.slane (!%p288_p2), %v456_v50, %v1289_v51 }
   0xd   : > { %s1396_s28 = smov (!%p341_p3, %s1050_s28), 1 }
   0xe   : > { %s1250_s29 = sshll.u32 %s1396_s28, 4  ;;  %s1082_s14 = sshll.u32 %s1396_s28, 5 }
   0xf   : > { %s355_s10 = scalar_lea.vmem %s1388_s2, %s1250_s29  ;;  %s350_s13 = scalar_lea.vmem %s1387_s1, %s1250_s29 }
  0x10   : > { %v391_v1 = vld [vmem:[%s355_s10] sm:$0xff]  ;;  %v392_v3 = vld [vmem:[%s355_s10 + $0x8] sm:$0xff]  ;;  %s345_s17 = scalar_lea.vmem %s1386_s0, %s1082_s14  ;;  %s1193_s10 = smov 111  }
  0x11   : > { %v375_v2 = vld [vmem:[%s350_s13] sm:$0xff]  ;;  %395 = vperm.xlu1 %1160, %v391_v1   ;;  %v376_v4 = vld [vmem:[%s350_s13 + $0x8] sm:$0xff]  ;;  %v373_v11 = vld [vmem:[%s345_s17 + $0x10] sm:$0xff] }
  0x12   : > { %379 = vperm.xlu0 %1159, %v375_v2   ;;  %v371_v5 = vld [vmem:[%s345_s17] sm:$0xff]  ;;  %v372_v6 = vld [vmem:[%s345_s17 + $0x8] sm:$0xff]  ;;  %v374_v12 = vld [vmem:[%s345_s17 + $0x18] sm:$0xff] }
  0x13   : > { %v1071_v2 = vld [vmem:[%s1389_s3 + $0x1] ss:$8 sm:$0x3] }
  0x15   : > { %400 = vperm.xlu1 %1160, %v392_v3  }
  0x16   : > { %384 = vperm.xlu0 %1159, %v376_v4  }
  0x90   : > { %v396_v7 = vpop.permute.xlu1 %395 }
  0x91   : > { %v380_v8 = vpop.permute.xlu0 %379 }
  0x92   : > { %v387_v9 = vmul.f32 %v380_v8, %v371_v5  ;;  %v388_v10 = vmul.f32 %v380_v8, %v372_v6  ;;  %v503_v8 = vrot.slane %v1071_v2, %v1289_v51 }
  0x94   : > { %v403_v13 = vadd.f32 %v396_v7, %v387_v9  ;;  %v404_v14 = vadd.f32 %v396_v7, %v388_v10  ;;  %v401_v20 = vpop.permute.xlu1 %400  ;;  %v499_v7 = vrot.slane %v1071_v2, %v1284_v49 }
  0x95   : > { %v385_v15 = vpop.permute.xlu0 %384 }
  0x96   : > { %v1067_v16 = vmul.f32 -1.442695, %v403_v13  ;;  %v1068_v17 = vmul.f32 -1.442695, %v404_v14  ;;  %v389_v18 = vmul.f32 %v385_v15, %v373_v11  ;;  %v390_v19 = vmul.f32 %v385_v15, %v374_v12 }
  0x98   : > { %1161 = vpow2.f32 %v1067_v16  ;;  %v405_v21 = vadd.f32 %v401_v20, %v389_v18  ;;  %v406_v22 = vadd.f32 %v401_v20, %v390_v19  ;;  %v1072_v19 = vld [vmem:[%s1389_s3 + $0x2] ss:$8 sm:$0x3] }
  0x99   : > { %1163 = vpow2.f32 %v1068_v17 }
  0x9a   : > { %v1069_v23 = vmul.f32 -1.442695, %v405_v21  ;;  %v1070_v24 = vmul.f32 -1.442695, %v406_v22 }
  0x9c   : > { %1165 = vpow2.f32 %v1069_v23 }
  0x9d   : > { %1167 = vpow2.f32 %v1070_v24  ;;  %v537_v24 = vrot.slane %v1072_v19, %v1284_v49 }
  0xa2   : > { %v1162_v25 = vpop.eup %1161 }
  0xa3   : > { %v1164_v26 = vpop.eup %1163  ;;  %v419_v27 = vadd.f32 1.0, %v1162_v25  ;;  %v541_v25 = vrot.slane %v1072_v19, %v1289_v51 }
  0xa4   : > { %v420_v28 = vadd.f32 1.0, %v1164_v26 }
  0xa5   : > { %1169 = vrcp.f32 %v419_v27 }
  0xa6   : > { %v1166_v29 = vpop.eup %1165  ;;  %1171 = vrcp.f32 %v420_v28 }
  0xa7   : > { %v1168_v30 = vpop.eup %1167  ;;  %v421_v31 = vadd.f32 1.0, %v1166_v29 }
  0xa8   : > { %v422_v32 = vadd.f32 1.0, %v1168_v30 }
  0xa9   : > { %1173 = vrcp.f32 %v421_v31 }
  0xaa   : > { %1175 = vrcp.f32 %v422_v32 }
  0xaf   : > { %v1170_v33 = vpop.eup %1169 }
  0xb0   : > { %v1172_v34 = vpop.eup %1171  ;;  %v431_v35 = vmul.f32 %v1170_v33, %v403_v13 }
  0xb1   : > { %v432_v36 = vmul.f32 %v1172_v34, %v404_v14 }
  0xb2   : > { %439 = vrot.lane.b32.xlu0 %v431_v35, %s1186_s18 }
  0xb3   : > { %v1174_v37 = vpop.eup %1173  ;;  %441 = vrot.lane.b32.xlu1 %v432_v36, %s1186_s18 }
  0xb4   : > { %v1176_v38 = vpop.eup %1175  ;;  %v433_v39 = vmul.f32 %v1174_v37, %v405_v21 }
  0xb5   : > { %v434_v40 = vmul.f32 %v1176_v38, %v406_v22 }
  0xb6   : > { %443 = vrot.lane.b32.xlu0 %v433_v39, %s1186_s18  ;;  %v1266_v41 = vpack.c.bf16 %v433_v39, %v431_v35 }
  0xb7   : > { %445 = vrot.lane.b32.xlu1 %v434_v40, %s1186_s18  ;;  %v1268_v42 = vpack.c.bf16 %v434_v40, %v432_v36 }
  0xba   : > { %476 = vrot.lane.b32.xlu0 %v431_v35, %s1187_s19 }
  0xbb   : > { %478 = vrot.lane.b32.xlu1 %v432_v36, %s1187_s19 }
  0xbe   : > { %480 = vrot.lane.b32.xlu0 %v433_v39, %s1187_s19 }
  0xbf   : > { %482 = vrot.lane.b32.xlu1 %v434_v40, %s1187_s19 }
  0xc2   : > { %514 = vrot.lane.b32.xlu0 %v431_v35, %s1188_s20 }
  0xc3   : > { %516 = vrot.lane.b32.xlu1 %v432_v36, %s1188_s20 }
  0xc6   : > { %518 = vrot.lane.b32.xlu0 %v433_v39, %s1188_s20 }
  0xc7   : > { %520 = vrot.lane.b32.xlu1 %v434_v40, %s1188_s20  ;;  %s360_s20 = scalar_lea.vmem %s1392_s6, %s1082_s14 }
  0xca   : > { %552 = vrot.lane.b32.xlu0 %v431_v35, %s1189_s21 }
  0xcb   : > { %554 = vrot.lane.b32.xlu1 %v432_v36, %s1189_s21 }
  0xce   : > { %556 = vrot.lane.b32.xlu0 %v433_v39, %s1189_s21 }
  0xcf   : > { %558 = vrot.lane.b32.xlu1 %v434_v40, %s1189_s21  ;;  %s365_s21 = scalar_lea.vmem %s1393_s7, %s1250_s29 }
  0xd2   : > { %596 = vrot.lane.b32.xlu0 %v432_v36, %s1190_s22 }
  0xd3   : > { %600 = vrot.lane.b32.xlu1 %v434_v40, %s1190_s22 }
  0xd6   : > { %594 = vrot.lane.b32.xlu0 %v431_v35, %s1190_s22 }
  0xd7   : > { %598 = vrot.lane.b32.xlu1 %v433_v39, %s1190_s22 }
  0xda   : > { %634 = vrot.lane.b32.xlu0 %v432_v36, %s1191_s23 }
  0xdb   : > { %638 = vrot.lane.b32.xlu1 %v434_v40, %s1191_s23 }
  0xde   : > { %632 = vrot.lane.b32.xlu0 %v431_v35, %s1191_s23 }
  0xdf   : > { %636 = vrot.lane.b32.xlu1 %v433_v39, %s1191_s23 }
  0xe2   : > { %672 = vrot.lane.b32.xlu0 %v432_v36, %s1192_s24 }
  0xe3   : > { %676 = vrot.lane.b32.xlu1 %v434_v40, %s1192_s24 }
  0xe6   : > { %670 = vrot.lane.b32.xlu0 %v431_v35, %s1192_s24 }
  0xe7   : > { %674 = vrot.lane.b32.xlu1 %v433_v39, %s1192_s24  ;;  %s370_s24 = scalar_lea.vmem %s1394_s8, %s1250_s29 }
  0xea   : > { %710 = vrot.lane.b32.xlu0 %v432_v36, %s1193_s10  ;;  %v1073_v36 = vld [vmem:[%s1389_s3 + $0x3] ss:$8 sm:$0x3] }
  0xeb   : > { %714 = vrot.lane.b32.xlu1 %v434_v40, %s1193_s10  ;;  %v575_v43 = vrot.slane %v1073_v36, %v1284_v49  ;;  %v579_v44 = vrot.slane %v1073_v36, %v1289_v51  ;;  %v1077_v36 = vld [vmem:[%s1389_s3 + $0x10] ss:$8 sm:$0x3] }
  0xee   : > { %708 = vrot.lane.b32.xlu0 %v431_v35, %s1193_s10 }
  0xef   : > { %712 = vrot.lane.b32.xlu1 %v433_v39, %s1193_s10 }
  0xf2   : > { %790 = vperm.xlu0 %1159, %v786_v45  }
  0xf3   : > { %795 = vperm.xlu1 %1160, %v787_v46  }
 0x124   : > { %v440_v52 = vpop.permute.xlu0 %439 }
 0x125   : > { %v442_v53 = vpop.permute.xlu1 %441  ;;  %v454_v56 = vsel %vm447_vm1, 0.0, %v440_v52 }
 0x126   : > { %v448_v57 = vsel %vm447_vm1, %v440_v52, %v442_v53  ;;  %v468_v61 = vmul.f32 %v461_v54, %v454_v56 }
 0x127   : > { %v469_v0 = vmul.f32 %v465_v55, %v448_v57 }
 0x128   : > { %v444_v58 = vpop.permute.xlu0 %443 }
 0x129   : > { %v446_v59 = vpop.permute.xlu1 %445  ;;  %v455_v60 = vsel %vm447_vm1, 0.0, %v444_v58 }
 0x12a   : > { %v449_v62 = vsel %vm447_vm1, %v444_v58, %v446_v59  ;;  %v470_v63 = vmul.f32 %v461_v54, %v455_v60  ;;  %v621_v58 = vrot.slane %v1074_v48, %v1289_v51 }
 0x12b   : > { %v471_v1 = vmul.f32 %v465_v55, %v449_v62 }
 0x12c   : > { %v477_v3 = vpop.permute.xlu0 %476  ;;  %v1090_v4 = vpack.c.bf16 %v470_v63, %v468_v61 }
 0x12d   : > { %v479_v5 = vpop.permute.xlu1 %478  ;;  %v1088_v6 = vpack.c.bf16 %v471_v1, %v469_v0  ;;  %v491_v9 = vsel %vm484_vm0, 0.0, %v477_v3  ;;  %v617_v1 = vrot.slane %v1074_v48, %v1284_v49 }
 0x12e   : > { %v485_v10 = vsel %vm484_vm0, %v477_v3, %v479_v5  ;;  %v506_v14 = vmul.f32 %v499_v7, %v491_v9 }
 0x12f   : > { %1089 = vmatprep.subr.bf16.mxu0 %v1088_v6  ;;  %1124 = vmatprep.subr.bf16.mxu1 %v1088_v6  ;;  %v507_v17 = vmul.f32 %v503_v8, %v485_v10 }
 0x130   : > { %1091 = vmatpush1.bf16.msra.mxu0 %v1090_v4  ;;  %1133 = vmatpush1.bf16.msra.mxu1 %v1090_v4  ;;  %v481_v11 = vpop.permute.xlu0 %480  ;;  %v1075_v4 = vld [vmem:[%s1389_s3 + $0x6] ss:$8 sm:$0x3] }
 0x131   : > { %v483_v12 = vpop.permute.xlu1 %482  ;;  %v492_v13 = vsel %vm484_vm0, 0.0, %v481_v11  ;;  %v659_v10 = vrot.slane %v1075_v4, %v1289_v51 }
 0x132   : > { %v486_v15 = vsel %vm484_vm0, %v481_v11, %v483_v12  ;;  %v508_v16 = vmul.f32 %v499_v7, %v492_v13 }
 0x133   : > { %v509_v18 = vmul.f32 %v503_v8, %v486_v15 }
 0x134   : > { %v515_v20 = vpop.permute.xlu0 %514  ;;  %v1094_v21 = vpack.c.bf16 %v508_v16, %v506_v14 }
 0x135   : > { %v517_v22 = vpop.permute.xlu1 %516  ;;  %v1092_v23 = vpack.c.bf16 %v509_v18, %v507_v17  ;;  %v529_v26 = vsel %vm522_vm2, 0.0, %v515_v20  ;;  %v655_v18 = vrot.slane %v1075_v4, %v1284_v49 }
 0x136   : > { %v523_v27 = vsel %vm522_vm2, %v515_v20, %v517_v22  ;;  %v544_v31 = vmul.f32 %v537_v24, %v529_v26  ;;  %v1076_v20 = vld [vmem:[%s1389_s3 + $0x7] ss:$8 sm:$0x3] }
 0x137   : > { %1093 = vmatprep.subr.bf16.mxu0 %v1092_v23  ;;  %1125 = vmatprep.subr.bf16.mxu1 %v1092_v23  ;;  %v545_v34 = vmul.f32 %v541_v25, %v523_v27  ;;  %v697_v26 = vrot.slane %v1076_v20, %v1289_v51 }
 0x138   : > { %1095 = vmatpush1.bf16.msra.mxu0 %v1094_v21  ;;  %1134 = vmatpush1.bf16.msra.mxu1 %v1094_v21  ;;  %v519_v28 = vpop.permute.xlu0 %518 }
 0x139   : > { %v521_v29 = vpop.permute.xlu1 %520  ;;  %v530_v30 = vsel %vm522_vm2, 0.0, %v519_v28 }
 0x13a   : > { %v524_v32 = vsel %vm522_vm2, %v519_v28, %v521_v29  ;;  %v546_v33 = vmul.f32 %v537_v24, %v530_v30 }
 0x13b   : > { %v547_v35 = vmul.f32 %v541_v25, %v524_v32 }
 0x13c   : > { %v553_v37 = vpop.permute.xlu0 %552  ;;  %v1098_v38 = vpack.c.bf16 %v546_v33, %v544_v31 }
 0x13d   : > { %v555_v39 = vpop.permute.xlu1 %554  ;;  %v1096_v40 = vpack.c.bf16 %v547_v35, %v545_v34  ;;  %v567_v45 = vsel %vm560_vm3, 0.0, %v553_v37  ;;  %v693_v34 = vrot.slane %v1076_v20, %v1284_v49 }
 0x13e   : > { %v561_v46 = vsel %vm560_vm3, %v553_v37, %v555_v39  ;;  %v582_v53 = vmul.f32 %v575_v43, %v567_v45  ;;  %v735_v45 = vrot.slane %v1077_v36, %v1289_v51 }
 0x13f   : > { %1097 = vmatprep.subr.bf16.mxu0 %v1096_v40  ;;  %1126 = vmatprep.subr.bf16.mxu1 %v1096_v40  ;;  %v583_v56 = vmul.f32 %v579_v44, %v561_v46 }
 0x140   : > { %1099 = vmatpush1.bf16.msra.mxu0 %v1098_v38  ;;  %1135 = vmatpush1.bf16.msra.mxu1 %v1098_v38  ;;  %v557_v47 = vpop.permute.xlu0 %556 }
 0x141   : > { %v559_v50 = vpop.permute.xlu1 %558  ;;  %v568_v52 = vsel %vm560_vm3, 0.0, %v557_v47 }
 0x142   : > { %v562_v54 = vsel %vm560_vm3, %v557_v47, %v559_v50  ;;  %v584_v55 = vmul.f32 %v575_v43, %v568_v52 }
 0x143   : > { %v585_v57 = vmul.f32 %v579_v44, %v562_v54 }
 0x144   : > { %v597_v59 = vpop.permute.xlu0 %596  ;;  %v1102_v60 = vpack.c.bf16 %v584_v55, %v582_v53  ;;  %v731_v55 = vrot.slane %v1077_v36, %v1284_v49  ;;  %v746_v49 = vld [vmem:[%s1390_s4] sm:$0xff] }
 0x145   : > { %v601_v61 = vpop.permute.xlu1 %600  ;;  %v609_v62 = vsel %vm602_vm4, %v597_v59, 0.0  ;;  %v1100_v63 = vpack.c.bf16 %v585_v57, %v583_v56 }
 0x146   : > { %v610_v0 = vsel %vm602_vm4, %v601_v61, 0.0  ;;  %v625_v3 = vmul.f32 %v621_v58, %v609_v62 }
 0x147   : > { %v627_v2 = vmul.f32 %v621_v58, %v610_v0  ;;  %1101 = vmatprep.subr.bf16.mxu0 %v1100_v63  ;;  %1127 = vmatprep.subr.bf16.mxu1 %v1100_v63  ;;  %v748_v0 = vld [vmem:[%s1390_s4 + $0x10] sm:$0xff] }
 0x148   : > { %1103 = vmatpush1.bf16.msra.mxu0 %v1102_v60  ;;  %1136 = vmatpush1.bf16.msra.mxu1 %v1102_v60  ;;  %v595_v5 = vpop.permute.xlu0 %594 }
 0x149   : > { %v599_v6 = vpop.permute.xlu1 %598  ;;  %1105 = vmatprep.subr.bf16.mxu0 %v1268_v42  ;;  %1128 = vmatprep.subr.bf16.mxu1 %v1268_v42  ;;  %v603_v7 = vsel %vm602_vm4, %v595_v5, %v597_v59  ;;  %v1108_v12 = vpack.c.bf16 %v627_v2, %v625_v3 }
 0x14a   : > { %v604_v8 = vsel %vm602_vm4, %v599_v6, %v601_v61  ;;  %v624_v9 = vmul.f32 %v617_v1, %v603_v7 }
 0x14b   : > { %v626_v11 = vmul.f32 %v617_v1, %v604_v8 }
 0x14c   : > { %1107 = vmatpush1.bf16.msra.mxu0 %v1266_v41  ;;  %1137 = vmatpush1.bf16.msra.mxu1 %v1266_v41  ;;  %v635_v13 = vpop.permute.xlu0 %634 }
 0x14d   : > { %v639_v14 = vpop.permute.xlu1 %638  ;;  %v647_v15 = vsel %vm640_vm5, %v635_v13, 0.0  ;;  %1109 = vmatprep.subr.bf16.mxu0 %v1108_v12  ;;  %1129 = vmatprep.subr.bf16.mxu1 %v1108_v12  ;;  %v1110_v42 = vpack.c.bf16 %v626_v11, %v624_v9 }
 0x14e   : > { %v648_v16 = vsel %vm640_vm5, %v639_v14, 0.0  ;;  %v663_v17 = vmul.f32 %v659_v10, %v647_v15 }
 0x14f   : > { %v665_v19 = vmul.f32 %v659_v10, %v648_v16 }
 0x150   : > { %1111 = vmatpush1.bf16.msra.mxu0 %v1110_v42  ;;  %1138 = vmatpush1.bf16.msra.mxu1 %v1110_v42  ;;  %v633_v41 = vpop.permute.xlu0 %632 }
 0x151   : > { %v637_v21 = vpop.permute.xlu1 %636  ;;  %v641_v22 = vsel %vm640_vm5, %v633_v41, %v635_v13  ;;  %v1112_v23 = vpack.c.bf16 %v665_v19, %v663_v17 }
 0x152   : > { %v642_v24 = vsel %vm640_vm5, %v637_v21, %v639_v14  ;;  %v662_v25 = vmul.f32 %v655_v18, %v641_v22 }
 0x153   : > { %v664_v27 = vmul.f32 %v655_v18, %v642_v24  ;;  %1113 = vmatprep.subr.bf16.mxu0 %v1112_v23  ;;  %1130 = vmatprep.subr.bf16.mxu1 %v1112_v23 }
 0x154   : > { %v673_v28 = vpop.permute.xlu0 %672 }
 0x155   : > { %v677_v29 = vpop.permute.xlu1 %676  ;;  %v685_v30 = vsel %vm678_vm6, %v673_v28, 0.0  ;;  %v1114_v31 = vpack.c.bf16 %v664_v27, %v662_v25 }
 0x156   : > { %v686_v32 = vsel %vm678_vm6, %v677_v29, 0.0  ;;  %v701_v33 = vmul.f32 %v697_v26, %v685_v30 }
 0x157   : > { %v703_v35 = vmul.f32 %v697_v26, %v686_v32  ;;  %1115 = vmatpush1.bf16.msra.mxu0 %v1114_v31  ;;  %1139 = vmatpush1.bf16.msra.mxu1 %v1114_v31 }
 0x158   : > { %v671_v37 = vpop.permute.xlu0 %670 }
 0x159   : > { %v675_v38 = vpop.permute.xlu1 %674  ;;  %v679_v39 = vsel %vm678_vm6, %v671_v37, %v673_v28  ;;  %v1116_v40 = vpack.c.bf16 %v703_v35, %v701_v33 }
 0x15a   : > { %v680_v43 = vsel %vm678_vm6, %v675_v38, %v677_v29  ;;  %v700_v44 = vmul.f32 %v693_v34, %v679_v39 }
 0x15b   : > { %v702_v46 = vmul.f32 %v693_v34, %v680_v43  ;;  %1117 = vmatprep.subr.bf16.mxu0 %v1116_v40  ;;  %1131 = vmatprep.subr.bf16.mxu1 %v1116_v40 }
 0x15c   : > { %v711_v47 = vpop.permute.xlu0 %710 }
 0x15d   : > { %v715_v48 = vpop.permute.xlu1 %714  ;;  %v723_v50 = vsel %vm716_vm7, %v711_v47, 0.0  ;;  %v1118_v52 = vpack.c.bf16 %v702_v46, %v700_v44 }
 0x15e   : > { %v724_v53 = vsel %vm716_vm7, %v715_v48, 0.0  ;;  %v739_v54 = vmul.f32 %v735_v45, %v723_v50 }
 0x15f   : > { %v741_v56 = vmul.f32 %v735_v45, %v724_v53  ;;  %1119 = vmatpush1.bf16.msra.mxu0 %v1118_v52  ;;  %1140 = vmatpush1.bf16.msra.mxu1 %v1118_v52 }
 0x160   : > { %v709_v57 = vpop.permute.xlu0 %708 }
 0x161   : > { %v713_v58 = vpop.permute.xlu1 %712  ;;  %v717_v51 = vsel %vm716_vm7, %v709_v57, %v711_v47  ;;  %v1120_v59 = vpack.c.bf16 %v741_v56, %v739_v54 }
 0x162   : > { %v718_v60 = vsel %vm716_vm7, %v713_v58, %v715_v48  ;;  %v738_v61 = vmul.f32 %v731_v55, %v717_v51 }
 0x163   : > { %v740_v62 = vmul.f32 %v731_v55, %v718_v60  ;;  %1121 = vmatprep.subr.bf16.mxu0 %v1120_v59  ;;  %1132 = vmatprep.subr.bf16.mxu1 %v1120_v59 }
 0x165   : > { %v1122_v63 = vpack.c.bf16 %v740_v62, %v738_v61 }
 0x167   : > { %1123 = vmatpush1.bf16.msra.mxu0 %v1122_v63  ;;  %1141 = vmatpush1.bf16.msra.mxu1 %v1122_v63 }
 0x16a   : > { %869 = vmatmul.mubr.f32.vlgmr.msra.gmra.mrb[0].mxu0 %v746_v49  ;;  %875 = vmatmul.mubr.f32.vlgmr.msra.gmra.mrb[0].mxu1 %v748_v0 }
 0x171   : > { %v791_v2 = vpop.permute.xlu0 %790 }
 0x172   : > { %v796_v1 = vpop.permute.xlu1 %795 }
 0x23d   : > { %v870_v3 = vpop.f32.mrb[0].mxu0  ;;  %v876_v4 = vpop.f32.mrb[0].mxu1 }
 0x23e   : > { %v871_v5 = vadd.f32 %v870_v3, %v791_v2  ;;  %v877_v6 = vadd.f32 %v876_v4, %v796_v1  ;;  %v872_v7 = vpop.f32.mrb[1].mxu0  ;;  %v878_v8 = vpop.f32.mrb[1].mxu1 }
 0x23f   : > { %v873_v9 = vadd.f32 %v872_v7, %v791_v2  ;;  %v879_v10 = vadd.f32 %v878_v8, %v796_v1 }
 0x240   : > { %881 = vst [vmem:[%s360_s20] sm:$0xff] %v871_v5  ;;  %883 = vst [vmem:[%s360_s20 + $0x10] sm:$0xff] %v877_v6  ;;  %v893_v11 = vmul.f32 %v871_v5, %v871_v5  ;;  %v895_v12 = vmul.f32 %v877_v6, %v877_v6 }
 0x241   : > { %882 = vst [vmem:[%s360_s20 + $0x8] sm:$0xff] %v873_v9  ;;  %884 = vst [vmem:[%s360_s20 + $0x18] sm:$0xff] %v879_v10  ;;  %v888_v13 = vadd.f32 %v879_v10, %v877_v6  ;;  %v885_v14 = vadd.f32 %v873_v9, %v871_v5  ;;  %v894_v15 = vmul.f32 %v873_v9, %v873_v9 }
 0x242   : > { %v896_v42 = vmul.f32 %v879_v10, %v879_v10 }
 0x243   : > { %889 = vadd.xlane.f32.xlu1 %v888_v13  ;;  %886 = vadd.xlane.f32.xlu0 %v885_v14  ;;  %v897_v16 = vadd.f32 %v894_v15, %v893_v11 }
 0x244   : > { %v900_v17 = vadd.f32 %v896_v42, %v895_v12 }
 0x247   : > { %898 = vadd.xlane.f32.xlu0 %v897_v16 }
 0x24b   : > { %901 = vadd.xlane.f32.xlu0 %v900_v17 }
 0x2d0   : > { %v890_v18 = vpop.xlane.xlu1 %889  ;;  %v887_v19 = vpop.xlane.xlu0 %886 }
 0x2d1   : > { %892 = vst.msk [vmem:[%s365_s21 + $0x8] sm:$0xff] %vm560_vm3, %v890_v18  ;;  %891 = vst.msk [vmem:[%s365_s21] sm:$0xff] %vm560_vm3, %v887_v19 }
 0x2d4   : > { %v899_v20 = vpop.xlane.xlu0 %898 }
 0x2d5   : > { %903 = vst.msk [vmem:[%s370_s24] sm:$0xff] %vm560_vm3, %v899_v20 }
 0x2d8   : > { %v902_v41 = vpop.xlane.xlu0 %901 }
 0x2d9   : > { %904 = vst.msk [vmem:[%s370_s24 + $0x8] sm:$0xff] %vm560_vm3, %v902_v41 }
 0x2da PF: > { %s19_s27 = sadd.s32 1, %s1183_s27  }
 0x2db   : > { %p16_p4 = scmp.ge.s32.totalorder %s19_s27, 4  }
 0x2dd   :  { %18 = sbr.rel (!%p16_p4) target bundleno = 1 (0x1), region = 111 }

// kernel: upblock_forward.9
= control target key start
LH: loop header
LB: loop body
LE: loop exit
PB: predicated region body
PF: predicated region fallthrough
CT: control target
= control target key end

     0   :  { %s1765_s0 = inlined_call_operand.vmem [shape: f32[2,16,256], index: 0, kind: input, shape index: {}]   ;;  %s1766_s1 = inlined_call_operand.vmem [shape: f32[2,16,1], index: 1, kind: input, shape index: {}]   ;;  %s1767_s2 = inlined_call_operand.vmem [shape: f32[2,16,1], index: 2, kind: input, shape index: {}]   ;;  %s1768_s3 = inlined_call_operand.vmem [shape: f32[9,256], index: 3, kind: input, shape index: {}]   ;;  %s1769_s4 = inlined_call_operand.vmem [shape: f32[16,160], index: 4, kind: input, shape index: {}]   ;;  %s1770_s5 = inlined_call_operand.vmem [shape: f32[16,1], index: 5, kind: input, shape index: {}]   ;;  %s1771_s6 = inlined_call_operand.vmem [shape: f32[2,16,256], index: 6, kind: input, shape index: {}]   ;;  %s1772_s7 = inlined_call_operand.vmem [shape: f32[2,16,256], index: 7, kind: output, shape index: {0}]   ;;  %s1773_s8 = inlined_call_operand.hbm [shape: f32[2,16,1], index: 8, kind: output, shape index: {1}]   ;;  %s1774_s9 = inlined_call_operand.hbm [shape: f32[2,16,1], index: 9, kind: output, shape index: {2}]  }
   0x1   :  { %1777 = sst [smem:[#allocation9_spill]] %s1765_s0 }
   0x2   :  { %15 = vsyncpa [#allocation4], 0 }
   0x3   :  { %17 = vsyncpa [#allocation4 + $0x1], 0 }
   0x4   :  { %18 = vsyncpa [#allocation6], 0 }
   0x5   :  { %20 = vsyncpa [#allocation6 + $0x1], 0  ;;  %s1495_s30 = smov 0   ;;  %s1497_s10 = smov 0  }
   0x6   :  { %s1499_s11 = smov 0   ;;  %s1501_s12 = smov 0  }
   0x7 LB: > { %s1516_s13 = sadd.s32 4294967295, %s1430_s12   ;;  %s1159_s14 = sadd.s32 4294967294, %s1430_s12   ;;  %s1430_s12 = sphi %s1501_s12, %s1786_s12   ;;  %s1426_s11 = sphi %s1499_s11, %s1785_s11   ;;  %s1422_s10 = sphi %s1497_s10, %s1784_s10   ;;  %s1418_s30 = sphi %s1495_s30, %s1783_s30  }
   0x8   : > { %s1520_s15 = sadd.s32 1, %s1430_s12   ;;  %s226_s16 = sadd.s32 1, %s1426_s11 }
   0x9   : > { %s223_s17 = ssub.s32 %s1430_s12, %s1520_s15  ;;  %p236_p0 = scmp.ne.s32.totalorder %s1426_s11, %s1422_s10 }
   0xa   : > { %p224_p1 = scmp.eq.s32.totalorder %s223_s17, 0  ;;  %p237_p2 = scmp.eq.s32.totalorder %s1516_s13, 1 }
   0xb   : > { %p242_p3 = scmp.ne.s32.totalorder %s1422_s10, %s1418_s30  ;;  %p243_p4 = scmp.eq.s32.totalorder %s1159_s14, 1 }
   0xc   : > { %s1531_s18 = scalar_select %p224_p1, %s1426_s11, %s226_s16  }
   0xd   : > { %p1533_p5 = por %p237_p2, %p236_p0  ;;  %p1537_p6 = por %p243_p4, %p242_p3 }
   0xe   : > { %p1162_p7 = scmp.ge.s32.totalorder %s1430_s12, 1  ;;  %p328_p8 = scmp.lt.s32.totalorder %s1430_s12, 3 }
  0x10   : > { %p329_p9 = pnand %p1162_p7, %p328_p8 }
  0x11   : > { %p389_p10 = scmp.lt.s32.totalorder (!%p329_p9), %s1516_s13, 1  ;;  %v1432_v0 = vmov (!%p329_p9), 0   ;;  %s1780_s0 = sld [smem:[#allocation9_spill]] (!%p329_p9)  ;;  %v798_v43 = vld [vmem:[%s1769_s4 + $0x8] sm:$0xff] (!%p329_p9)  ;;  %vm853_vm0 = vcmask (!%p329_p9), 261120   ;;  %v800_v44 = vld [vmem:[%s1769_s4 + $0x18] sm:$0xff] (!%p329_p9)  ;;  %v501_v47 = vlaneseq (!%p329_p9) }
  0x12   : > { %332 = sbr.rel (%p329_p9) target bundleno = 778 (0x30a), region = 48  ;;  %1319 = vset.pattern.permute.xlu1 (!%p329_p9), %v1432_v0  ;;  %1318 = vset.pattern.permute.xlu0 (!%p329_p9), %v1432_v0  ;;  %s1435_s23 = smov (!%p329_p9), 15   ;;  %v841_v45 = vld [vmem:[%s1770_s5] sm:$0xff] (!%p329_p9)  ;;  %v842_v46 = vld [vmem:[%s1770_s5 + $0x8] sm:$0xff] (!%p329_p9)  ;;  %vm490_vm1 = vcmask (!%p329_p9), 138240   ;;  %vm527_vm2 = vcmask (!%p329_p9), 130048  }
  0x13   : > { %s1436_s24 = smov (!%p329_p9), 1   ;;  %s1438_s26 = smov (!%p329_p9), 113   ;;  %1186 = vmatprep.mubr.msk.f32.mxu0 (!%p329_p9), %vm853_vm0, %v798_v43  ;;  %1187 = vmatprep.mubr.msk.f32.mxu1 (!%p329_p9), %vm853_vm0, %v800_v44  ;;  %v502_v48 = vshrl.u32 (!%p329_p9), %v501_v47, 7  ;;  %v499_v50 = vld [vmem:[%s1768_s3] ss:$8 sm:$0x3] (!%p329_p9) }
  0x14   : > { %s1439_s27 = smov (!%p329_p9), 112   ;;  %vm565_vm3 = vcmask (!%p329_p9), 121856   ;;  %vm603_vm4 = vcmask (!%p329_p9), 7168   ;;  %vm645_vm5 = vcmask (!%p329_p9), 1039360   ;;  %vm683_vm6 = vcmask (!%p329_p9), 924672  }
  0x15   : > { %v1573_v49 = vsub.s32 (!%p329_p9), 0, %v502_v48  ;;  %v1578_v51 = vsub.s32 (!%p329_p9), 1, %v502_v48  ;;  %v1182_v48 = vld [vmem:[%s1768_s3 + $0x5] ss:$8 sm:$0x3] (!%p329_p9)  ;;  %vm721_vm7 = vcmask (!%p329_p9), 916480  }
  0x16   : > { %vm759_vm8 = vcmask (!%p329_p9), 908288  }
  0x17   : > { %v504_v54 = vrot.slane (!%p329_p9), %v499_v50, %v1573_v49  ;;  %v508_v55 = vrot.slane (!%p329_p9), %v499_v50, %v1578_v51 }
  0x19   : > { %s390_s21 = scalar_select %p389_p10, %s1516_s13, 1 }
  0x1b   : > { %s1197_s22 = sshll.u32 %s390_s21, 4  ;;  %s1551_s29 = sshll.u32 %s390_s21, 5 }
  0x1c   : > { %s403_s25 = scalar_lea.vmem %s1767_s2, %s1197_s22  ;;  %s398_s28 = scalar_lea.vmem %s1766_s1, %s1197_s22 }
  0x1d   : > { %v434_v1 = vld [vmem:[%s403_s25] sm:$0xff]  ;;  %v435_v3 = vld [vmem:[%s403_s25 + $0x8] sm:$0xff]  ;;  %s393_s17 = scalar_lea.vmem %s1780_s0, %s1551_s29  ;;  %s1433_s21 = smov 17  }
  0x1e   : > { %438 = vperm.xlu1 %1319, %v434_v1   ;;  %v418_v2 = vld [vmem:[%s398_s28] sm:$0xff]  ;;  %v419_v4 = vld [vmem:[%s398_s28 + $0x8] sm:$0xff]  ;;  %v416_v11 = vld [vmem:[%s393_s17 + $0x10] sm:$0xff]  ;;  %s1434_s22 = smov 16   ;;  %s1437_s25 = smov 127  }
  0x1f   : > { %422 = vperm.xlu0 %1318, %v418_v2   ;;  %v414_v5 = vld [vmem:[%s393_s17] sm:$0xff]  ;;  %v415_v6 = vld [vmem:[%s393_s17 + $0x8] sm:$0xff]  ;;  %v417_v12 = vld [vmem:[%s393_s17 + $0x18] sm:$0xff]  ;;  %s1440_s28 = smov 111   ;;  %s413_s14 = scalar_lea.vmem %s1772_s7, %s1551_s29 }
  0x20   : > { %v1179_v2 = vld [vmem:[%s1768_s3 + $0x1] ss:$8 sm:$0x3] }
  0x22   : > { %443 = vperm.xlu1 %1319, %v435_v3  }
  0x23   : > { %427 = vperm.xlu0 %1318, %v419_v4  }
  0x9d   : > { %v439_v7 = vpop.permute.xlu1 %438 }
  0x9e   : > { %v423_v8 = vpop.permute.xlu0 %422 }
  0x9f   : > { %v430_v9 = vmul.f32 %v423_v8, %v414_v5  ;;  %v431_v10 = vmul.f32 %v423_v8, %v415_v6  ;;  %v546_v8 = vrot.slane %v1179_v2, %v1578_v51 }
  0xa1   : > { %v446_v13 = vadd.f32 %v439_v7, %v430_v9  ;;  %v447_v14 = vadd.f32 %v439_v7, %v431_v10  ;;  %v444_v20 = vpop.permute.xlu1 %443  ;;  %v542_v7 = vrot.slane %v1179_v2, %v1573_v49 }
  0xa2   : > { %v428_v15 = vpop.permute.xlu0 %427 }
  0xa3   : > { %v1175_v16 = vmul.f32 -1.442695, %v446_v13  ;;  %v1176_v17 = vmul.f32 -1.442695, %v447_v14  ;;  %v432_v18 = vmul.f32 %v428_v15, %v416_v11  ;;  %v433_v19 = vmul.f32 %v428_v15, %v417_v12 }
  0xa5   : > { %1320 = vpow2.f32 %v1175_v16  ;;  %v448_v21 = vadd.f32 %v444_v20, %v432_v18  ;;  %v449_v22 = vadd.f32 %v444_v20, %v433_v19  ;;  %v1180_v19 = vld [vmem:[%s1768_s3 + $0x2] ss:$8 sm:$0x3] }
  0xa6   : > { %1322 = vpow2.f32 %v1176_v17 }
  0xa7   : > { %v1177_v23 = vmul.f32 -1.442695, %v448_v21  ;;  %v1178_v24 = vmul.f32 -1.442695, %v449_v22 }
  0xa9   : > { %1324 = vpow2.f32 %v1177_v23 }
  0xaa   : > { %1326 = vpow2.f32 %v1178_v24  ;;  %v580_v24 = vrot.slane %v1180_v19, %v1573_v49 }
  0xaf   : > { %v1321_v25 = vpop.eup %1320 }
  0xb0   : > { %v1323_v26 = vpop.eup %1322  ;;  %v462_v27 = vadd.f32 1.0, %v1321_v25  ;;  %v584_v25 = vrot.slane %v1180_v19, %v1578_v51 }
  0xb1   : > { %v463_v28 = vadd.f32 1.0, %v1323_v26 }
  0xb2   : > { %1328 = vrcp.f32 %v462_v27 }
  0xb3   : > { %v1325_v29 = vpop.eup %1324  ;;  %1330 = vrcp.f32 %v463_v28 }
  0xb4   : > { %v1327_v30 = vpop.eup %1326  ;;  %v464_v31 = vadd.f32 1.0, %v1325_v29 }
  0xb5   : > { %v465_v32 = vadd.f32 1.0, %v1327_v30 }
  0xb6   : > { %1332 = vrcp.f32 %v464_v31 }
  0xb7   : > { %1334 = vrcp.f32 %v465_v32 }
  0xbc   : > { %v1329_v33 = vpop.eup %1328 }
  0xbd   : > { %v1331_v34 = vpop.eup %1330  ;;  %v474_v35 = vmul.f32 %v1329_v33, %v446_v13 }
  0xbe   : > { %v475_v36 = vmul.f32 %v1331_v34, %v447_v14 }
  0xbf   : > { %482 = vrot.lane.b32.xlu0 %v474_v35, %s1433_s21 }
  0xc0   : > { %v1333_v37 = vpop.eup %1332  ;;  %484 = vrot.lane.b32.xlu1 %v475_v36, %s1433_s21 }
  0xc1   : > { %v1335_v38 = vpop.eup %1334  ;;  %v476_v39 = vmul.f32 %v1333_v37, %v448_v21 }
  0xc2   : > { %v477_v40 = vmul.f32 %v1335_v38, %v449_v22 }
  0xc3   : > { %486 = vrot.lane.b32.xlu0 %v476_v39, %s1433_s21  ;;  %v1557_v41 = vpack.c.bf16 %v476_v39, %v474_v35 }
  0xc4   : > { %488 = vrot.lane.b32.xlu1 %v477_v40, %s1433_s21  ;;  %v1559_v42 = vpack.c.bf16 %v477_v40, %v475_v36 }
  0xc7   : > { %519 = vrot.lane.b32.xlu0 %v474_v35, %s1434_s22 }
  0xc8   : > { %521 = vrot.lane.b32.xlu1 %v475_v36, %s1434_s22 }
  0xcb   : > { %523 = vrot.lane.b32.xlu0 %v476_v39, %s1434_s22 }
  0xcc   : > { %525 = vrot.lane.b32.xlu1 %v477_v40, %s1434_s22  ;;  %s408_s22 = scalar_lea.vmem %s1771_s6, %s1551_s29  ;;  %s1664_s29 = sand.u32 1, %s1422_s10  }
  0xcd   : > { %s1776_s16 = sshll.u32 %s1664_s29, 4 }
  0xce   : > { %s381_s17 = scalar_lea.vmem [#allocation3], %s1776_s16 }
  0xcf   : > { %557 = vrot.lane.b32.xlu0 %v474_v35, %s1435_s23  ;;  %s988_s21 = sshll.u32 %s381_s17, 4  ;;  %s1670_s21 = int_to_ptr.vmem [resolvable:$true] %s988_s21 }
  0xd0   : > { %559 = vrot.lane.b32.xlu1 %v475_v36, %s1435_s23 }
  0xd3   : > { %561 = vrot.lane.b32.xlu0 %v476_v39, %s1435_s23 }
  0xd4   : > { %563 = vrot.lane.b32.xlu1 %v477_v40, %s1435_s23 }
  0xd7   : > { %595 = vrot.lane.b32.xlu0 %v474_v35, %s1436_s24 }
  0xd8   : > { %597 = vrot.lane.b32.xlu1 %v475_v36, %s1436_s24 }
  0xdb   : > { %599 = vrot.lane.b32.xlu0 %v476_v39, %s1436_s24 }
  0xdc   : > { %601 = vrot.lane.b32.xlu1 %v477_v40, %s1436_s24 }
  0xdf   : > { %639 = vrot.lane.b32.xlu0 %v475_v36, %s1437_s25 }
  0xe0   : > { %643 = vrot.lane.b32.xlu1 %v477_v40, %s1437_s25 }
  0xe3   : > { %637 = vrot.lane.b32.xlu0 %v474_v35, %s1437_s25 }
  0xe4   : > { %641 = vrot.lane.b32.xlu1 %v476_v39, %s1437_s25 }
  0xe7   : > { %677 = vrot.lane.b32.xlu0 %v475_v36, %s1438_s26 }
  0xe8   : > { %681 = vrot.lane.b32.xlu1 %v477_v40, %s1438_s26 }
  0xeb   : > { %675 = vrot.lane.b32.xlu0 %v474_v35, %s1438_s26 }
  0xec   : > { %679 = vrot.lane.b32.xlu1 %v476_v39, %s1438_s26  ;;  %s967_s26 = scalar_lea.sflag [#allocation4], %s1664_s29 }
  0xef   : > { %715 = vrot.lane.b32.xlu0 %v475_v36, %s1439_s27 }
  0xf0   : > { %719 = vrot.lane.b32.xlu1 %v477_v40, %s1439_s27 }
  0xf3   : > { %713 = vrot.lane.b32.xlu0 %v474_v35, %s1439_s27 }
  0xf4   : > { %717 = vrot.lane.b32.xlu1 %v476_v39, %s1439_s27  ;;  %s1336_s27 = scalar_lea.vmem %s1670_s21, 256 }
  0xf5   : > { %p1337_p11 = scmp.ne.s32.totalorder %s1670_s21, %s1336_s27 }
  0xf7   : > { %753 = vrot.lane.b32.xlu0 %v475_v36, %s1440_s28  ;;  %v1181_v36 = vld [vmem:[%s1768_s3 + $0x3] ss:$8 sm:$0x3]  ;;  %p1338_p12 = pnand %p1337_p11, %p1533_p5 }
  0xf8   : > { %757 = vrot.lane.b32.xlu1 %v477_v40, %s1440_s28  ;;  %v618_v43 = vrot.slane %v1181_v36, %v1573_v49  ;;  %v622_v44 = vrot.slane %v1181_v36, %v1578_v51  ;;  %v1185_v36 = vld [vmem:[%s1768_s3 + $0x10] ss:$8 sm:$0x3] }
  0xf9   : > { %p1339_p13 = pneg %p1338_p12 }
  0xfb   : > { %751 = vrot.lane.b32.xlu0 %v474_v35, %s1440_s28 }
  0xfc   : > { %755 = vrot.lane.b32.xlu1 %v476_v39, %s1440_s28  ;;  %s1441_s28 = smov [#allocation3]  }
  0xff   : > { %845 = vperm.xlu0 %1318, %v841_v45  }
 0x100   : > { %850 = vperm.xlu1 %1319, %v842_v46  }
 0x131   : > { %v483_v52 = vpop.permute.xlu0 %482 }
 0x132   : > { %v485_v53 = vpop.permute.xlu1 %484  ;;  %v497_v56 = vsel %vm490_vm1, 0.0, %v483_v52 }
 0x133   : > { %v491_v57 = vsel %vm490_vm1, %v483_v52, %v485_v53  ;;  %v511_v61 = vmul.f32 %v504_v54, %v497_v56 }
 0x134   : > { %v512_v0 = vmul.f32 %v508_v55, %v491_v57 }
 0x135   : > { %v487_v58 = vpop.permute.xlu0 %486 }
 0x136   : > { %v489_v59 = vpop.permute.xlu1 %488  ;;  %v498_v60 = vsel %vm490_vm1, 0.0, %v487_v58 }
 0x137   : > { %v492_v62 = vsel %vm490_vm1, %v487_v58, %v489_v59  ;;  %v513_v63 = vmul.f32 %v504_v54, %v498_v60  ;;  %v664_v58 = vrot.slane %v1182_v48, %v1578_v51 }
 0x138   : > { %v514_v1 = vmul.f32 %v508_v55, %v492_v62 }
 0x139   : > { %v520_v3 = vpop.permute.xlu0 %519  ;;  %v1205_v4 = vpack.c.bf16 %v513_v63, %v511_v61 }
 0x13a   : > { %v522_v5 = vpop.permute.xlu1 %521  ;;  %v1203_v6 = vpack.c.bf16 %v514_v1, %v512_v0  ;;  %v534_v9 = vsel %vm527_vm2, 0.0, %v520_v3  ;;  %v660_v1 = vrot.slane %v1182_v48, %v1573_v49 }
 0x13b   : > { %v528_v10 = vsel %vm527_vm2, %v520_v3, %v522_v5  ;;  %v549_v14 = vmul.f32 %v542_v7, %v534_v9 }
 0x13c   : > { %1204 = vmatprep.subr.bf16.mxu0 %v1203_v6  ;;  %1243 = vmatprep.subr.bf16.mxu1 %v1203_v6  ;;  %v550_v17 = vmul.f32 %v546_v8, %v528_v10 }
 0x13d   : > { %1206 = vmatpush1.bf16.msra.mxu0 %v1205_v4  ;;  %1253 = vmatpush1.bf16.msra.mxu1 %v1205_v4  ;;  %v524_v11 = vpop.permute.xlu0 %523  ;;  %v1183_v4 = vld [vmem:[%s1768_s3 + $0x6] ss:$8 sm:$0x3] }
 0x13e   : > { %v526_v12 = vpop.permute.xlu1 %525  ;;  %v535_v13 = vsel %vm527_vm2, 0.0, %v524_v11  ;;  %v702_v10 = vrot.slane %v1183_v4, %v1578_v51 }
 0x13f   : > { %v529_v15 = vsel %vm527_vm2, %v524_v11, %v526_v12  ;;  %v551_v16 = vmul.f32 %v542_v7, %v535_v13 }
 0x140   : > { %v552_v18 = vmul.f32 %v546_v8, %v529_v15 }
 0x141   : > { %v558_v20 = vpop.permute.xlu0 %557  ;;  %v1209_v21 = vpack.c.bf16 %v551_v16, %v549_v14 }
 0x142   : > { %v560_v22 = vpop.permute.xlu1 %559  ;;  %v1207_v23 = vpack.c.bf16 %v552_v18, %v550_v17  ;;  %v572_v26 = vsel %vm565_vm3, 0.0, %v558_v20  ;;  %v698_v18 = vrot.slane %v1183_v4, %v1573_v49 }
 0x143   : > { %v566_v27 = vsel %vm565_vm3, %v558_v20, %v560_v22  ;;  %v587_v31 = vmul.f32 %v580_v24, %v572_v26  ;;  %v1184_v20 = vld [vmem:[%s1768_s3 + $0x7] ss:$8 sm:$0x3] }
 0x144   : > { %1208 = vmatprep.subr.bf16.mxu0 %v1207_v23  ;;  %1244 = vmatprep.subr.bf16.mxu1 %v1207_v23  ;;  %v588_v34 = vmul.f32 %v584_v25, %v566_v27  ;;  %v740_v26 = vrot.slane %v1184_v20, %v1578_v51 }
 0x145   : > { %1210 = vmatpush1.bf16.msra.mxu0 %v1209_v21  ;;  %1254 = vmatpush1.bf16.msra.mxu1 %v1209_v21  ;;  %v562_v28 = vpop.permute.xlu0 %561 }
 0x146   : > { %v564_v29 = vpop.permute.xlu1 %563  ;;  %v573_v30 = vsel %vm565_vm3, 0.0, %v562_v28 }
 0x147   : > { %v567_v32 = vsel %vm565_vm3, %v562_v28, %v564_v29  ;;  %v589_v33 = vmul.f32 %v580_v24, %v573_v30 }
 0x148   : > { %v590_v35 = vmul.f32 %v584_v25, %v567_v32 }
 0x149   : > { %v596_v37 = vpop.permute.xlu0 %595  ;;  %v1213_v38 = vpack.c.bf16 %v589_v33, %v587_v31 }
 0x14a   : > { %v598_v39 = vpop.permute.xlu1 %597  ;;  %v1211_v40 = vpack.c.bf16 %v590_v35, %v588_v34  ;;  %v610_v45 = vsel %vm603_vm4, 0.0, %v596_v37  ;;  %v736_v34 = vrot.slane %v1184_v20, %v1573_v49 }
 0x14b   : > { %v604_v46 = vsel %vm603_vm4, %v596_v37, %v598_v39  ;;  %v625_v53 = vmul.f32 %v618_v43, %v610_v45  ;;  %v778_v45 = vrot.slane %v1185_v36, %v1578_v51 }
 0x14c   : > { %1212 = vmatprep.subr.bf16.mxu0 %v1211_v40  ;;  %1245 = vmatprep.subr.bf16.mxu1 %v1211_v40  ;;  %v626_v56 = vmul.f32 %v622_v44, %v604_v46 }
 0x14d   : > { %1214 = vmatpush1.bf16.msra.mxu0 %v1213_v38  ;;  %1255 = vmatpush1.bf16.msra.mxu1 %v1213_v38  ;;  %v600_v47 = vpop.permute.xlu0 %599 }
 0x14e   : > { %v602_v50 = vpop.permute.xlu1 %601  ;;  %v611_v52 = vsel %vm603_vm4, 0.0, %v600_v47 }
 0x14f   : > { %v605_v54 = vsel %vm603_vm4, %v600_v47, %v602_v50  ;;  %v627_v55 = vmul.f32 %v618_v43, %v611_v52 }
 0x150   : > { %v628_v57 = vmul.f32 %v622_v44, %v605_v54 }
 0x151   : > { %v640_v59 = vpop.permute.xlu0 %639  ;;  %v1217_v60 = vpack.c.bf16 %v627_v55, %v625_v53  ;;  %v774_v55 = vrot.slane %v1185_v36, %v1573_v49  ;;  %v791_v49 = vld [vmem:[%s408_s22 + $0x10] sm:$0xff] }
 0x152   : > { %v644_v61 = vpop.permute.xlu1 %643  ;;  %v652_v62 = vsel %vm645_vm5, %v640_v59, 0.0  ;;  %v1215_v63 = vpack.c.bf16 %v628_v57, %v626_v56 }
 0x153   : > { %v653_v0 = vsel %vm645_vm5, %v644_v61, 0.0  ;;  %v668_v3 = vmul.f32 %v664_v58, %v652_v62 }
 0x154   : > { %v670_v2 = vmul.f32 %v664_v58, %v653_v0  ;;  %1216 = vmatprep.subr.bf16.mxu0 %v1215_v63  ;;  %1246 = vmatprep.subr.bf16.mxu1 %v1215_v63 }
 0x155   : > { %1218 = vmatpush1.bf16.msra.mxu0 %v1217_v60  ;;  %1256 = vmatpush1.bf16.msra.mxu1 %v1217_v60  ;;  %v638_v5 = vpop.permute.xlu0 %637  ;;  %v790_v60 = vld [vmem:[%s408_s22 + $0x8] sm:$0xff] }
 0x156   : > { %v642_v6 = vpop.permute.xlu1 %641  ;;  %1220 = vmatprep.subr.bf16.mxu0 %v1559_v42  ;;  %1247 = vmatprep.subr.bf16.mxu1 %v1559_v42  ;;  %v646_v7 = vsel %vm645_vm5, %v638_v5, %v640_v59  ;;  %v1223_v12 = vpack.c.bf16 %v670_v2, %v668_v3  ;;  %v789_v2 = vld [vmem:[%s408_s22] sm:$0xff] }
 0x157   : > { %v647_v8 = vsel %vm645_vm5, %v642_v6, %v644_v61  ;;  %v667_v9 = vmul.f32 %v660_v1, %v646_v7  ;;  %v792_v61 = vld [vmem:[%s408_s22 + $0x18] sm:$0xff]  ;;  %v1241_v4 = vpack.c.bf16 %v791_v49, %v789_v2  ;;  %v797_v5 = vld [vmem:[%s1769_s4] sm:$0xff]  ;;  %v799_v6 = vld [vmem:[%s1769_s4 + $0x10] sm:$0xff]  ;;  %s1775_s22 = sshll.u32 %s1516_s13, 8 }
 0x158   : > { %v669_v11 = vmul.f32 %v660_v1, %v647_v8  ;;  %v1239_v1 = vpack.c.bf16 %v792_v61, %v790_v60  ;;  %s1677_s25 = scalar_lea.hbm %s1773_s8, %s1775_s22 }
 0x159   : > { %1222 = vmatpush1.bf16.msra.mxu0 %v1557_v41  ;;  %1257 = vmatpush1.bf16.msra.mxu1 %v1557_v41  ;;  %v678_v13 = vpop.permute.xlu0 %677 }
 0x15a   : > { %v682_v14 = vpop.permute.xlu1 %681  ;;  %v690_v15 = vsel %vm683_vm6, %v678_v13, 0.0  ;;  %1224 = vmatprep.subr.bf16.mxu0 %v1223_v12  ;;  %1248 = vmatprep.subr.bf16.mxu1 %v1223_v12  ;;  %v1225_v42 = vpack.c.bf16 %v669_v11, %v667_v9 }
 0x15b   : > { %v691_v16 = vsel %vm683_vm6, %v682_v14, 0.0  ;;  %v706_v17 = vmul.f32 %v702_v10, %v690_v15 }
 0x15c   : > { %v708_v19 = vmul.f32 %v702_v10, %v691_v16 }
 0x15d   : > { %1226 = vmatpush1.bf16.msra.mxu0 %v1225_v42  ;;  %1258 = vmatpush1.bf16.msra.mxu1 %v1225_v42  ;;  %v676_v41 = vpop.permute.xlu0 %675 }
 0x15e   : > { %v680_v21 = vpop.permute.xlu1 %679  ;;  %v684_v22 = vsel %vm683_vm6, %v676_v41, %v678_v13  ;;  %v1227_v23 = vpack.c.bf16 %v708_v19, %v706_v17 }
 0x15f   : > { %v685_v24 = vsel %vm683_vm6, %v680_v21, %v682_v14  ;;  %v705_v25 = vmul.f32 %v698_v18, %v684_v22 }
 0x160   : > { %v707_v27 = vmul.f32 %v698_v18, %v685_v24  ;;  %1228 = vmatprep.subr.bf16.mxu0 %v1227_v23  ;;  %1249 = vmatprep.subr.bf16.mxu1 %v1227_v23 }
 0x161   : > { %v716_v28 = vpop.permute.xlu0 %715 }
 0x162   : > { %v720_v29 = vpop.permute.xlu1 %719  ;;  %v728_v30 = vsel %vm721_vm7, %v716_v28, 0.0  ;;  %v1229_v31 = vpack.c.bf16 %v707_v27, %v705_v25 }
 0x163   : > { %v729_v32 = vsel %vm721_vm7, %v720_v29, 0.0  ;;  %v744_v33 = vmul.f32 %v740_v26, %v728_v30 }
 0x164   : > { %v746_v35 = vmul.f32 %v740_v26, %v729_v32  ;;  %1230 = vmatpush1.bf16.msra.mxu0 %v1229_v31  ;;  %1259 = vmatpush1.bf16.msra.mxu1 %v1229_v31 }
 0x165   : > { %v714_v37 = vpop.permute.xlu0 %713 }
 0x166   : > { %v718_v38 = vpop.permute.xlu1 %717  ;;  %v722_v39 = vsel %vm721_vm7, %v714_v37, %v716_v28  ;;  %v1231_v40 = vpack.c.bf16 %v746_v35, %v744_v33 }
 0x167   : > { %v723_v43 = vsel %vm721_vm7, %v718_v38, %v720_v29  ;;  %v743_v44 = vmul.f32 %v736_v34, %v722_v39 }
 0x168   : > { %v745_v46 = vmul.f32 %v736_v34, %v723_v43  ;;  %1232 = vmatprep.subr.bf16.mxu0 %v1231_v40  ;;  %1250 = vmatprep.subr.bf16.mxu1 %v1231_v40 }
 0x169   : > { %v754_v47 = vpop.permute.xlu0 %753 }
 0x16a   : > { %v758_v48 = vpop.permute.xlu1 %757  ;;  %v766_v50 = vsel %vm759_vm8, %v754_v47, 0.0  ;;  %v1233_v52 = vpack.c.bf16 %v745_v46, %v743_v44 }
 0x16b   : > { %v767_v53 = vsel %vm759_vm8, %v758_v48, 0.0  ;;  %v782_v54 = vmul.f32 %v778_v45, %v766_v50 }
 0x16c   : > { %v784_v56 = vmul.f32 %v778_v45, %v767_v53  ;;  %1234 = vmatpush1.bf16.msra.mxu0 %v1233_v52  ;;  %1260 = vmatpush1.bf16.msra.mxu1 %v1233_v52 }
 0x16d   : > { %v752_v51 = vpop.permute.xlu0 %751 }
 0x16e   : > { %v756_v57 = vpop.permute.xlu1 %755  ;;  %v760_v58 = vsel %vm759_vm8, %v752_v51, %v754_v47  ;;  %v1235_v59 = vpack.c.bf16 %v784_v56, %v782_v54 }
 0x16f   : > { %v761_v62 = vsel %vm759_vm8, %v756_v57, %v758_v48  ;;  %v781_v63 = vmul.f32 %v774_v55, %v760_v58 }
 0x170   : > { %v783_v0 = vmul.f32 %v774_v55, %v761_v62  ;;  %1236 = vmatprep.subr.bf16.mxu0 %v1235_v59  ;;  %1251 = vmatprep.subr.bf16.mxu1 %v1235_v59 }
 0x172   : > { %v1237_v3 = vpack.c.bf16 %v783_v0, %v781_v63 }
 0x174   : > { %1238 = vmatpush1.bf16.msra.mxu0 %v1237_v3  ;;  %1261 = vmatpush1.bf16.msra.mxu1 %v1237_v3 }
 0x175   : > { %1240 = vmatprep.subr.bf16.mxu0 %v1239_v1  ;;  %1252 = vmatprep.subr.bf16.mxu1 %v1239_v1 }
 0x178   : > { %1242 = vmatpush1.bf16.msra.mxu0 %v1241_v4  ;;  %1262 = vmatpush1.bf16.msra.mxu1 %v1241_v4 }
 0x17b   : > { %925 = vmatmul.mubr.f32.vlgmr.msra.gmra.mrb[0].mxu0 %v797_v5  ;;  %931 = vmatmul.mubr.f32.vlgmr.msra.gmra.mrb[0].mxu1 %v799_v6 }
 0x17e   : > { %v846_v8 = vpop.permute.xlu0 %845 }
 0x17f   : > { %v851_v7 = vpop.permute.xlu1 %850 }
 0x24e   : > { %v926_v9 = vpop.f32.mrb[0].mxu0  ;;  %v932_v10 = vpop.f32.mrb[0].mxu1 }
 0x24f   : > { %v927_v11 = vadd.f32 %v926_v9, %v846_v8  ;;  %v933_v12 = vadd.f32 %v932_v10, %v851_v7  ;;  %v928_v13 = vpop.f32.mrb[1].mxu0  ;;  %v934_v14 = vpop.f32.mrb[1].mxu1 }
 0x250   : > { %v929_v15 = vadd.f32 %v928_v13, %v846_v8  ;;  %v935_v42 = vadd.f32 %v934_v14, %v851_v7 }
 0x251   : > { %937 = vst [vmem:[%s413_s14] sm:$0xff] %v927_v11  ;;  %939 = vst [vmem:[%s413_s14 + $0x10] sm:$0xff] %v933_v12  ;;  %v949_v16 = vmul.f32 %v927_v11, %v927_v11  ;;  %v951_v17 = vmul.f32 %v933_v12, %v933_v12 }
 0x252   : > { %938 = vst [vmem:[%s413_s14 + $0x8] sm:$0xff] %v929_v15  ;;  %940 = vst [vmem:[%s413_s14 + $0x18] sm:$0xff] %v935_v42  ;;  %v944_v18 = vadd.f32 %v935_v42, %v933_v12  ;;  %v941_v19 = vadd.f32 %v929_v15, %v927_v11  ;;  %v950_v20 = vmul.f32 %v929_v15, %v929_v15  ;;  %s1340_s14 = sshll.u32 %s1441_s28, 4  ;;  %s1341_s14 = int_to_ptr.vmem [resolvable:$false] %s1340_s14 }
 0x253   : > { %v952_v41 = vmul.f32 %v935_v42, %v935_v42  ;;  %s1342_s23 = scalar_lea.vmem %s1341_s14, 512  ;;  %p1343_p0 = scmp.lt.s32.totalorder %s1670_s21, %s1341_s14 }
 0x254   : > { %945 = vadd.xlane.f32.xlu1 %v944_v18  ;;  %942 = vadd.xlane.f32.xlu0 %v941_v19  ;;  %v953_v21 = vadd.f32 %v950_v20, %v949_v16  ;;  %p1344_p1 = scmp.lt.s32.totalorder %s1342_s23, %s1336_s27 }
 0x255   : > { %v956_v22 = vadd.f32 %v952_v41, %v951_v17 }
 0x256   : > { %p1345_p2 = por %p1344_p1, %p1343_p0 }
 0x258   : > { %954 = vadd.xlane.f32.xlu0 %v953_v21  ;;  %p1346_p3 = pnand %p1345_p2, %p1339_p13 }
 0x25c   : > { %957 = vadd.xlane.f32.xlu0 %v956_v22 }
 0x2e1   : > { %v946_v23 = vpop.xlane.xlu1 %945  ;;  %v943_v24 = vpop.xlane.xlu0 %942 }
 0x2e2   : > { %948 = vst.msk [vmem:[%s381_s17 + $0x8] sm:$0xff] %vm603_vm4, %v946_v23  ;;  %947 = vst.msk [vmem:[%s381_s17] sm:$0xff] %vm603_vm4, %v943_v24 }
 0x2e3   : > { %1349 = shalt.err (!%p1346_p3)
}
 0x2e4   : > { %s1350_s17 = scalar_lea.hbm %s1677_s25, 256  ;;  %s1354_s28 = scalar_lea.hbm %s1773_s8, 512 }
 0x2e5   : > { %p1351_p4 = scmp.ne.s32.totalorder %s1677_s25, %s1350_s17  ;;  %p1355_p9 = scmp.lt.u32.totalorder %s1677_s25, %s1773_s8 }
 0x2e6   : > { %p1356_p10 = scmp.lt.u32.totalorder %s1354_s28, %s1350_s17  ;;  %p1358_p12 = scmp.lt.u32.totalorder %s1350_s17, %s1677_s25 }
 0x2e7   : > { %p1352_p7 = pnand %p1351_p4, %p1533_p5 }
 0x2e8   : > { %p1357_p11 = por %p1356_p10, %p1355_p9 }
 0x2e9   : > { %p1353_p8 = pneg %p1352_p7 }
 0x2ea   : > { %p1359_p13 = por %p1358_p12, %p1357_p11 }
 0x2ec   : > { %p1360_p0 = pnand %p1359_p13, %p1353_p8 }
 0x2ee   : > { %1363 = shalt.err (!%p1360_p0)
}
 0x2ef   : > { %s1442_s27 = smov 128   ;;  %s1443_s22 = smov 8   ;;  %v955_v25 = vpop.xlane.xlu0 %954 }
 0x2f0   : > { %1263 = dma.vmem_to_hbm [thread:$0]  (%p1533_p5), %s1670_s21, 256, %s1677_s25, %s967_s26, %s1442_s27, %s1442_s27, %s1443_s22  }
 0x2f1   : > { %s1781_s16 = sshll.u32 %s1664_s29, 4  ;;  %s1782_s24 = sshll.u32 %s1516_s13, 8 }
 0x2f2   : > { %s388_s23 = scalar_lea.vmem [#allocation5], %s1781_s16  ;;  %s1718_s0 = scalar_lea.hbm %s1774_s9, %s1782_s24 }
 0x2f3   : > { %s1004_s17 = sshll.u32 %s388_s23, 4  ;;  %959 = vst.msk [vmem:[%s388_s23] sm:$0xff] %vm603_vm4, %v955_v25  ;;  %v958_v26 = vpop.xlane.xlu0 %957  ;;  %s972_s21 = scalar_lea.sflag [#allocation6], %s1664_s29  ;;  %s1711_s17 = int_to_ptr.vmem [resolvable:$true] %s1004_s17 }
 0x2f4   : > { %960 = vst.msk [vmem:[%s388_s23 + $0x8] sm:$0xff] %vm603_vm4, %v958_v26  ;;  %s1364_s25 = scalar_lea.vmem %s1711_s17, 256  ;;  %s1444_s26 = smov [#allocation5]  }
 0x2f5   : > { %p1365_p1 = scmp.ne.s32.totalorder %s1711_s17, %s1364_s25  ;;  %s1368_s16 = sshll.u32 %s1444_s26, 4  ;;  %s1369_s16 = int_to_ptr.vmem [resolvable:$false] %s1368_s16 }
 0x2f6   : > { %s1370_s13 = scalar_lea.vmem %s1369_s16, 512  ;;  %p1371_p4 = scmp.lt.s32.totalorder %s1711_s17, %s1369_s16 }
 0x2f7   : > { %p1366_p2 = pnand %p1365_p1, %p1533_p5  ;;  %p1372_p7 = scmp.lt.s32.totalorder %s1370_s13, %s1364_s25 }
 0x2f9   : > { %p1367_p3 = pneg %p1366_p2  ;;  %p1373_p8 = por %p1372_p7, %p1371_p4 }
 0x2fb   : > { %p1374_p9 = pnand %p1373_p8, %p1367_p3 }
 0x2fd   : > { %1377 = shalt.err (!%p1374_p9)
}
 0x2fe   : > { %s1378_s23 = scalar_lea.hbm %s1718_s0, 256  ;;  %s1382_s14 = scalar_lea.hbm %s1774_s9, 512 }
 0x2ff   : > { %p1379_p10 = scmp.ne.s32.totalorder %s1718_s0, %s1378_s23  ;;  %p1383_p13 = scmp.lt.u32.totalorder %s1718_s0, %s1774_s9 }
 0x300   : > { %p1384_p0 = scmp.lt.u32.totalorder %s1382_s14, %s1378_s23  ;;  %p1386_p2 = scmp.lt.u32.totalorder %s1378_s23, %s1718_s0 }
 0x301   : > { %p1380_p11 = pnand %p1379_p10, %p1533_p5 }
 0x302   : > { %p1385_p1 = por %p1384_p0, %p1383_p13 }
 0x303   : > { %p1381_p12 = pneg %p1380_p11 }
 0x304   : > { %p1387_p3 = por %p1386_p2, %p1385_p1 }
 0x306   : > { %p1388_p4 = pnand %p1387_p3, %p1381_p12 }
 0x308   : > { %1391 = shalt.err (!%p1388_p4)
}
 0x309   : > { %1264 = dma.vmem_to_hbm [thread:$0]  (%p1533_p5), %s1711_s17, 256, %s1718_s0, %s972_s21, %s1442_s27, %s1442_s27, %s1443_s22  }
 0x30a PF: > { %p1274_p7 = scmp.ge.s32.totalorder %s1430_s12, 2  ;;  %s1027_s25 = sand.u32 1, %s1418_s30  }
 0x30b   : > { %s1028_s13 = scalar_lea.sflag [#allocation4], %s1027_s25 }
 0x30c   : > { %p1268_p8 = pnand %p1274_p7, %p1537_p6 }
 0x30e   : > { %1409 = dma.done.wait (!%p1268_p8), %s1028_s13, 256  }
 0x30f   : > { %1411 = vsyncadd (!%p1268_p8), %s1028_s13, 4294967040  ;;  %s1037_s19 = scalar_lea.sflag [#allocation6], %s1027_s25 }
 0x310   : > { %1413 = dma.done.wait (!%p1268_p8), %s1037_s19, 256  }
 0x311   : > { %1415 = vsyncadd (!%p1268_p8), %s1037_s19, 4294967040  ;;  %p23_p5 = scmp.ge.s32.totalorder %s1520_s15, 4   ;;  %s1783_s30 = smov %s1422_s10 }
 0x312   : > { %s1784_s10 = smov %s1426_s11  ;;  %s1785_s11 = smov %s1531_s18 }
 0x313   : > { %s1786_s12 = smov %s1520_s15  ;;  %25 = sbr.rel (!%p23_p5) target bundleno = 7 (0x7), region = 128 }
 0x31a   :  { %1042 = vsyncpa [#allocation4], 1 }
 0x31b   :  { %1044 = vsyncpa [#allocation4 + $0x1], 1 }
 0x31c   :  { %1045 = vsyncpa [#allocation6], 1 }
 0x31d   :  { %1047 = vsyncpa [#allocation6 + $0x1], 1 }

</bundles_post_ra>
